<compile_context>
chip_gen: v5e
topology: v5e:2x2
jax: 0.10.0
libtpu: 0.0.40
codegen_flags: <defaults>
</compile_context>

<pallas_src>
import functools

import jax
import jax.numpy as jnp
import numpy as np
from jax import lax
from jax.experimental import pallas as pl
from jax.experimental.pallas import tpu as pltpu


def _round_up(x, m):
    return (x + m - 1) // m * m


# ----------------------------- Pallas kernel ------------------------------


def _gru_cell(x, h, w, u, bi, bh):
    """PyTorch GRUCell math with gate-major (per-gate) weights.

    w, u:   tuples of 3 arrays (r, z, n): (E, H) / (H, H)
    bi, bh: tuples of 3 arrays (1, H)
    """
    gi_r = jnp.dot(x, w[0], preferred_element_type=jnp.float32) + bi[0]
    gi_z = jnp.dot(x, w[1], preferred_element_type=jnp.float32) + bi[1]
    gi_n = jnp.dot(x, w[2], preferred_element_type=jnp.float32) + bi[2]
    gh_r = jnp.dot(h, u[0], preferred_element_type=jnp.float32) + bh[0]
    gh_z = jnp.dot(h, u[1], preferred_element_type=jnp.float32) + bh[1]
    gh_n = jnp.dot(h, u[2], preferred_element_type=jnp.float32) + bh[2]
    r = jax.nn.sigmoid(gi_r + gh_r)
    z = jax.nn.sigmoid(gi_z + gh_z)
    n = jnp.tanh(gi_n + r * gh_n)
    return (1.0 - z) * n + z * h


def seq2seq_kernel(tf_ref, src_ids_ref, tgt_ids_ref,
                   enc_emb_ref, enc_wih_ref, enc_whh_ref, enc_bih_ref, enc_bhh_ref,
                   dec_emb_ref, dec_wih_ref, dec_whh_ref, dec_bih_ref, dec_bhh_ref,
                   wfc_ref, bfc_ref, out_ref, *, vocab):
    # tf_ref:       (T,)          int32 SMEM  (1 = teacher force this step)
    # src_ids_ref:  (T+1, Bp, 1)  int32 VMEM  (un-reversed; reversal done via indexing)
    # tgt_ids_ref:  (T+1, Bp, 1)  int32 VMEM
    # enc/dec_emb:  (Vp, E)       f32   (vocab rows zero-padded to Vp)
    # *_wih/ *_whh: (3, E, H) / (3, H, H)  gate-major GRU weights (r, z, n)
    # *_bih/ *_bhh: (3, 1, H)
    # wfc / bfc:    (H, Vp) / (1, Vp)      (padded vocab columns are zero)
    # out_ref:      (T, Bp, Vp)   f32 per-step logits (lane-dense stores)
    Tsrc = src_ids_ref.shape[0]                      # T + 1
    T, Bp, Vp = out_ref.shape
    H = enc_whh_ref.shape[1]

    # -------- hoisted loop invariants (JAX does not CSE broadcast_in_dim) --------
    col = lax.broadcasted_iota(jnp.int32, (Bp, Vp), 1)
    valid = col < vocab
    neg_inf = jnp.full((Bp, Vp), -jnp.inf, jnp.float32)

    def embed(ids, table):                           # ids: (Bp, 1) int32
        onehot = (col == ids).astype(jnp.float32)    # (Bp, Vp)
        return jnp.dot(onehot, table, preferred_element_type=jnp.float32)

    # ---------------------------------- encoder ----------------------------------
    enc_emb = enc_emb_ref[...]
    enc_w = tuple(enc_wih_ref[g] for g in range(3))
    enc_u = tuple(enc_whh_ref[g] for g in range(3))
    enc_bi = tuple(enc_bih_ref[g] for g in range(3))
    enc_bh = tuple(enc_bhh_ref[g] for g in range(3))

    def enc_step(t, h):
        ids = src_ids_ref[Tsrc - 1 - t]              # source = fliplr(source)
        return _gru_cell(embed(ids, enc_emb), h, enc_w, enc_u, enc_bi, enc_bh)

    h = lax.fori_loop(0, Tsrc, enc_step,
                      jnp.zeros((Bp, H), jnp.float32), unroll=True)

    # ---------------------------------- decoder ----------------------------------
    dec_emb = dec_emb_ref[...]
    dec_w = tuple(dec_wih_ref[g] for g in range(3))
    dec_u = tuple(dec_whh_ref[g] for g in range(3))
    dec_bi = tuple(dec_bih_ref[g] for g in range(3))
    dec_bh = tuple(dec_bhh_ref[g] for g in range(3))
    wfc = wfc_ref[...]
    bfc = bfc_ref[...]

    x0 = embed(tgt_ids_ref[0], dec_emb)              # <sos> embedding

    def dec_step(t, carry):
        x, hh = carry                                # state stays in vregs
        hh = _gru_cell(x, hh, dec_w, dec_u, dec_bi, dec_bh)
        logits = jnp.dot(hh, wfc, preferred_element_type=jnp.float32) + bfc
        out_ref[t] = logits                          # lane-dense (Bp, Vp) store

        # argmax (first max) over the real vocab columns -> feedback token id
        masked = jnp.where(valid, logits, neg_inf)
        maxv = jnp.max(masked, axis=-1, keepdims=True)
        pred_ids = jnp.min(jnp.where(masked == maxv, col, Vp),
                           axis=-1, keepdims=True)   # (Bp, 1) int32
        next_ids = jnp.where(tf_ref[t] > 0, tgt_ids_ref[t + 1], pred_ids)
        return embed(next_ids, dec_emb), hh

    lax.fori_loop(0, T, dec_step, (x0, h), unroll=True)


# ------------------------------ JAX wrappers --------------------------------


def seq2seq_pallas(tf_mask, src_ids, tgt_ids, kp, *, vocab):
    Tp1, Bp, _ = src_ids.shape
    T = Tp1 - 1
    Vp = kp["wfc"].shape[1]
    smem = pl.BlockSpec(memory_space=pltpu.MemorySpace.SMEM)
    vmem = pl.BlockSpec(memory_space=pltpu.MemorySpace.VMEM)
    return pl.pallas_call(
        functools.partial(seq2seq_kernel, vocab=vocab),
        out_shape=jax.ShapeDtypeStruct((T, Bp, Vp), jnp.float32),
        in_specs=[smem] + [vmem] * 14,
        out_specs=vmem,
        compiler_params=pltpu.CompilerParams(vmem_limit_bytes=32 * 1024 * 1024),
    )(tf_mask, src_ids, tgt_ids,
      kp["enc_emb"], kp["enc_wih"], kp["enc_whh"], kp["enc_bih"], kp["enc_bhh"],
      kp["dec_emb"], kp["dec_wih"], kp["dec_whh"], kp["dec_bih"], kp["dec_bhh"],
      kp["wfc"], kp["bfc"])


def pack_params(p, *, v_pad):
    """Re-layout PyTorch-style params for the kernel: gate-major stacking of the
    3H GRU weight axes and vocab padded to a lane multiple (zero rows/cols)."""
    H = p["enc_whh"].shape[0]

    def split_gates(w):                              # (..., 3H) -> (3, ..., H)
        return jnp.stack([w[..., g * H:(g + 1) * H] for g in range(3)], axis=0)

    def pad_rows(a):
        return jnp.pad(a, ((0, v_pad - a.shape[0]), (0, 0)))

    def pad_cols(a):
        return jnp.pad(a, ((0, 0), (0, v_pad - a.shape[1])))

    return {
        "enc_emb": pad_rows(p["enc_emb"]),           # (Vp, E)
        "enc_wih": split_gates(p["enc_wih"]),        # (3, E, H)
        "enc_whh": split_gates(p["enc_whh"]),        # (3, H, H)
        "enc_bih": split_gates(p["enc_bih"]),        # (3, 1, H)
        "enc_bhh": split_gates(p["enc_bhh"]),
        "dec_emb": pad_rows(p["dec_emb"]),
        "dec_wih": split_gates(p["dec_wih"]),
        "dec_whh": split_gates(p["dec_whh"]),
        "dec_bih": split_gates(p["dec_bih"]),
        "dec_bhh": split_gates(p["dec_bhh"]),
        "wfc": pad_cols(p["wfc"]),                   # (H, Vp)
        "bfc": pad_cols(p["bfc"]),                   # (1, Vp)
    }


@functools.partial(jax.jit, static_argnames=("vocab", "teacher_forcing_ratio"))
def seq2seq_forward(kernel_params, source, target, vocab, teacher_forcing_ratio, tf_key):
    """source, target: (B, T+1) int32 token ids. Returns logits (B, V, T)."""
    B, Tp1 = source.shape
    T = Tp1 - 1
    Bp = max(8, _round_up(B, 8))                     # sublane-pad the batch

    def to_kernel_ids(tok):                          # (B, T+1) -> (T+1, Bp, 1) int32
        t = jnp.transpose(tok.astype(jnp.int32), (1, 0))
        t = jnp.pad(t, ((0, 0), (0, Bp - B)))
        return t[:, :, None]

    src_ids = to_kernel_ids(source)                  # reversal happens in-kernel
    tgt_ids = to_kernel_ids(target)

    tf_mask = (jax.random.uniform(tf_key, (T,))
               < teacher_forcing_ratio).astype(jnp.int32)

    out_tbv = seq2seq_pallas(tf_mask, src_ids, tgt_ids, kernel_params, vocab=vocab)

    # Slice off the batch / vocab padding and return the PyTorch (B, V, T) layout.
    # TODO(synk): a fused consumer should keep the time-major (T, B, V) layout and
    #             argmax over the last axis to avoid this extra transpose pass.
    return jnp.transpose(out_tbv[:, :B, :vocab], (1, 2, 0))


# ---------------------------- pure-JAX reference -----------------------------


def _gru_ref(x, h, wih, whh, bih, bhh):
    H = h.shape[1]
    gi = x @ wih + bih
    gh = h @ whh + bhh
    r = jax.nn.sigmoid(gi[:, :H] + gh[:, :H])
    z = jax.nn.sigmoid(gi[:, H:2 * H] + gh[:, H:2 * H])
    n = jnp.tanh(gi[:, 2 * H:] + r * gh[:, 2 * H:])
    return (1.0 - z) * n + z * h


def seq2seq_ref(params, source, target, teacher_forcing_ratio, tf_key):
    B, Tp1 = source.shape
    T = Tp1 - 1
    H = params["enc_whh"].shape[0]

    src_rev = jnp.fliplr(source)
    h = jnp.zeros((B, H), jnp.float32)
    for t in range(Tp1):
        x = params["enc_emb"][src_rev[:, t]]
        h = _gru_ref(x, h, params["enc_wih"], params["enc_whh"],
                     params["enc_bih"], params["enc_bhh"])

    tf_mask = (jax.random.uniform(tf_key, (T,)) < teacher_forcing_ratio)
    outs = []
    inp = target[:, 0]
    for t in range(T):
        x = params["dec_emb"][inp]
        h = _gru_ref(x, h, params["dec_wih"], params["dec_whh"],
                     params["dec_bih"], params["dec_bhh"])
        logits = h @ params["wfc"] + params["bfc"]
        outs.append(logits)
        top1 = jnp.argmax(logits, axis=-1)
        inp = jnp.where(tf_mask[t], target[:, t + 1], top1)
    return jnp.stack(outs, axis=-1)                  # (B, V, T)


# --------------------------------- setup -------------------------------------


def init_params(key, V, E, H):
    ks = jax.random.split(key, 12)
    s = 1.0 / np.sqrt(H)
    u = lambda k, shape: jax.random.uniform(k, shape, jnp.float32, -s, s)
    return {
        "enc_emb": jax.random.normal(ks[0], (V, E), jnp.float32),
        "enc_wih": u(ks[1], (E, 3 * H)),
        "enc_whh": u(ks[2], (H, 3 * H)),
        "enc_bih": u(ks[3], (1, 3 * H)),
        "enc_bhh": u(ks[4], (1, 3 * H)),
        "dec_emb": jax.random.normal(ks[5], (V, E), jnp.float32),
        "dec_wih": u(ks[6], (E, 3 * H)),
        "dec_whh": u(ks[7], (H, 3 * H)),
        "dec_bih": u(ks[8], (1, 3 * H)),
        "dec_bhh": u(ks[9], (1, 3 * H)),
        "wfc":     u(ks[10], (H, V)),
        "bfc":     u(ks[11], (1, V)),
    }


if __name__ == "__main__":
    B, T, V, E, H = 2, 8, 16, 16, 32                 # source/target: (B, T+1)
    key = jax.random.PRNGKey(0)
    kp_, ks, kt, ktf = jax.random.split(key, 4)

    params = init_params(kp_, V, E, H)
    kernel_params = pack_params(params, v_pad=_round_up(V, 128))

    source = jax.random.randint(ks, (B, T + 1), 0, V, dtype=jnp.int32)
    target = jax.random.randint(kt, (B, T + 1), 0, V, dtype=jnp.int32)
    teacher_forcing_ratio = 0.5

    out = seq2seq_forward(kernel_params, source, target, V,
                          teacher_forcing_ratio, ktf)
    out = jax.block_until_ready(out)
    assert out.shape == (B, V, T)

    ref = seq2seq_ref(params, source, target, teacher_forcing_ratio, ktf)
    np.testing.assert_allclose(np.asarray(out), np.asarray(ref),
                               rtol=1e-2, atol=1e-3)
    print("KERNEL_OK")
</pallas_src>

<mosaic_0001>
module attributes {stable_mosaic.version = 11 : i64} {
  func.func @seq2seq_kernel(%arg0: memref<8xi32, #tpu.memory_space<smem>>, %arg1: memref<9x8x1xi32, #tpu.memory_space<vmem>>, %arg2: memref<9x8x1xi32, #tpu.memory_space<vmem>>, %arg3: memref<128x16xf32, #tpu.memory_space<vmem>>, %arg4: memref<3x16x32xf32, #tpu.memory_space<vmem>>, %arg5: memref<3x32x32xf32, #tpu.memory_space<vmem>>, %arg6: memref<3x1x32xf32, #tpu.memory_space<vmem>>, %arg7: memref<3x1x32xf32, #tpu.memory_space<vmem>>, %arg8: memref<128x16xf32, #tpu.memory_space<vmem>>, %arg9: memref<3x16x32xf32, #tpu.memory_space<vmem>>, %arg10: memref<3x32x32xf32, #tpu.memory_space<vmem>>, %arg11: memref<3x1x32xf32, #tpu.memory_space<vmem>>, %arg12: memref<3x1x32xf32, #tpu.memory_space<vmem>>, %arg13: memref<32x128xf32, #tpu.memory_space<vmem>>, %arg14: memref<1x128xf32, #tpu.memory_space<vmem>>, %arg15: memref<8x8x128xf32, #tpu.memory_space<vmem>>) attributes {dimension_semantics = [], scalar_prefetch = 0 : i64, scratch_operands = 0 : i64, tpu.core_type = #tpu.core_type<tc>} {
    %0 = tpu.iota {dimensions = array<i32: 1>} : vector<8x128xi32>
    %c16_i32 = arith.constant 16 : i32
    %1 = vector.broadcast %c16_i32 : i32 to vector<8x128xi32>
    %2 = arith.cmpi slt, %0, %1 : vector<8x128xi32>
    %cst = arith.constant 0xFF800000 : f32
    %3 = vector.broadcast %cst : f32 to vector<8x128xf32>
    %c0 = arith.constant 0 : index
    %c0_0 = arith.constant 0 : index
    %4 = vector.load %arg3[%c0, %c0_0] : memref<128x16xf32, #tpu.memory_space<vmem>>, vector<128x16xf32>
    %c0_1 = arith.constant 0 : index
    %c0_2 = arith.constant 0 : index
    %c0_3 = arith.constant 0 : index
    %5 = vector.load %arg4[%c0_1, %c0_2, %c0_3] : memref<3x16x32xf32, #tpu.memory_space<vmem>>, vector<1x16x32xf32>
    %6 = vector.shape_cast %5 : vector<1x16x32xf32> to vector<16x32xf32>
    %c1 = arith.constant 1 : index
    %c0_4 = arith.constant 0 : index
    %c0_5 = arith.constant 0 : index
    %7 = vector.load %arg4[%c1, %c0_4, %c0_5] : memref<3x16x32xf32, #tpu.memory_space<vmem>>, vector<1x16x32xf32>
    %8 = vector.shape_cast %7 : vector<1x16x32xf32> to vector<16x32xf32>
    %c2 = arith.constant 2 : index
    %c0_6 = arith.constant 0 : index
    %c0_7 = arith.constant 0 : index
    %9 = vector.load %arg4[%c2, %c0_6, %c0_7] : memref<3x16x32xf32, #tpu.memory_space<vmem>>, vector<1x16x32xf32>
    %10 = vector.shape_cast %9 : vector<1x16x32xf32> to vector<16x32xf32>
    %c0_8 = arith.constant 0 : index
    %c0_9 = arith.constant 0 : index
    %c0_10 = arith.constant 0 : index
    %11 = vector.load %arg5[%c0_8, %c0_9, %c0_10] : memref<3x32x32xf32, #tpu.memory_space<vmem>>, vector<1x32x32xf32>
    %12 = vector.shape_cast %11 : vector<1x32x32xf32> to vector<32x32xf32>
    %c1_11 = arith.constant 1 : index
    %c0_12 = arith.constant 0 : index
    %c0_13 = arith.constant 0 : index
    %13 = vector.load %arg5[%c1_11, %c0_12, %c0_13] : memref<3x32x32xf32, #tpu.memory_space<vmem>>, vector<1x32x32xf32>
    %14 = vector.shape_cast %13 : vector<1x32x32xf32> to vector<32x32xf32>
    %c2_14 = arith.constant 2 : index
    %c0_15 = arith.constant 0 : index
    %c0_16 = arith.constant 0 : index
    %15 = vector.load %arg5[%c2_14, %c0_15, %c0_16] : memref<3x32x32xf32, #tpu.memory_space<vmem>>, vector<1x32x32xf32>
    %16 = vector.shape_cast %15 : vector<1x32x32xf32> to vector<32x32xf32>
    %c0_17 = arith.constant 0 : index
    %c0_18 = arith.constant 0 : index
    %c0_19 = arith.constant 0 : index
    %17 = vector.load %arg6[%c0_17, %c0_18, %c0_19] : memref<3x1x32xf32, #tpu.memory_space<vmem>>, vector<1x1x32xf32>
    %18 = vector.shape_cast %17 : vector<1x1x32xf32> to vector<1x32xf32>
    %c1_20 = arith.constant 1 : index
    %c0_21 = arith.constant 0 : index
    %c0_22 = arith.constant 0 : index
    %19 = vector.load %arg6[%c1_20, %c0_21, %c0_22] : memref<3x1x32xf32, #tpu.memory_space<vmem>>, vector<1x1x32xf32>
    %20 = vector.shape_cast %19 : vector<1x1x32xf32> to vector<1x32xf32>
    %c2_23 = arith.constant 2 : index
    %c0_24 = arith.constant 0 : index
    %c0_25 = arith.constant 0 : index
    %21 = vector.load %arg6[%c2_23, %c0_24, %c0_25] : memref<3x1x32xf32, #tpu.memory_space<vmem>>, vector<1x1x32xf32>
    %22 = vector.shape_cast %21 : vector<1x1x32xf32> to vector<1x32xf32>
    %c0_26 = arith.constant 0 : index
    %c0_27 = arith.constant 0 : index
    %c0_28 = arith.constant 0 : index
    %23 = vector.load %arg7[%c0_26, %c0_27, %c0_28] : memref<3x1x32xf32, #tpu.memory_space<vmem>>, vector<1x1x32xf32>
    %24 = vector.shape_cast %23 : vector<1x1x32xf32> to vector<1x32xf32>
    %c1_29 = arith.constant 1 : index
    %c0_30 = arith.constant 0 : index
    %c0_31 = arith.constant 0 : index
    %25 = vector.load %arg7[%c1_29, %c0_30, %c0_31] : memref<3x1x32xf32, #tpu.memory_space<vmem>>, vector<1x1x32xf32>
    %26 = vector.shape_cast %25 : vector<1x1x32xf32> to vector<1x32xf32>
    %c2_32 = arith.constant 2 : index
    %c0_33 = arith.constant 0 : index
    %c0_34 = arith.constant 0 : index
    %27 = vector.load %arg7[%c2_32, %c0_33, %c0_34] : memref<3x1x32xf32, #tpu.memory_space<vmem>>, vector<1x1x32xf32>
    %28 = vector.shape_cast %27 : vector<1x1x32xf32> to vector<1x32xf32>
    %cst_35 = arith.constant 0.000000e+00 : f32
    %29 = vector.broadcast %cst_35 : f32 to vector<8x32xf32>
    %c0_i32 = arith.constant 0 : i32
    %c8_i32 = arith.constant 8 : i32
    %30 = arith.subi %c8_i32, %c0_i32 : i32
    %31 = arith.index_cast %30 : i32 to index
    %c0_36 = arith.constant 0 : index
    %c0_37 = arith.constant 0 : index
    %32 = vector.load %arg1[%31, %c0_36, %c0_37] : memref<9x8x1xi32, #tpu.memory_space<vmem>>, vector<1x8x1xi32>
    %33 = vector.shape_cast %32 : vector<1x8x1xi32> to vector<8x1xi32>
    %34 = vector.broadcast %33 : vector<8x1xi32> to vector<8x128xi32>
    %35 = arith.cmpi eq, %0, %34 : vector<8x128xi32>
    %36 = arith.extui %35 : vector<8x128xi1> to vector<8x128xi32>
    %37 = arith.sitofp %36 : vector<8x128xi32> to vector<8x128xf32>
    %cst_38 = arith.constant dense<0.000000e+00> : vector<8x16xf32>
    %38 = tpu.matmul %37, %4, %cst_38 {dimension_numbers = #tpu.dot_dimension_numbers<[1], [0], [0], [1], [0, 0, 1, 1], [], []>} : vector<8x128xf32>, vector<128x16xf32>, vector<8x16xf32> -> vector<8x16xf32>
    %cst_39 = arith.constant dense<0.000000e+00> : vector<8x32xf32>
    %39 = tpu.matmul %38, %6, %cst_39 {dimension_numbers = #tpu.dot_dimension_numbers<[1], [0], [0], [1], [0, 0, 1, 1], [], []>} : vector<8x16xf32>, vector<16x32xf32>, vector<8x32xf32> -> vector<8x32xf32>
    %40 = vector.broadcast %18 : vector<1x32xf32> to vector<8x32xf32>
    %41 = arith.addf %39, %40 : vector<8x32xf32>
    %cst_40 = arith.constant dense<0.000000e+00> : vector<8x32xf32>
    %42 = tpu.matmul %38, %8, %cst_40 {dimension_numbers = #tpu.dot_dimension_numbers<[1], [0], [0], [1], [0, 0, 1, 1], [], []>} : vector<8x16xf32>, vector<16x32xf32>, vector<8x32xf32> -> vector<8x32xf32>
    %43 = vector.broadcast %20 : vector<1x32xf32> to vector<8x32xf32>
    %44 = arith.addf %42, %43 : vector<8x32xf32>
    %cst_41 = arith.constant dense<0.000000e+00> : vector<8x32xf32>
    %45 = tpu.matmul %38, %10, %cst_41 {dimension_numbers = #tpu.dot_dimension_numbers<[1], [0], [0], [1], [0, 0, 1, 1], [], []>} : vector<8x16xf32>, vector<16x32xf32>, vector<8x32xf32> -> vector<8x32xf32>
    %46 = vector.broadcast %22 : vector<1x32xf32> to vector<8x32xf32>
    %47 = arith.addf %45, %46 : vector<8x32xf32>
    %cst_42 = arith.constant dense<0.000000e+00> : vector<8x32xf32>
    %48 = tpu.matmul %29, %12, %cst_42 {dimension_numbers = #tpu.dot_dimension_numbers<[1], [0], [0], [1], [0, 0, 1, 1], [], []>} : vector<8x32xf32>, vector<32x32xf32>, vector<8x32xf32> -> vector<8x32xf32>
    %49 = vector.broadcast %24 : vector<1x32xf32> to vector<8x32xf32>
    %50 = arith.addf %48, %49 : vector<8x32xf32>
    %cst_43 = arith.constant dense<0.000000e+00> : vector<8x32xf32>
    %51 = tpu.matmul %29, %14, %cst_43 {dimension_numbers = #tpu.dot_dimension_numbers<[1], [0], [0], [1], [0, 0, 1, 1], [], []>} : vector<8x32xf32>, vector<32x32xf32>, vector<8x32xf32> -> vector<8x32xf32>
    %52 = vector.broadcast %26 : vector<1x32xf32> to vector<8x32xf32>
    %53 = arith.addf %51, %52 : vector<8x32xf32>
    %cst_44 = arith.constant dense<0.000000e+00> : vector<8x32xf32>
    %54 = tpu.matmul %29, %16, %cst_44 {dimension_numbers = #tpu.dot_dimension_numbers<[1], [0], [0], [1], [0, 0, 1, 1], [], []>} : vector<8x32xf32>, vector<32x32xf32>, vector<8x32xf32> -> vector<8x32xf32>
    %55 = vector.broadcast %28 : vector<1x32xf32> to vector<8x32xf32>
    %56 = arith.addf %54, %55 : vector<8x32xf32>
    %57 = arith.addf %41, %50 : vector<8x32xf32>
    %58 = arith.negf %57 : vector<8x32xf32>
    %59 = math.exp %58 : vector<8x32xf32>
    %cst_45 = arith.constant 1.000000e+00 : f32
    %60 = vector.broadcast %cst_45 : f32 to vector<8x32xf32>
    %61 = arith.addf %60, %59 : vector<8x32xf32>
    %62 = arith.divf %60, %61 : vector<8x32xf32>
    %63 = arith.addf %44, %53 : vector<8x32xf32>
    %64 = arith.negf %63 : vector<8x32xf32>
    %65 = math.exp %64 : vector<8x32xf32>
    %cst_46 = arith.constant 1.000000e+00 : f32
    %66 = vector.broadcast %cst_46 : f32 to vector<8x32xf32>
    %67 = arith.addf %66, %65 : vector<8x32xf32>
    %68 = arith.divf %66, %67 : vector<8x32xf32>
    %69 = arith.mulf %62, %56 : vector<8x32xf32>
    %70 = arith.addf %47, %69 : vector<8x32xf32>
    %71 = math.tanh %70 : vector<8x32xf32>
    %cst_47 = arith.constant 1.000000e+00 : f32
    %72 = vector.broadcast %cst_47 : f32 to vector<8x32xf32>
    %73 = arith.subf %72, %68 : vector<8x32xf32>
    %74 = arith.mulf %73, %71 : vector<8x32xf32>
    %75 = arith.mulf %68, %29 : vector<8x32xf32>
    %76 = arith.addf %74, %75 : vector<8x32xf32>
    %c1_i32 = arith.constant 1 : i32
    %c8_i32_48 = arith.constant 8 : i32
    %77 = arith.subi %c8_i32_48, %c1_i32 : i32
    %78 = arith.index_cast %77 : i32 to index
    %c0_49 = arith.constant 0 : index
    %c0_50 = arith.constant 0 : index
    %79 = vector.load %arg1[%78, %c0_49, %c0_50] : memref<9x8x1xi32, #tpu.memory_space<vmem>>, vector<1x8x1xi32>
    %80 = vector.shape_cast %79 : vector<1x8x1xi32> to vector<8x1xi32>
    %81 = vector.broadcast %80 : vector<8x1xi32> to vector<8x128xi32>
    %82 = arith.cmpi eq, %0, %81 : vector<8x128xi32>
    %83 = arith.extui %82 : vector<8x128xi1> to vector<8x128xi32>
    %84 = arith.sitofp %83 : vector<8x128xi32> to vector<8x128xf32>
    %cst_51 = arith.constant dense<0.000000e+00> : vector<8x16xf32>
    %85 = tpu.matmul %84, %4, %cst_51 {dimension_numbers = #tpu.dot_dimension_numbers<[1], [0], [0], [1], [0, 0, 1, 1], [], []>} : vector<8x128xf32>, vector<128x16xf32>, vector<8x16xf32> -> vector<8x16xf32>
    %cst_52 = arith.constant dense<0.000000e+00> : vector<8x32xf32>
    %86 = tpu.matmul %85, %6, %cst_52 {dimension_numbers = #tpu.dot_dimension_numbers<[1], [0], [0], [1], [0, 0, 1, 1], [], []>} : vector<8x16xf32>, vector<16x32xf32>, vector<8x32xf32> -> vector<8x32xf32>
    %87 = vector.broadcast %18 : vector<1x32xf32> to vector<8x32xf32>
    %88 = arith.addf %86, %87 : vector<8x32xf32>
    %cst_53 = arith.constant dense<0.000000e+00> : vector<8x32xf32>
    %89 = tpu.matmul %85, %8, %cst_53 {dimension_numbers = #tpu.dot_dimension_numbers<[1], [0], [0], [1], [0, 0, 1, 1], [], []>} : vector<8x16xf32>, vector<16x32xf32>, vector<8x32xf32> -> vector<8x32xf32>
    %90 = vector.broadcast %20 : vector<1x32xf32> to vector<8x32xf32>
    %91 = arith.addf %89, %90 : vector<8x32xf32>
    %cst_54 = arith.constant dense<0.000000e+00> : vector<8x32xf32>
    %92 = tpu.matmul %85, %10, %cst_54 {dimension_numbers = #tpu.dot_dimension_numbers<[1], [0], [0], [1], [0, 0, 1, 1], [], []>} : vector<8x16xf32>, vector<16x32xf32>, vector<8x32xf32> -> vector<8x32xf32>
    %93 = vector.broadcast %22 : vector<1x32xf32> to vector<8x32xf32>
    %94 = arith.addf %92, %93 : vector<8x32xf32>
    %cst_55 = arith.constant dense<0.000000e+00> : vector<8x32xf32>
    %95 = tpu.matmul %76, %12, %cst_55 {dimension_numbers = #tpu.dot_dimension_numbers<[1], [0], [0], [1], [0, 0, 1, 1], [], []>} : vector<8x32xf32>, vector<32x32xf32>, vector<8x32xf32> -> vector<8x32xf32>
    %96 = vector.broadcast %24 : vector<1x32xf32> to vector<8x32xf32>
    %97 = arith.addf %95, %96 : vector<8x32xf32>
    %cst_56 = arith.constant dense<0.000000e+00> : vector<8x32xf32>
    %98 = tpu.matmul %76, %14, %cst_56 {dimension_numbers = #tpu.dot_dimension_numbers<[1], [0], [0], [1], [0, 0, 1, 1], [], []>} : vector<8x32xf32>, vector<32x32xf32>, vector<8x32xf32> -> vector<8x32xf32>
    %99 = vector.broadcast %26 : vector<1x32xf32> to vector<8x32xf32>
    %100 = arith.addf %98, %99 : vector<8x32xf32>
    %cst_57 = arith.constant dense<0.000000e+00> : vector<8x32xf32>
    %101 = tpu.matmul %76, %16, %cst_57 {dimension_numbers = #tpu.dot_dimension_numbers<[1], [0], [0], [1], [0, 0, 1, 1], [], []>} : vector<8x32xf32>, vector<32x32xf32>, vector<8x32xf32> -> vector<8x32xf32>
    %102 = vector.broadcast %28 : vector<1x32xf32> to vector<8x32xf32>
    %103 = arith.addf %101, %102 : vector<8x32xf32>
    %104 = arith.addf %88, %97 : vector<8x32xf32>
    %105 = arith.negf %104 : vector<8x32xf32>
    %106 = math.exp %105 : vector<8x32xf32>
    %cst_58 = arith.constant 1.000000e+00 : f32
    %107 = vector.broadcast %cst_58 : f32 to vector<8x32xf32>
    %108 = arith.addf %107, %106 : vector<8x32xf32>
    %109 = arith.divf %107, %108 : vector<8x32xf32>
    %110 = arith.addf %91, %100 : vector<8x32xf32>
    %111 = arith.negf %110 : vector<8x32xf32>
    %112 = math.exp %111 : vector<8x32xf32>
    %cst_59 = arith.constant 1.000000e+00 : f32
    %113 = vector.broadcast %cst_59 : f32 to vector<8x32xf32>
    %114 = arith.addf %113, %112 : vector<8x32xf32>
    %115 = arith.divf %113, %114 : vector<8x32xf32>
    %116 = arith.mulf %109, %103 : vector<8x32xf32>
    %117 = arith.addf %94, %116 : vector<8x32xf32>
    %118 = math.tanh %117 : vector<8x32xf32>
    %cst_60 = arith.constant 1.000000e+00 : f32
    %119 = vector.broadcast %cst_60 : f32 to vector<8x32xf32>
    %120 = arith.subf %119, %115 : vector<8x32xf32>
    %121 = arith.mulf %120, %118 : vector<8x32xf32>
    %122 = arith.mulf %115, %76 : vector<8x32xf32>
    %123 = arith.addf %121, %122 : vector<8x32xf32>
    %c2_i32 = arith.constant 2 : i32
    %c8_i32_61 = arith.constant 8 : i32
    %124 = arith.subi %c8_i32_61, %c2_i32 : i32
    %125 = arith.index_cast %124 : i32 to index
    %c0_62 = arith.constant 0 : index
    %c0_63 = arith.constant 0 : index
    %126 = vector.load %arg1[%125, %c0_62, %c0_63] : memref<9x8x1xi32, #tpu.memory_space<vmem>>, vector<1x8x1xi32>
    %127 = vector.shape_cast %126 : vector<1x8x1xi32> to vector<8x1xi32>
    %128 = vector.broadcast %127 : vector<8x1xi32> to vector<8x128xi32>
    %129 = arith.cmpi eq, %0, %128 : vector<8x128xi32>
    %130 = arith.extui %129 : vector<8x128xi1> to vector<8x128xi32>
    %131 = arith.sitofp %130 : vector<8x128xi32> to vector<8x128xf32>
    %cst_64 = arith.constant dense<0.000000e+00> : vector<8x16xf32>
    %132 = tpu.matmul %131, %4, %cst_64 {dimension_numbers = #tpu.dot_dimension_numbers<[1], [0], [0], [1], [0, 0, 1, 1], [], []>} : vector<8x128xf32>, vector<128x16xf32>, vector<8x16xf32> -> vector<8x16xf32>
    %cst_65 = arith.constant dense<0.000000e+00> : vector<8x32xf32>
    %133 = tpu.matmul %132, %6, %cst_65 {dimension_numbers = #tpu.dot_dimension_numbers<[1], [0], [0], [1], [0, 0, 1, 1], [], []>} : vector<8x16xf32>, vector<16x32xf32>, vector<8x32xf32> -> vector<8x32xf32>
    %134 = vector.broadcast %18 : vector<1x32xf32> to vector<8x32xf32>
    %135 = arith.addf %133, %134 : vector<8x32xf32>
    %cst_66 = arith.constant dense<0.000000e+00> : vector<8x32xf32>
    %136 = tpu.matmul %132, %8, %cst_66 {dimension_numbers = #tpu.dot_dimension_numbers<[1], [0], [0], [1], [0, 0, 1, 1], [], []>} : vector<8x16xf32>, vector<16x32xf32>, vector<8x32xf32> -> vector<8x32xf32>
    %137 = vector.broadcast %20 : vector<1x32xf32> to vector<8x32xf32>
    %138 = arith.addf %136, %137 : vector<8x32xf32>
    %cst_67 = arith.constant dense<0.000000e+00> : vector<8x32xf32>
    %139 = tpu.matmul %132, %10, %cst_67 {dimension_numbers = #tpu.dot_dimension_numbers<[1], [0], [0], [1], [0, 0, 1, 1], [], []>} : vector<8x16xf32>, vector<16x32xf32>, vector<8x32xf32> -> vector<8x32xf32>
    %140 = vector.broadcast %22 : vector<1x32xf32> to vector<8x32xf32>
    %141 = arith.addf %139, %140 : vector<8x32xf32>
    %cst_68 = arith.constant dense<0.000000e+00> : vector<8x32xf32>
    %142 = tpu.matmul %123, %12, %cst_68 {dimension_numbers = #tpu.dot_dimension_numbers<[1], [0], [0], [1], [0, 0, 1, 1], [], []>} : vector<8x32xf32>, vector<32x32xf32>, vector<8x32xf32> -> vector<8x32xf32>
    %143 = vector.broadcast %24 : vector<1x32xf32> to vector<8x32xf32>
    %144 = arith.addf %142, %143 : vector<8x32xf32>
    %cst_69 = arith.constant dense<0.000000e+00> : vector<8x32xf32>
    %145 = tpu.matmul %123, %14, %cst_69 {dimension_numbers = #tpu.dot_dimension_numbers<[1], [0], [0], [1], [0, 0, 1, 1], [], []>} : vector<8x32xf32>, vector<32x32xf32>, vector<8x32xf32> -> vector<8x32xf32>
    %146 = vector.broadcast %26 : vector<1x32xf32> to vector<8x32xf32>
    %147 = arith.addf %145, %146 : vector<8x32xf32>
    %cst_70 = arith.constant dense<0.000000e+00> : vector<8x32xf32>
    %148 = tpu.matmul %123, %16, %cst_70 {dimension_numbers = #tpu.dot_dimension_numbers<[1], [0], [0], [1], [0, 0, 1, 1], [], []>} : vector<8x32xf32>, vector<32x32xf32>, vector<8x32xf32> -> vector<8x32xf32>
    %149 = vector.broadcast %28 : vector<1x32xf32> to vector<8x32xf32>
    %150 = arith.addf %148, %149 : vector<8x32xf32>
    %151 = arith.addf %135, %144 : vector<8x32xf32>
    %152 = arith.negf %151 : vector<8x32xf32>
    %153 = math.exp %152 : vector<8x32xf32>
    %cst_71 = arith.constant 1.000000e+00 : f32
    %154 = vector.broadcast %cst_71 : f32 to vector<8x32xf32>
    %155 = arith.addf %154, %153 : vector<8x32xf32>
    %156 = arith.divf %154, %155 : vector<8x32xf32>
    %157 = arith.addf %138, %147 : vector<8x32xf32>
    %158 = arith.negf %157 : vector<8x32xf32>
    %159 = math.exp %158 : vector<8x32xf32>
    %cst_72 = arith.constant 1.000000e+00 : f32
    %160 = vector.broadcast %cst_72 : f32 to vector<8x32xf32>
    %161 = arith.addf %160, %159 : vector<8x32xf32>
    %162 = arith.divf %160, %161 : vector<8x32xf32>
    %163 = arith.mulf %156, %150 : vector<8x32xf32>
    %164 = arith.addf %141, %163 : vector<8x32xf32>
    %165 = math.tanh %164 : vector<8x32xf32>
    %cst_73 = arith.constant 1.000000e+00 : f32
    %166 = vector.broadcast %cst_73 : f32 to vector<8x32xf32>
    %167 = arith.subf %166, %162 : vector<8x32xf32>
    %168 = arith.mulf %167, %165 : vector<8x32xf32>
    %169 = arith.mulf %162, %123 : vector<8x32xf32>
    %170 = arith.addf %168, %169 : vector<8x32xf32>
    %c3_i32 = arith.constant 3 : i32
    %c8_i32_74 = arith.constant 8 : i32
    %171 = arith.subi %c8_i32_74, %c3_i32 : i32
    %172 = arith.index_cast %171 : i32 to index
    %c0_75 = arith.constant 0 : index
    %c0_76 = arith.constant 0 : index
    %173 = vector.load %arg1[%172, %c0_75, %c0_76] : memref<9x8x1xi32, #tpu.memory_space<vmem>>, vector<1x8x1xi32>
    %174 = vector.shape_cast %173 : vector<1x8x1xi32> to vector<8x1xi32>
    %175 = vector.broadcast %174 : vector<8x1xi32> to vector<8x128xi32>
    %176 = arith.cmpi eq, %0, %175 : vector<8x128xi32>
    %177 = arith.extui %176 : vector<8x128xi1> to vector<8x128xi32>
    %178 = arith.sitofp %177 : vector<8x128xi32> to vector<8x128xf32>
    %cst_77 = arith.constant dense<0.000000e+00> : vector<8x16xf32>
    %179 = tpu.matmul %178, %4, %cst_77 {dimension_numbers = #tpu.dot_dimension_numbers<[1], [0], [0], [1], [0, 0, 1, 1], [], []>} : vector<8x128xf32>, vector<128x16xf32>, vector<8x16xf32> -> vector<8x16xf32>
    %cst_78 = arith.constant dense<0.000000e+00> : vector<8x32xf32>
    %180 = tpu.matmul %179, %6, %cst_78 {dimension_numbers = #tpu.dot_dimension_numbers<[1], [0], [0], [1], [0, 0, 1, 1], [], []>} : vector<8x16xf32>, vector<16x32xf32>, vector<8x32xf32> -> vector<8x32xf32>
    %181 = vector.broadcast %18 : vector<1x32xf32> to vector<8x32xf32>
    %182 = arith.addf %180, %181 : vector<8x32xf32>
    %cst_79 = arith.constant dense<0.000000e+00> : vector<8x32xf32>
    %183 = tpu.matmul %179, %8, %cst_79 {dimension_numbers = #tpu.dot_dimension_numbers<[1], [0], [0], [1], [0, 0, 1, 1], [], []>} : vector<8x16xf32>, vector<16x32xf32>, vector<8x32xf32> -> vector<8x32xf32>
    %184 = vector.broadcast %20 : vector<1x32xf32> to vector<8x32xf32>
    %185 = arith.addf %183, %184 : vector<8x32xf32>
    %cst_80 = arith.constant dense<0.000000e+00> : vector<8x32xf32>
    %186 = tpu.matmul %179, %10, %cst_80 {dimension_numbers = #tpu.dot_dimension_numbers<[1], [0], [0], [1], [0, 0, 1, 1], [], []>} : vector<8x16xf32>, vector<16x32xf32>, vector<8x32xf32> -> vector<8x32xf32>
    %187 = vector.broadcast %22 : vector<1x32xf32> to vector<8x32xf32>
    %188 = arith.addf %186, %187 : vector<8x32xf32>
    %cst_81 = arith.constant dense<0.000000e+00> : vector<8x32xf32>
    %189 = tpu.matmul %170, %12, %cst_81 {dimension_numbers = #tpu.dot_dimension_numbers<[1], [0], [0], [1], [0, 0, 1, 1], [], []>} : vector<8x32xf32>, vector<32x32xf32>, vector<8x32xf32> -> vector<8x32xf32>
    %190 = vector.broadcast %24 : vector<1x32xf32> to vector<8x32xf32>
    %191 = arith.addf %189, %190 : vector<8x32xf32>
    %cst_82 = arith.constant dense<0.000000e+00> : vector<8x32xf32>
    %192 = tpu.matmul %170, %14, %cst_82 {dimension_numbers = #tpu.dot_dimension_numbers<[1], [0], [0], [1], [0, 0, 1, 1], [], []>} : vector<8x32xf32>, vector<32x32xf32>, vector<8x32xf32> -> vector<8x32xf32>
    %193 = vector.broadcast %26 : vector<1x32xf32> to vector<8x32xf32>
    %194 = arith.addf %192, %193 : vector<8x32xf32>
    %cst_83 = arith.constant dense<0.000000e+00> : vector<8x32xf32>
    %195 = tpu.matmul %170, %16, %cst_83 {dimension_numbers = #tpu.dot_dimension_numbers<[1], [0], [0], [1], [0, 0, 1, 1], [], []>} : vector<8x32xf32>, vector<32x32xf32>, vector<8x32xf32> -> vector<8x32xf32>
    %196 = vector.broadcast %28 : vector<1x32xf32> to vector<8x32xf32>
    %197 = arith.addf %195, %196 : vector<8x32xf32>
    %198 = arith.addf %182, %191 : vector<8x32xf32>
    %199 = arith.negf %198 : vector<8x32xf32>
    %200 = math.exp %199 : vector<8x32xf32>
    %cst_84 = arith.constant 1.000000e+00 : f32
    %201 = vector.broadcast %cst_84 : f32 to vector<8x32xf32>
    %202 = arith.addf %201, %200 : vector<8x32xf32>
    %203 = arith.divf %201, %202 : vector<8x32xf32>
    %204 = arith.addf %185, %194 : vector<8x32xf32>
    %205 = arith.negf %204 : vector<8x32xf32>
    %206 = math.exp %205 : vector<8x32xf32>
    %cst_85 = arith.constant 1.000000e+00 : f32
    %207 = vector.broadcast %cst_85 : f32 to vector<8x32xf32>
    %208 = arith.addf %207, %206 : vector<8x32xf32>
    %209 = arith.divf %207, %208 : vector<8x32xf32>
    %210 = arith.mulf %203, %197 : vector<8x32xf32>
    %211 = arith.addf %188, %210 : vector<8x32xf32>
    %212 = math.tanh %211 : vector<8x32xf32>
    %cst_86 = arith.constant 1.000000e+00 : f32
    %213 = vector.broadcast %cst_86 : f32 to vector<8x32xf32>
    %214 = arith.subf %213, %209 : vector<8x32xf32>
    %215 = arith.mulf %214, %212 : vector<8x32xf32>
    %216 = arith.mulf %209, %170 : vector<8x32xf32>
    %217 = arith.addf %215, %216 : vector<8x32xf32>
    %c4_i32 = arith.constant 4 : i32
    %c8_i32_87 = arith.constant 8 : i32
    %218 = arith.subi %c8_i32_87, %c4_i32 : i32
    %219 = arith.index_cast %218 : i32 to index
    %c0_88 = arith.constant 0 : index
    %c0_89 = arith.constant 0 : index
    %220 = vector.load %arg1[%219, %c0_88, %c0_89] : memref<9x8x1xi32, #tpu.memory_space<vmem>>, vector<1x8x1xi32>
    %221 = vector.shape_cast %220 : vector<1x8x1xi32> to vector<8x1xi32>
    %222 = vector.broadcast %221 : vector<8x1xi32> to vector<8x128xi32>
    %223 = arith.cmpi eq, %0, %222 : vector<8x128xi32>
    %224 = arith.extui %223 : vector<8x128xi1> to vector<8x128xi32>
    %225 = arith.sitofp %224 : vector<8x128xi32> to vector<8x128xf32>
    %cst_90 = arith.constant dense<0.000000e+00> : vector<8x16xf32>
    %226 = tpu.matmul %225, %4, %cst_90 {dimension_numbers = #tpu.dot_dimension_numbers<[1], [0], [0], [1], [0, 0, 1, 1], [], []>} : vector<8x128xf32>, vector<128x16xf32>, vector<8x16xf32> -> vector<8x16xf32>
    %cst_91 = arith.constant dense<0.000000e+00> : vector<8x32xf32>
    %227 = tpu.matmul %226, %6, %cst_91 {dimension_numbers = #tpu.dot_dimension_numbers<[1], [0], [0], [1], [0, 0, 1, 1], [], []>} : vector<8x16xf32>, vector<16x32xf32>, vector<8x32xf32> -> vector<8x32xf32>
    %228 = vector.broadcast %18 : vector<1x32xf32> to vector<8x32xf32>
    %229 = arith.addf %227, %228 : vector<8x32xf32>
    %cst_92 = arith.constant dense<0.000000e+00> : vector<8x32xf32>
    %230 = tpu.matmul %226, %8, %cst_92 {dimension_numbers = #tpu.dot_dimension_numbers<[1], [0], [0], [1], [0, 0, 1, 1], [], []>} : vector<8x16xf32>, vector<16x32xf32>, vector<8x32xf32> -> vector<8x32xf32>
    %231 = vector.broadcast %20 : vector<1x32xf32> to vector<8x32xf32>
    %232 = arith.addf %230, %231 : vector<8x32xf32>
    %cst_93 = arith.constant dense<0.000000e+00> : vector<8x32xf32>
    %233 = tpu.matmul %226, %10, %cst_93 {dimension_numbers = #tpu.dot_dimension_numbers<[1], [0], [0], [1], [0, 0, 1, 1], [], []>} : vector<8x16xf32>, vector<16x32xf32>, vector<8x32xf32> -> vector<8x32xf32>
    %234 = vector.broadcast %22 : vector<1x32xf32> to vector<8x32xf32>
    %235 = arith.addf %233, %234 : vector<8x32xf32>
    %cst_94 = arith.constant dense<0.000000e+00> : vector<8x32xf32>
    %236 = tpu.matmul %217, %12, %cst_94 {dimension_numbers = #tpu.dot_dimension_numbers<[1], [0], [0], [1], [0, 0, 1, 1], [], []>} : vector<8x32xf32>, vector<32x32xf32>, vector<8x32xf32> -> vector<8x32xf32>
    %237 = vector.broadcast %24 : vector<1x32xf32> to vector<8x32xf32>
    %238 = arith.addf %236, %237 : vector<8x32xf32>
    %cst_95 = arith.constant dense<0.000000e+00> : vector<8x32xf32>
    %239 = tpu.matmul %217, %14, %cst_95 {dimension_numbers = #tpu.dot_dimension_numbers<[1], [0], [0], [1], [0, 0, 1, 1], [], []>} : vector<8x32xf32>, vector<32x32xf32>, vector<8x32xf32> -> vector<8x32xf32>
    %240 = vector.broadcast %26 : vector<1x32xf32> to vector<8x32xf32>
    %241 = arith.addf %239, %240 : vector<8x32xf32>
    %cst_96 = arith.constant dense<0.000000e+00> : vector<8x32xf32>
    %242 = tpu.matmul %217, %16, %cst_96 {dimension_numbers = #tpu.dot_dimension_numbers<[1], [0], [0], [1], [0, 0, 1, 1], [], []>} : vector<8x32xf32>, vector<32x32xf32>, vector<8x32xf32> -> vector<8x32xf32>
    %243 = vector.broadcast %28 : vector<1x32xf32> to vector<8x32xf32>
    %244 = arith.addf %242, %243 : vector<8x32xf32>
    %245 = arith.addf %229, %238 : vector<8x32xf32>
    %246 = arith.negf %245 : vector<8x32xf32>
    %247 = math.exp %246 : vector<8x32xf32>
    %cst_97 = arith.constant 1.000000e+00 : f32
    %248 = vector.broadcast %cst_97 : f32 to vector<8x32xf32>
    %249 = arith.addf %248, %247 : vector<8x32xf32>
    %250 = arith.divf %248, %249 : vector<8x32xf32>
    %251 = arith.addf %232, %241 : vector<8x32xf32>
    %252 = arith.negf %251 : vector<8x32xf32>
    %253 = math.exp %252 : vector<8x32xf32>
    %cst_98 = arith.constant 1.000000e+00 : f32
    %254 = vector.broadcast %cst_98 : f32 to vector<8x32xf32>
    %255 = arith.addf %254, %253 : vector<8x32xf32>
    %256 = arith.divf %254, %255 : vector<8x32xf32>
    %257 = arith.mulf %250, %244 : vector<8x32xf32>
    %258 = arith.addf %235, %257 : vector<8x32xf32>
    %259 = math.tanh %258 : vector<8x32xf32>
    %cst_99 = arith.constant 1.000000e+00 : f32
    %260 = vector.broadcast %cst_99 : f32 to vector<8x32xf32>
    %261 = arith.subf %260, %256 : vector<8x32xf32>
    %262 = arith.mulf %261, %259 : vector<8x32xf32>
    %263 = arith.mulf %256, %217 : vector<8x32xf32>
    %264 = arith.addf %262, %263 : vector<8x32xf32>
    %c5_i32 = arith.constant 5 : i32
    %c8_i32_100 = arith.constant 8 : i32
    %265 = arith.subi %c8_i32_100, %c5_i32 : i32
    %266 = arith.index_cast %265 : i32 to index
    %c0_101 = arith.constant 0 : index
    %c0_102 = arith.constant 0 : index
    %267 = vector.load %arg1[%266, %c0_101, %c0_102] : memref<9x8x1xi32, #tpu.memory_space<vmem>>, vector<1x8x1xi32>
    %268 = vector.shape_cast %267 : vector<1x8x1xi32> to vector<8x1xi32>
    %269 = vector.broadcast %268 : vector<8x1xi32> to vector<8x128xi32>
    %270 = arith.cmpi eq, %0, %269 : vector<8x128xi32>
    %271 = arith.extui %270 : vector<8x128xi1> to vector<8x128xi32>
    %272 = arith.sitofp %271 : vector<8x128xi32> to vector<8x128xf32>
    %cst_103 = arith.constant dense<0.000000e+00> : vector<8x16xf32>
    %273 = tpu.matmul %272, %4, %cst_103 {dimension_numbers = #tpu.dot_dimension_numbers<[1], [0], [0], [1], [0, 0, 1, 1], [], []>} : vector<8x128xf32>, vector<128x16xf32>, vector<8x16xf32> -> vector<8x16xf32>
    %cst_104 = arith.constant dense<0.000000e+00> : vector<8x32xf32>
    %274 = tpu.matmul %273, %6, %cst_104 {dimension_numbers = #tpu.dot_dimension_numbers<[1], [0], [0], [1], [0, 0, 1, 1], [], []>} : vector<8x16xf32>, vector<16x32xf32>, vector<8x32xf32> -> vector<8x32xf32>
    %275 = vector.broadcast %18 : vector<1x32xf32> to vector<8x32xf32>
    %276 = arith.addf %274, %275 : vector<8x32xf32>
    %cst_105 = arith.constant dense<0.000000e+00> : vector<8x32xf32>
    %277 = tpu.matmul %273, %8, %cst_105 {dimension_numbers = #tpu.dot_dimension_numbers<[1], [0], [0], [1], [0, 0, 1, 1], [], []>} : vector<8x16xf32>, vector<16x32xf32>, vector<8x32xf32> -> vector<8x32xf32>
    %278 = vector.broadcast %20 : vector<1x32xf32> to vector<8x32xf32>
    %279 = arith.addf %277, %278 : vector<8x32xf32>
    %cst_106 = arith.constant dense<0.000000e+00> : vector<8x32xf32>
    %280 = tpu.matmul %273, %10, %cst_106 {dimension_numbers = #tpu.dot_dimension_numbers<[1], [0], [0], [1], [0, 0, 1, 1], [], []>} : vector<8x16xf32>, vector<16x32xf32>, vector<8x32xf32> -> vector<8x32xf32>
    %281 = vector.broadcast %22 : vector<1x32xf32> to vector<8x32xf32>
    %282 = arith.addf %280, %281 : vector<8x32xf32>
    %cst_107 = arith.constant dense<0.000000e+00> : vector<8x32xf32>
    %283 = tpu.matmul %264, %12, %cst_107 {dimension_numbers = #tpu.dot_dimension_numbers<[1], [0], [0], [1], [0, 0, 1, 1], [], []>} : vector<8x32xf32>, vector<32x32xf32>, vector<8x32xf32> -> vector<8x32xf32>
    %284 = vector.broadcast %24 : vector<1x32xf32> to vector<8x32xf32>
    %285 = arith.addf %283, %284 : vector<8x32xf32>
    %cst_108 = arith.constant dense<0.000000e+00> : vector<8x32xf32>
    %286 = tpu.matmul %264, %14, %cst_108 {dimension_numbers = #tpu.dot_dimension_numbers<[1], [0], [0], [1], [0, 0, 1, 1], [], []>} : vector<8x32xf32>, vector<32x32xf32>, vector<8x32xf32> -> vector<8x32xf32>
    %287 = vector.broadcast %26 : vector<1x32xf32> to vector<8x32xf32>
    %288 = arith.addf %286, %287 : vector<8x32xf32>
    %cst_109 = arith.constant dense<0.000000e+00> : vector<8x32xf32>
    %289 = tpu.matmul %264, %16, %cst_109 {dimension_numbers = #tpu.dot_dimension_numbers<[1], [0], [0], [1], [0, 0, 1, 1], [], []>} : vector<8x32xf32>, vector<32x32xf32>, vector<8x32xf32> -> vector<8x32xf32>
    %290 = vector.broadcast %28 : vector<1x32xf32> to vector<8x32xf32>
    %291 = arith.addf %289, %290 : vector<8x32xf32>
    %292 = arith.addf %276, %285 : vector<8x32xf32>
    %293 = arith.negf %292 : vector<8x32xf32>
    %294 = math.exp %293 : vector<8x32xf32>
    %cst_110 = arith.constant 1.000000e+00 : f32
    %295 = vector.broadcast %cst_110 : f32 to vector<8x32xf32>
    %296 = arith.addf %295, %294 : vector<8x32xf32>
    %297 = arith.divf %295, %296 : vector<8x32xf32>
    %298 = arith.addf %279, %288 : vector<8x32xf32>
    %299 = arith.negf %298 : vector<8x32xf32>
    %300 = math.exp %299 : vector<8x32xf32>
    %cst_111 = arith.constant 1.000000e+00 : f32
    %301 = vector.broadcast %cst_111 : f32 to vector<8x32xf32>
    %302 = arith.addf %301, %300 : vector<8x32xf32>
    %303 = arith.divf %301, %302 : vector<8x32xf32>
    %304 = arith.mulf %297, %291 : vector<8x32xf32>
    %305 = arith.addf %282, %304 : vector<8x32xf32>
    %306 = math.tanh %305 : vector<8x32xf32>
    %cst_112 = arith.constant 1.000000e+00 : f32
    %307 = vector.broadcast %cst_112 : f32 to vector<8x32xf32>
    %308 = arith.subf %307, %303 : vector<8x32xf32>
    %309 = arith.mulf %308, %306 : vector<8x32xf32>
    %310 = arith.mulf %303, %264 : vector<8x32xf32>
    %311 = arith.addf %309, %310 : vector<8x32xf32>
    %c6_i32 = arith.constant 6 : i32
    %c8_i32_113 = arith.constant 8 : i32
    %312 = arith.subi %c8_i32_113, %c6_i32 : i32
    %313 = arith.index_cast %312 : i32 to index
    %c0_114 = arith.constant 0 : index
    %c0_115 = arith.constant 0 : index
    %314 = vector.load %arg1[%313, %c0_114, %c0_115] : memref<9x8x1xi32, #tpu.memory_space<vmem>>, vector<1x8x1xi32>
    %315 = vector.shape_cast %314 : vector<1x8x1xi32> to vector<8x1xi32>
    %316 = vector.broadcast %315 : vector<8x1xi32> to vector<8x128xi32>
    %317 = arith.cmpi eq, %0, %316 : vector<8x128xi32>
    %318 = arith.extui %317 : vector<8x128xi1> to vector<8x128xi32>
    %319 = arith.sitofp %318 : vector<8x128xi32> to vector<8x128xf32>
    %cst_116 = arith.constant dense<0.000000e+00> : vector<8x16xf32>
    %320 = tpu.matmul %319, %4, %cst_116 {dimension_numbers = #tpu.dot_dimension_numbers<[1], [0], [0], [1], [0, 0, 1, 1], [], []>} : vector<8x128xf32>, vector<128x16xf32>, vector<8x16xf32> -> vector<8x16xf32>
    %cst_117 = arith.constant dense<0.000000e+00> : vector<8x32xf32>
    %321 = tpu.matmul %320, %6, %cst_117 {dimension_numbers = #tpu.dot_dimension_numbers<[1], [0], [0], [1], [0, 0, 1, 1], [], []>} : vector<8x16xf32>, vector<16x32xf32>, vector<8x32xf32> -> vector<8x32xf32>
    %322 = vector.broadcast %18 : vector<1x32xf32> to vector<8x32xf32>
    %323 = arith.addf %321, %322 : vector<8x32xf32>
    %cst_118 = arith.constant dense<0.000000e+00> : vector<8x32xf32>
    %324 = tpu.matmul %320, %8, %cst_118 {dimension_numbers = #tpu.dot_dimension_numbers<[1], [0], [0], [1], [0, 0, 1, 1], [], []>} : vector<8x16xf32>, vector<16x32xf32>, vector<8x32xf32> -> vector<8x32xf32>
    %325 = vector.broadcast %20 : vector<1x32xf32> to vector<8x32xf32>
    %326 = arith.addf %324, %325 : vector<8x32xf32>
    %cst_119 = arith.constant dense<0.000000e+00> : vector<8x32xf32>
    %327 = tpu.matmul %320, %10, %cst_119 {dimension_numbers = #tpu.dot_dimension_numbers<[1], [0], [0], [1], [0, 0, 1, 1], [], []>} : vector<8x16xf32>, vector<16x32xf32>, vector<8x32xf32> -> vector<8x32xf32>
    %328 = vector.broadcast %22 : vector<1x32xf32> to vector<8x32xf32>
    %329 = arith.addf %327, %328 : vector<8x32xf32>
    %cst_120 = arith.constant dense<0.000000e+00> : vector<8x32xf32>
    %330 = tpu.matmul %311, %12, %cst_120 {dimension_numbers = #tpu.dot_dimension_numbers<[1], [0], [0], [1], [0, 0, 1, 1], [], []>} : vector<8x32xf32>, vector<32x32xf32>, vector<8x32xf32> -> vector<8x32xf32>
    %331 = vector.broadcast %24 : vector<1x32xf32> to vector<8x32xf32>
    %332 = arith.addf %330, %331 : vector<8x32xf32>
    %cst_121 = arith.constant dense<0.000000e+00> : vector<8x32xf32>
    %333 = tpu.matmul %311, %14, %cst_121 {dimension_numbers = #tpu.dot_dimension_numbers<[1], [0], [0], [1], [0, 0, 1, 1], [], []>} : vector<8x32xf32>, vector<32x32xf32>, vector<8x32xf32> -> vector<8x32xf32>
    %334 = vector.broadcast %26 : vector<1x32xf32> to vector<8x32xf32>
    %335 = arith.addf %333, %334 : vector<8x32xf32>
    %cst_122 = arith.constant dense<0.000000e+00> : vector<8x32xf32>
    %336 = tpu.matmul %311, %16, %cst_122 {dimension_numbers = #tpu.dot_dimension_numbers<[1], [0], [0], [1], [0, 0, 1, 1], [], []>} : vector<8x32xf32>, vector<32x32xf32>, vector<8x32xf32> -> vector<8x32xf32>
    %337 = vector.broadcast %28 : vector<1x32xf32> to vector<8x32xf32>
    %338 = arith.addf %336, %337 : vector<8x32xf32>
    %339 = arith.addf %323, %332 : vector<8x32xf32>
    %340 = arith.negf %339 : vector<8x32xf32>
    %341 = math.exp %340 : vector<8x32xf32>
    %cst_123 = arith.constant 1.000000e+00 : f32
    %342 = vector.broadcast %cst_123 : f32 to vector<8x32xf32>
    %343 = arith.addf %342, %341 : vector<8x32xf32>
    %344 = arith.divf %342, %343 : vector<8x32xf32>
    %345 = arith.addf %326, %335 : vector<8x32xf32>
    %346 = arith.negf %345 : vector<8x32xf32>
    %347 = math.exp %346 : vector<8x32xf32>
    %cst_124 = arith.constant 1.000000e+00 : f32
    %348 = vector.broadcast %cst_124 : f32 to vector<8x32xf32>
    %349 = arith.addf %348, %347 : vector<8x32xf32>
    %350 = arith.divf %348, %349 : vector<8x32xf32>
    %351 = arith.mulf %344, %338 : vector<8x32xf32>
    %352 = arith.addf %329, %351 : vector<8x32xf32>
    %353 = math.tanh %352 : vector<8x32xf32>
    %cst_125 = arith.constant 1.000000e+00 : f32
    %354 = vector.broadcast %cst_125 : f32 to vector<8x32xf32>
    %355 = arith.subf %354, %350 : vector<8x32xf32>
    %356 = arith.mulf %355, %353 : vector<8x32xf32>
    %357 = arith.mulf %350, %311 : vector<8x32xf32>
    %358 = arith.addf %356, %357 : vector<8x32xf32>
    %c7_i32 = arith.constant 7 : i32
    %c8_i32_126 = arith.constant 8 : i32
    %359 = arith.subi %c8_i32_126, %c7_i32 : i32
    %360 = arith.index_cast %359 : i32 to index
    %c0_127 = arith.constant 0 : index
    %c0_128 = arith.constant 0 : index
    %361 = vector.load %arg1[%360, %c0_127, %c0_128] : memref<9x8x1xi32, #tpu.memory_space<vmem>>, vector<1x8x1xi32>
    %362 = vector.shape_cast %361 : vector<1x8x1xi32> to vector<8x1xi32>
    %363 = vector.broadcast %362 : vector<8x1xi32> to vector<8x128xi32>
    %364 = arith.cmpi eq, %0, %363 : vector<8x128xi32>
    %365 = arith.extui %364 : vector<8x128xi1> to vector<8x128xi32>
    %366 = arith.sitofp %365 : vector<8x128xi32> to vector<8x128xf32>
    %cst_129 = arith.constant dense<0.000000e+00> : vector<8x16xf32>
    %367 = tpu.matmul %366, %4, %cst_129 {dimension_numbers = #tpu.dot_dimension_numbers<[1], [0], [0], [1], [0, 0, 1, 1], [], []>} : vector<8x128xf32>, vector<128x16xf32>, vector<8x16xf32> -> vector<8x16xf32>
    %cst_130 = arith.constant dense<0.000000e+00> : vector<8x32xf32>
    %368 = tpu.matmul %367, %6, %cst_130 {dimension_numbers = #tpu.dot_dimension_numbers<[1], [0], [0], [1], [0, 0, 1, 1], [], []>} : vector<8x16xf32>, vector<16x32xf32>, vector<8x32xf32> -> vector<8x32xf32>
    %369 = vector.broadcast %18 : vector<1x32xf32> to vector<8x32xf32>
    %370 = arith.addf %368, %369 : vector<8x32xf32>
    %cst_131 = arith.constant dense<0.000000e+00> : vector<8x32xf32>
    %371 = tpu.matmul %367, %8, %cst_131 {dimension_numbers = #tpu.dot_dimension_numbers<[1], [0], [0], [1], [0, 0, 1, 1], [], []>} : vector<8x16xf32>, vector<16x32xf32>, vector<8x32xf32> -> vector<8x32xf32>
    %372 = vector.broadcast %20 : vector<1x32xf32> to vector<8x32xf32>
    %373 = arith.addf %371, %372 : vector<8x32xf32>
    %cst_132 = arith.constant dense<0.000000e+00> : vector<8x32xf32>
    %374 = tpu.matmul %367, %10, %cst_132 {dimension_numbers = #tpu.dot_dimension_numbers<[1], [0], [0], [1], [0, 0, 1, 1], [], []>} : vector<8x16xf32>, vector<16x32xf32>, vector<8x32xf32> -> vector<8x32xf32>
    %375 = vector.broadcast %22 : vector<1x32xf32> to vector<8x32xf32>
    %376 = arith.addf %374, %375 : vector<8x32xf32>
    %cst_133 = arith.constant dense<0.000000e+00> : vector<8x32xf32>
    %377 = tpu.matmul %358, %12, %cst_133 {dimension_numbers = #tpu.dot_dimension_numbers<[1], [0], [0], [1], [0, 0, 1, 1], [], []>} : vector<8x32xf32>, vector<32x32xf32>, vector<8x32xf32> -> vector<8x32xf32>
    %378 = vector.broadcast %24 : vector<1x32xf32> to vector<8x32xf32>
    %379 = arith.addf %377, %378 : vector<8x32xf32>
    %cst_134 = arith.constant dense<0.000000e+00> : vector<8x32xf32>
    %380 = tpu.matmul %358, %14, %cst_134 {dimension_numbers = #tpu.dot_dimension_numbers<[1], [0], [0], [1], [0, 0, 1, 1], [], []>} : vector<8x32xf32>, vector<32x32xf32>, vector<8x32xf32> -> vector<8x32xf32>
    %381 = vector.broadcast %26 : vector<1x32xf32> to vector<8x32xf32>
    %382 = arith.addf %380, %381 : vector<8x32xf32>
    %cst_135 = arith.constant dense<0.000000e+00> : vector<8x32xf32>
    %383 = tpu.matmul %358, %16, %cst_135 {dimension_numbers = #tpu.dot_dimension_numbers<[1], [0], [0], [1], [0, 0, 1, 1], [], []>} : vector<8x32xf32>, vector<32x32xf32>, vector<8x32xf32> -> vector<8x32xf32>
    %384 = vector.broadcast %28 : vector<1x32xf32> to vector<8x32xf32>
    %385 = arith.addf %383, %384 : vector<8x32xf32>
    %386 = arith.addf %370, %379 : vector<8x32xf32>
    %387 = arith.negf %386 : vector<8x32xf32>
    %388 = math.exp %387 : vector<8x32xf32>
    %cst_136 = arith.constant 1.000000e+00 : f32
    %389 = vector.broadcast %cst_136 : f32 to vector<8x32xf32>
    %390 = arith.addf %389, %388 : vector<8x32xf32>
    %391 = arith.divf %389, %390 : vector<8x32xf32>
    %392 = arith.addf %373, %382 : vector<8x32xf32>
    %393 = arith.negf %392 : vector<8x32xf32>
    %394 = math.exp %393 : vector<8x32xf32>
    %cst_137 = arith.constant 1.000000e+00 : f32
    %395 = vector.broadcast %cst_137 : f32 to vector<8x32xf32>
    %396 = arith.addf %395, %394 : vector<8x32xf32>
    %397 = arith.divf %395, %396 : vector<8x32xf32>
    %398 = arith.mulf %391, %385 : vector<8x32xf32>
    %399 = arith.addf %376, %398 : vector<8x32xf32>
    %400 = math.tanh %399 : vector<8x32xf32>
    %cst_138 = arith.constant 1.000000e+00 : f32
    %401 = vector.broadcast %cst_138 : f32 to vector<8x32xf32>
    %402 = arith.subf %401, %397 : vector<8x32xf32>
    %403 = arith.mulf %402, %400 : vector<8x32xf32>
    %404 = arith.mulf %397, %358 : vector<8x32xf32>
    %405 = arith.addf %403, %404 : vector<8x32xf32>
    %c8_i32_139 = arith.constant 8 : i32
    %c8_i32_140 = arith.constant 8 : i32
    %406 = arith.subi %c8_i32_140, %c8_i32_139 : i32
    %407 = arith.index_cast %406 : i32 to index
    %c0_141 = arith.constant 0 : index
    %c0_142 = arith.constant 0 : index
    %408 = vector.load %arg1[%407, %c0_141, %c0_142] : memref<9x8x1xi32, #tpu.memory_space<vmem>>, vector<1x8x1xi32>
    %409 = vector.shape_cast %408 : vector<1x8x1xi32> to vector<8x1xi32>
    %410 = vector.broadcast %409 : vector<8x1xi32> to vector<8x128xi32>
    %411 = arith.cmpi eq, %0, %410 : vector<8x128xi32>
    %412 = arith.extui %411 : vector<8x128xi1> to vector<8x128xi32>
    %413 = arith.sitofp %412 : vector<8x128xi32> to vector<8x128xf32>
    %cst_143 = arith.constant dense<0.000000e+00> : vector<8x16xf32>
    %414 = tpu.matmul %413, %4, %cst_143 {dimension_numbers = #tpu.dot_dimension_numbers<[1], [0], [0], [1], [0, 0, 1, 1], [], []>} : vector<8x128xf32>, vector<128x16xf32>, vector<8x16xf32> -> vector<8x16xf32>
    %cst_144 = arith.constant dense<0.000000e+00> : vector<8x32xf32>
    %415 = tpu.matmul %414, %6, %cst_144 {dimension_numbers = #tpu.dot_dimension_numbers<[1], [0], [0], [1], [0, 0, 1, 1], [], []>} : vector<8x16xf32>, vector<16x32xf32>, vector<8x32xf32> -> vector<8x32xf32>
    %416 = vector.broadcast %18 : vector<1x32xf32> to vector<8x32xf32>
    %417 = arith.addf %415, %416 : vector<8x32xf32>
    %cst_145 = arith.constant dense<0.000000e+00> : vector<8x32xf32>
    %418 = tpu.matmul %414, %8, %cst_145 {dimension_numbers = #tpu.dot_dimension_numbers<[1], [0], [0], [1], [0, 0, 1, 1], [], []>} : vector<8x16xf32>, vector<16x32xf32>, vector<8x32xf32> -> vector<8x32xf32>
    %419 = vector.broadcast %20 : vector<1x32xf32> to vector<8x32xf32>
    %420 = arith.addf %418, %419 : vector<8x32xf32>
    %cst_146 = arith.constant dense<0.000000e+00> : vector<8x32xf32>
    %421 = tpu.matmul %414, %10, %cst_146 {dimension_numbers = #tpu.dot_dimension_numbers<[1], [0], [0], [1], [0, 0, 1, 1], [], []>} : vector<8x16xf32>, vector<16x32xf32>, vector<8x32xf32> -> vector<8x32xf32>
    %422 = vector.broadcast %22 : vector<1x32xf32> to vector<8x32xf32>
    %423 = arith.addf %421, %422 : vector<8x32xf32>
    %cst_147 = arith.constant dense<0.000000e+00> : vector<8x32xf32>
    %424 = tpu.matmul %405, %12, %cst_147 {dimension_numbers = #tpu.dot_dimension_numbers<[1], [0], [0], [1], [0, 0, 1, 1], [], []>} : vector<8x32xf32>, vector<32x32xf32>, vector<8x32xf32> -> vector<8x32xf32>
    %425 = vector.broadcast %24 : vector<1x32xf32> to vector<8x32xf32>
    %426 = arith.addf %424, %425 : vector<8x32xf32>
    %cst_148 = arith.constant dense<0.000000e+00> : vector<8x32xf32>
    %427 = tpu.matmul %405, %14, %cst_148 {dimension_numbers = #tpu.dot_dimension_numbers<[1], [0], [0], [1], [0, 0, 1, 1], [], []>} : vector<8x32xf32>, vector<32x32xf32>, vector<8x32xf32> -> vector<8x32xf32>
    %428 = vector.broadcast %26 : vector<1x32xf32> to vector<8x32xf32>
    %429 = arith.addf %427, %428 : vector<8x32xf32>
    %cst_149 = arith.constant dense<0.000000e+00> : vector<8x32xf32>
    %430 = tpu.matmul %405, %16, %cst_149 {dimension_numbers = #tpu.dot_dimension_numbers<[1], [0], [0], [1], [0, 0, 1, 1], [], []>} : vector<8x32xf32>, vector<32x32xf32>, vector<8x32xf32> -> vector<8x32xf32>
    %431 = vector.broadcast %28 : vector<1x32xf32> to vector<8x32xf32>
    %432 = arith.addf %430, %431 : vector<8x32xf32>
    %433 = arith.addf %417, %426 : vector<8x32xf32>
    %434 = arith.negf %433 : vector<8x32xf32>
    %435 = math.exp %434 : vector<8x32xf32>
    %cst_150 = arith.constant 1.000000e+00 : f32
    %436 = vector.broadcast %cst_150 : f32 to vector<8x32xf32>
    %437 = arith.addf %436, %435 : vector<8x32xf32>
    %438 = arith.divf %436, %437 : vector<8x32xf32>
    %439 = arith.addf %420, %429 : vector<8x32xf32>
    %440 = arith.negf %439 : vector<8x32xf32>
    %441 = math.exp %440 : vector<8x32xf32>
    %cst_151 = arith.constant 1.000000e+00 : f32
    %442 = vector.broadcast %cst_151 : f32 to vector<8x32xf32>
    %443 = arith.addf %442, %441 : vector<8x32xf32>
    %444 = arith.divf %442, %443 : vector<8x32xf32>
    %445 = arith.mulf %438, %432 : vector<8x32xf32>
    %446 = arith.addf %423, %445 : vector<8x32xf32>
    %447 = math.tanh %446 : vector<8x32xf32>
    %cst_152 = arith.constant 1.000000e+00 : f32
    %448 = vector.broadcast %cst_152 : f32 to vector<8x32xf32>
    %449 = arith.subf %448, %444 : vector<8x32xf32>
    %450 = arith.mulf %449, %447 : vector<8x32xf32>
    %451 = arith.mulf %444, %405 : vector<8x32xf32>
    %452 = arith.addf %450, %451 : vector<8x32xf32>
    %c9_i32 = arith.constant 9 : i32
    %c0_153 = arith.constant 0 : index
    %c0_154 = arith.constant 0 : index
    %453 = vector.load %arg8[%c0_153, %c0_154] : memref<128x16xf32, #tpu.memory_space<vmem>>, vector<128x16xf32>
    %c0_155 = arith.constant 0 : index
    %c0_156 = arith.constant 0 : index
    %c0_157 = arith.constant 0 : index
    %454 = vector.load %arg9[%c0_155, %c0_156, %c0_157] : memref<3x16x32xf32, #tpu.memory_space<vmem>>, vector<1x16x32xf32>
    %455 = vector.shape_cast %454 : vector<1x16x32xf32> to vector<16x32xf32>
    %c1_158 = arith.constant 1 : index
    %c0_159 = arith.constant 0 : index
    %c0_160 = arith.constant 0 : index
    %456 = vector.load %arg9[%c1_158, %c0_159, %c0_160] : memref<3x16x32xf32, #tpu.memory_space<vmem>>, vector<1x16x32xf32>
    %457 = vector.shape_cast %456 : vector<1x16x32xf32> to vector<16x32xf32>
    %c2_161 = arith.constant 2 : index
    %c0_162 = arith.constant 0 : index
    %c0_163 = arith.constant 0 : index
    %458 = vector.load %arg9[%c2_161, %c0_162, %c0_163] : memref<3x16x32xf32, #tpu.memory_space<vmem>>, vector<1x16x32xf32>
    %459 = vector.shape_cast %458 : vector<1x16x32xf32> to vector<16x32xf32>
    %c0_164 = arith.constant 0 : index
    %c0_165 = arith.constant 0 : index
    %c0_166 = arith.constant 0 : index
    %460 = vector.load %arg10[%c0_164, %c0_165, %c0_166] : memref<3x32x32xf32, #tpu.memory_space<vmem>>, vector<1x32x32xf32>
    %461 = vector.shape_cast %460 : vector<1x32x32xf32> to vector<32x32xf32>
    %c1_167 = arith.constant 1 : index
    %c0_168 = arith.constant 0 : index
    %c0_169 = arith.constant 0 : index
    %462 = vector.load %arg10[%c1_167, %c0_168, %c0_169] : memref<3x32x32xf32, #tpu.memory_space<vmem>>, vector<1x32x32xf32>
    %463 = vector.shape_cast %462 : vector<1x32x32xf32> to vector<32x32xf32>
    %c2_170 = arith.constant 2 : index
    %c0_171 = arith.constant 0 : index
    %c0_172 = arith.constant 0 : index
    %464 = vector.load %arg10[%c2_170, %c0_171, %c0_172] : memref<3x32x32xf32, #tpu.memory_space<vmem>>, vector<1x32x32xf32>
    %465 = vector.shape_cast %464 : vector<1x32x32xf32> to vector<32x32xf32>
    %c0_173 = arith.constant 0 : index
    %c0_174 = arith.constant 0 : index
    %c0_175 = arith.constant 0 : index
    %466 = vector.load %arg11[%c0_173, %c0_174, %c0_175] : memref<3x1x32xf32, #tpu.memory_space<vmem>>, vector<1x1x32xf32>
    %467 = vector.shape_cast %466 : vector<1x1x32xf32> to vector<1x32xf32>
    %c1_176 = arith.constant 1 : index
    %c0_177 = arith.constant 0 : index
    %c0_178 = arith.constant 0 : index
    %468 = vector.load %arg11[%c1_176, %c0_177, %c0_178] : memref<3x1x32xf32, #tpu.memory_space<vmem>>, vector<1x1x32xf32>
    %469 = vector.shape_cast %468 : vector<1x1x32xf32> to vector<1x32xf32>
    %c2_179 = arith.constant 2 : index
    %c0_180 = arith.constant 0 : index
    %c0_181 = arith.constant 0 : index
    %470 = vector.load %arg11[%c2_179, %c0_180, %c0_181] : memref<3x1x32xf32, #tpu.memory_space<vmem>>, vector<1x1x32xf32>
    %471 = vector.shape_cast %470 : vector<1x1x32xf32> to vector<1x32xf32>
    %c0_182 = arith.constant 0 : index
    %c0_183 = arith.constant 0 : index
    %c0_184 = arith.constant 0 : index
    %472 = vector.load %arg12[%c0_182, %c0_183, %c0_184] : memref<3x1x32xf32, #tpu.memory_space<vmem>>, vector<1x1x32xf32>
    %473 = vector.shape_cast %472 : vector<1x1x32xf32> to vector<1x32xf32>
    %c1_185 = arith.constant 1 : index
    %c0_186 = arith.constant 0 : index
    %c0_187 = arith.constant 0 : index
    %474 = vector.load %arg12[%c1_185, %c0_186, %c0_187] : memref<3x1x32xf32, #tpu.memory_space<vmem>>, vector<1x1x32xf32>
    %475 = vector.shape_cast %474 : vector<1x1x32xf32> to vector<1x32xf32>
    %c2_188 = arith.constant 2 : index
    %c0_189 = arith.constant 0 : index
    %c0_190 = arith.constant 0 : index
    %476 = vector.load %arg12[%c2_188, %c0_189, %c0_190] : memref<3x1x32xf32, #tpu.memory_space<vmem>>, vector<1x1x32xf32>
    %477 = vector.shape_cast %476 : vector<1x1x32xf32> to vector<1x32xf32>
    %c0_191 = arith.constant 0 : index
    %c0_192 = arith.constant 0 : index
    %478 = vector.load %arg13[%c0_191, %c0_192] : memref<32x128xf32, #tpu.memory_space<vmem>>, vector<32x128xf32>
    %c0_193 = arith.constant 0 : index
    %c0_194 = arith.constant 0 : index
    %479 = vector.load %arg14[%c0_193, %c0_194] : memref<1x128xf32, #tpu.memory_space<vmem>>, vector<1x128xf32>
    %c0_195 = arith.constant 0 : index
    %c0_196 = arith.constant 0 : index
    %c0_197 = arith.constant 0 : index
    %480 = vector.load %arg2[%c0_195, %c0_196, %c0_197] : memref<9x8x1xi32, #tpu.memory_space<vmem>>, vector<1x8x1xi32>
    %481 = vector.shape_cast %480 : vector<1x8x1xi32> to vector<8x1xi32>
    %482 = vector.broadcast %481 : vector<8x1xi32> to vector<8x128xi32>
    %483 = arith.cmpi eq, %0, %482 : vector<8x128xi32>
    %484 = arith.extui %483 : vector<8x128xi1> to vector<8x128xi32>
    %485 = arith.sitofp %484 : vector<8x128xi32> to vector<8x128xf32>
    %cst_198 = arith.constant dense<0.000000e+00> : vector<8x16xf32>
    %486 = tpu.matmul %485, %453, %cst_198 {dimension_numbers = #tpu.dot_dimension_numbers<[1], [0], [0], [1], [0, 0, 1, 1], [], []>} : vector<8x128xf32>, vector<128x16xf32>, vector<8x16xf32> -> vector<8x16xf32>
    %c0_i32_199 = arith.constant 0 : i32
    %cst_200 = arith.constant dense<0.000000e+00> : vector<8x32xf32>
    %487 = tpu.matmul %486, %455, %cst_200 {dimension_numbers = #tpu.dot_dimension_numbers<[1], [0], [0], [1], [0, 0, 1, 1], [], []>} : vector<8x16xf32>, vector<16x32xf32>, vector<8x32xf32> -> vector<8x32xf32>
    %488 = vector.broadcast %467 : vector<1x32xf32> to vector<8x32xf32>
    %489 = arith.addf %487, %488 : vector<8x32xf32>
    %cst_201 = arith.constant dense<0.000000e+00> : vector<8x32xf32>
    %490 = tpu.matmul %486, %457, %cst_201 {dimension_numbers = #tpu.dot_dimension_numbers<[1], [0], [0], [1], [0, 0, 1, 1], [], []>} : vector<8x16xf32>, vector<16x32xf32>, vector<8x32xf32> -> vector<8x32xf32>
    %491 = vector.broadcast %469 : vector<1x32xf32> to vector<8x32xf32>
    %492 = arith.addf %490, %491 : vector<8x32xf32>
    %cst_202 = arith.constant dense<0.000000e+00> : vector<8x32xf32>
    %493 = tpu.matmul %486, %459, %cst_202 {dimension_numbers = #tpu.dot_dimension_numbers<[1], [0], [0], [1], [0, 0, 1, 1], [], []>} : vector<8x16xf32>, vector<16x32xf32>, vector<8x32xf32> -> vector<8x32xf32>
    %494 = vector.broadcast %471 : vector<1x32xf32> to vector<8x32xf32>
    %495 = arith.addf %493, %494 : vector<8x32xf32>
    %cst_203 = arith.constant dense<0.000000e+00> : vector<8x32xf32>
    %496 = tpu.matmul %452, %461, %cst_203 {dimension_numbers = #tpu.dot_dimension_numbers<[1], [0], [0], [1], [0, 0, 1, 1], [], []>} : vector<8x32xf32>, vector<32x32xf32>, vector<8x32xf32> -> vector<8x32xf32>
    %497 = vector.broadcast %473 : vector<1x32xf32> to vector<8x32xf32>
    %498 = arith.addf %496, %497 : vector<8x32xf32>
    %cst_204 = arith.constant dense<0.000000e+00> : vector<8x32xf32>
    %499 = tpu.matmul %452, %463, %cst_204 {dimension_numbers = #tpu.dot_dimension_numbers<[1], [0], [0], [1], [0, 0, 1, 1], [], []>} : vector<8x32xf32>, vector<32x32xf32>, vector<8x32xf32> -> vector<8x32xf32>
    %500 = vector.broadcast %475 : vector<1x32xf32> to vector<8x32xf32>
    %501 = arith.addf %499, %500 : vector<8x32xf32>
    %cst_205 = arith.constant dense<0.000000e+00> : vector<8x32xf32>
    %502 = tpu.matmul %452, %465, %cst_205 {dimension_numbers = #tpu.dot_dimension_numbers<[1], [0], [0], [1], [0, 0, 1, 1], [], []>} : vector<8x32xf32>, vector<32x32xf32>, vector<8x32xf32> -> vector<8x32xf32>
    %503 = vector.broadcast %477 : vector<1x32xf32> to vector<8x32xf32>
    %504 = arith.addf %502, %503 : vector<8x32xf32>
    %505 = arith.addf %489, %498 : vector<8x32xf32>
    %506 = arith.negf %505 : vector<8x32xf32>
    %507 = math.exp %506 : vector<8x32xf32>
    %cst_206 = arith.constant 1.000000e+00 : f32
    %508 = vector.broadcast %cst_206 : f32 to vector<8x32xf32>
    %509 = arith.addf %508, %507 : vector<8x32xf32>
    %510 = arith.divf %508, %509 : vector<8x32xf32>
    %511 = arith.addf %492, %501 : vector<8x32xf32>
    %512 = arith.negf %511 : vector<8x32xf32>
    %513 = math.exp %512 : vector<8x32xf32>
    %cst_207 = arith.constant 1.000000e+00 : f32
    %514 = vector.broadcast %cst_207 : f32 to vector<8x32xf32>
    %515 = arith.addf %514, %513 : vector<8x32xf32>
    %516 = arith.divf %514, %515 : vector<8x32xf32>
    %517 = arith.mulf %510, %504 : vector<8x32xf32>
    %518 = arith.addf %495, %517 : vector<8x32xf32>
    %519 = math.tanh %518 : vector<8x32xf32>
    %cst_208 = arith.constant 1.000000e+00 : f32
    %520 = vector.broadcast %cst_208 : f32 to vector<8x32xf32>
    %521 = arith.subf %520, %516 : vector<8x32xf32>
    %522 = arith.mulf %521, %519 : vector<8x32xf32>
    %523 = arith.mulf %516, %452 : vector<8x32xf32>
    %524 = arith.addf %522, %523 : vector<8x32xf32>
    %cst_209 = arith.constant dense<0.000000e+00> : vector<8x128xf32>
    %525 = tpu.matmul %524, %478, %cst_209 {dimension_numbers = #tpu.dot_dimension_numbers<[1], [0], [0], [1], [0, 0, 1, 1], [], []>} : vector<8x32xf32>, vector<32x128xf32>, vector<8x128xf32> -> vector<8x128xf32>
    %526 = vector.broadcast %479 : vector<1x128xf32> to vector<8x128xf32>
    %527 = arith.addf %525, %526 : vector<8x128xf32>
    %528 = arith.index_cast %c0_i32_199 : i32 to index
    %c0_210 = arith.constant 0 : index
    %c0_211 = arith.constant 0 : index
    %529 = vector.load %arg15[%528, %c0_210, %c0_211] : memref<8x8x128xf32, #tpu.memory_space<vmem>>, vector<1x8x128xf32>
    %530 = vector.shape_cast %529 : vector<1x8x128xf32> to vector<8x128xf32>
    %531 = vector.shape_cast %527 : vector<8x128xf32> to vector<1x8x128xf32>
    tpu.vector_store %arg15[%528, %c0_210, %c0_211], %531 {strides = array<i32>} : memref<8x8x128xf32, #tpu.memory_space<vmem>>, vector<1x8x128xf32>,
    %532 = arith.select %2, %527, %3 : vector<8x128xi1>, vector<8x128xf32>
    %cst_212 = arith.constant dense<0xFF800000> : vector<8xf32>
    %533 = vector.multi_reduction <maximumf>, %532, %cst_212 [1] : vector<8x128xf32> to vector<8xf32>
    %534 = vector.shape_cast %533 : vector<8xf32> to vector<8x1xf32>
    %535 = vector.broadcast %534 : vector<8x1xf32> to vector<8x128xf32>
    %536 = arith.cmpf oeq, %532, %535 : vector<8x128xf32>
    %c128_i32 = arith.constant 128 : i32
    %537 = vector.broadcast %c128_i32 : i32 to vector<8x128xi32>
    %538 = arith.select %536, %0, %537 : vector<8x128xi1>, vector<8x128xi32>
    %cst_213 = arith.constant dense<2147483647> : vector<8xi32>
    %539 = vector.multi_reduction <minsi>, %538, %cst_213 [1] : vector<8x128xi32> to vector<8xi32>
    %540 = vector.shape_cast %539 : vector<8xi32> to vector<8x1xi32>
    %541 = arith.index_cast %c0_i32_199 : i32 to index
    %542 = memref.load %arg0[%541] : memref<8xi32, #tpu.memory_space<smem>>
    %c0_i32_214 = arith.constant 0 : i32
    %543 = arith.cmpi sgt, %542, %c0_i32_214 : i32
    %c1_i32_215 = arith.constant 1 : i32
    %544 = arith.addi %c0_i32_199, %c1_i32_215 : i32
    %545 = arith.index_cast %544 : i32 to index
    %c0_216 = arith.constant 0 : index
    %c0_217 = arith.constant 0 : index
    %546 = vector.load %arg2[%545, %c0_216, %c0_217] : memref<9x8x1xi32, #tpu.memory_space<vmem>>, vector<1x8x1xi32>
    %547 = vector.shape_cast %546 : vector<1x8x1xi32> to vector<8x1xi32>
    %548 = arith.select %543, %547, %540 : vector<8x1xi32>
    %549 = vector.broadcast %548 : vector<8x1xi32> to vector<8x128xi32>
    %550 = arith.cmpi eq, %0, %549 : vector<8x128xi32>
    %551 = arith.extui %550 : vector<8x128xi1> to vector<8x128xi32>
    %552 = arith.sitofp %551 : vector<8x128xi32> to vector<8x128xf32>
    %cst_218 = arith.constant dense<0.000000e+00> : vector<8x16xf32>
    %553 = tpu.matmul %552, %453, %cst_218 {dimension_numbers = #tpu.dot_dimension_numbers<[1], [0], [0], [1], [0, 0, 1, 1], [], []>} : vector<8x128xf32>, vector<128x16xf32>, vector<8x16xf32> -> vector<8x16xf32>
    %c1_i32_219 = arith.constant 1 : i32
    %cst_220 = arith.constant dense<0.000000e+00> : vector<8x32xf32>
    %554 = tpu.matmul %553, %455, %cst_220 {dimension_numbers = #tpu.dot_dimension_numbers<[1], [0], [0], [1], [0, 0, 1, 1], [], []>} : vector<8x16xf32>, vector<16x32xf32>, vector<8x32xf32> -> vector<8x32xf32>
    %555 = vector.broadcast %467 : vector<1x32xf32> to vector<8x32xf32>
    %556 = arith.addf %554, %555 : vector<8x32xf32>
    %cst_221 = arith.constant dense<0.000000e+00> : vector<8x32xf32>
    %557 = tpu.matmul %553, %457, %cst_221 {dimension_numbers = #tpu.dot_dimension_numbers<[1], [0], [0], [1], [0, 0, 1, 1], [], []>} : vector<8x16xf32>, vector<16x32xf32>, vector<8x32xf32> -> vector<8x32xf32>
    %558 = vector.broadcast %469 : vector<1x32xf32> to vector<8x32xf32>
    %559 = arith.addf %557, %558 : vector<8x32xf32>
    %cst_222 = arith.constant dense<0.000000e+00> : vector<8x32xf32>
    %560 = tpu.matmul %553, %459, %cst_222 {dimension_numbers = #tpu.dot_dimension_numbers<[1], [0], [0], [1], [0, 0, 1, 1], [], []>} : vector<8x16xf32>, vector<16x32xf32>, vector<8x32xf32> -> vector<8x32xf32>
    %561 = vector.broadcast %471 : vector<1x32xf32> to vector<8x32xf32>
    %562 = arith.addf %560, %561 : vector<8x32xf32>
    %cst_223 = arith.constant dense<0.000000e+00> : vector<8x32xf32>
    %563 = tpu.matmul %524, %461, %cst_223 {dimension_numbers = #tpu.dot_dimension_numbers<[1], [0], [0], [1], [0, 0, 1, 1], [], []>} : vector<8x32xf32>, vector<32x32xf32>, vector<8x32xf32> -> vector<8x32xf32>
    %564 = vector.broadcast %473 : vector<1x32xf32> to vector<8x32xf32>
    %565 = arith.addf %563, %564 : vector<8x32xf32>
    %cst_224 = arith.constant dense<0.000000e+00> : vector<8x32xf32>
    %566 = tpu.matmul %524, %463, %cst_224 {dimension_numbers = #tpu.dot_dimension_numbers<[1], [0], [0], [1], [0, 0, 1, 1], [], []>} : vector<8x32xf32>, vector<32x32xf32>, vector<8x32xf32> -> vector<8x32xf32>
    %567 = vector.broadcast %475 : vector<1x32xf32> to vector<8x32xf32>
    %568 = arith.addf %566, %567 : vector<8x32xf32>
    %cst_225 = arith.constant dense<0.000000e+00> : vector<8x32xf32>
    %569 = tpu.matmul %524, %465, %cst_225 {dimension_numbers = #tpu.dot_dimension_numbers<[1], [0], [0], [1], [0, 0, 1, 1], [], []>} : vector<8x32xf32>, vector<32x32xf32>, vector<8x32xf32> -> vector<8x32xf32>
    %570 = vector.broadcast %477 : vector<1x32xf32> to vector<8x32xf32>
    %571 = arith.addf %569, %570 : vector<8x32xf32>
    %572 = arith.addf %556, %565 : vector<8x32xf32>
    %573 = arith.negf %572 : vector<8x32xf32>
    %574 = math.exp %573 : vector<8x32xf32>
    %cst_226 = arith.constant 1.000000e+00 : f32
    %575 = vector.broadcast %cst_226 : f32 to vector<8x32xf32>
    %576 = arith.addf %575, %574 : vector<8x32xf32>
    %577 = arith.divf %575, %576 : vector<8x32xf32>
    %578 = arith.addf %559, %568 : vector<8x32xf32>
    %579 = arith.negf %578 : vector<8x32xf32>
    %580 = math.exp %579 : vector<8x32xf32>
    %cst_227 = arith.constant 1.000000e+00 : f32
    %581 = vector.broadcast %cst_227 : f32 to vector<8x32xf32>
    %582 = arith.addf %581, %580 : vector<8x32xf32>
    %583 = arith.divf %581, %582 : vector<8x32xf32>
    %584 = arith.mulf %577, %571 : vector<8x32xf32>
    %585 = arith.addf %562, %584 : vector<8x32xf32>
    %586 = math.tanh %585 : vector<8x32xf32>
    %cst_228 = arith.constant 1.000000e+00 : f32
    %587 = vector.broadcast %cst_228 : f32 to vector<8x32xf32>
    %588 = arith.subf %587, %583 : vector<8x32xf32>
    %589 = arith.mulf %588, %586 : vector<8x32xf32>
    %590 = arith.mulf %583, %524 : vector<8x32xf32>
    %591 = arith.addf %589, %590 : vector<8x32xf32>
    %cst_229 = arith.constant dense<0.000000e+00> : vector<8x128xf32>
    %592 = tpu.matmul %591, %478, %cst_229 {dimension_numbers = #tpu.dot_dimension_numbers<[1], [0], [0], [1], [0, 0, 1, 1], [], []>} : vector<8x32xf32>, vector<32x128xf32>, vector<8x128xf32> -> vector<8x128xf32>
    %593 = vector.broadcast %479 : vector<1x128xf32> to vector<8x128xf32>
    %594 = arith.addf %592, %593 : vector<8x128xf32>
    %595 = arith.index_cast %c1_i32_219 : i32 to index
    %c0_230 = arith.constant 0 : index
    %c0_231 = arith.constant 0 : index
    %596 = vector.load %arg15[%595, %c0_230, %c0_231] : memref<8x8x128xf32, #tpu.memory_space<vmem>>, vector<1x8x128xf32>
    %597 = vector.shape_cast %596 : vector<1x8x128xf32> to vector<8x128xf32>
    %598 = vector.shape_cast %594 : vector<8x128xf32> to vector<1x8x128xf32>
    tpu.vector_store %arg15[%595, %c0_230, %c0_231], %598 {strides = array<i32>} : memref<8x8x128xf32, #tpu.memory_space<vmem>>, vector<1x8x128xf32>,
    %599 = arith.select %2, %594, %3 : vector<8x128xi1>, vector<8x128xf32>
    %cst_232 = arith.constant dense<0xFF800000> : vector<8xf32>
    %600 = vector.multi_reduction <maximumf>, %599, %cst_232 [1] : vector<8x128xf32> to vector<8xf32>
    %601 = vector.shape_cast %600 : vector<8xf32> to vector<8x1xf32>
    %602 = vector.broadcast %601 : vector<8x1xf32> to vector<8x128xf32>
    %603 = arith.cmpf oeq, %599, %602 : vector<8x128xf32>
    %c128_i32_233 = arith.constant 128 : i32
    %604 = vector.broadcast %c128_i32_233 : i32 to vector<8x128xi32>
    %605 = arith.select %603, %0, %604 : vector<8x128xi1>, vector<8x128xi32>
    %cst_234 = arith.constant dense<2147483647> : vector<8xi32>
    %606 = vector.multi_reduction <minsi>, %605, %cst_234 [1] : vector<8x128xi32> to vector<8xi32>
    %607 = vector.shape_cast %606 : vector<8xi32> to vector<8x1xi32>
    %608 = arith.index_cast %c1_i32_219 : i32 to index
    %609 = memref.load %arg0[%608] : memref<8xi32, #tpu.memory_space<smem>>
    %c0_i32_235 = arith.constant 0 : i32
    %610 = arith.cmpi sgt, %609, %c0_i32_235 : i32
    %c1_i32_236 = arith.constant 1 : i32
    %611 = arith.addi %c1_i32_219, %c1_i32_236 : i32
    %612 = arith.index_cast %611 : i32 to index
    %c0_237 = arith.constant 0 : index
    %c0_238 = arith.constant 0 : index
    %613 = vector.load %arg2[%612, %c0_237, %c0_238] : memref<9x8x1xi32, #tpu.memory_space<vmem>>, vector<1x8x1xi32>
    %614 = vector.shape_cast %613 : vector<1x8x1xi32> to vector<8x1xi32>
    %615 = arith.select %610, %614, %607 : vector<8x1xi32>
    %616 = vector.broadcast %615 : vector<8x1xi32> to vector<8x128xi32>
    %617 = arith.cmpi eq, %0, %616 : vector<8x128xi32>
    %618 = arith.extui %617 : vector<8x128xi1> to vector<8x128xi32>
    %619 = arith.sitofp %618 : vector<8x128xi32> to vector<8x128xf32>
    %cst_239 = arith.constant dense<0.000000e+00> : vector<8x16xf32>
    %620 = tpu.matmul %619, %453, %cst_239 {dimension_numbers = #tpu.dot_dimension_numbers<[1], [0], [0], [1], [0, 0, 1, 1], [], []>} : vector<8x128xf32>, vector<128x16xf32>, vector<8x16xf32> -> vector<8x16xf32>
    %c2_i32_240 = arith.constant 2 : i32
    %cst_241 = arith.constant dense<0.000000e+00> : vector<8x32xf32>
    %621 = tpu.matmul %620, %455, %cst_241 {dimension_numbers = #tpu.dot_dimension_numbers<[1], [0], [0], [1], [0, 0, 1, 1], [], []>} : vector<8x16xf32>, vector<16x32xf32>, vector<8x32xf32> -> vector<8x32xf32>
    %622 = vector.broadcast %467 : vector<1x32xf32> to vector<8x32xf32>
    %623 = arith.addf %621, %622 : vector<8x32xf32>
    %cst_242 = arith.constant dense<0.000000e+00> : vector<8x32xf32>
    %624 = tpu.matmul %620, %457, %cst_242 {dimension_numbers = #tpu.dot_dimension_numbers<[1], [0], [0], [1], [0, 0, 1, 1], [], []>} : vector<8x16xf32>, vector<16x32xf32>, vector<8x32xf32> -> vector<8x32xf32>
    %625 = vector.broadcast %469 : vector<1x32xf32> to vector<8x32xf32>
    %626 = arith.addf %624, %625 : vector<8x32xf32>
    %cst_243 = arith.constant dense<0.000000e+00> : vector<8x32xf32>
    %627 = tpu.matmul %620, %459, %cst_243 {dimension_numbers = #tpu.dot_dimension_numbers<[1], [0], [0], [1], [0, 0, 1, 1], [], []>} : vector<8x16xf32>, vector<16x32xf32>, vector<8x32xf32> -> vector<8x32xf32>
    %628 = vector.broadcast %471 : vector<1x32xf32> to vector<8x32xf32>
    %629 = arith.addf %627, %628 : vector<8x32xf32>
    %cst_244 = arith.constant dense<0.000000e+00> : vector<8x32xf32>
    %630 = tpu.matmul %591, %461, %cst_244 {dimension_numbers = #tpu.dot_dimension_numbers<[1], [0], [0], [1], [0, 0, 1, 1], [], []>} : vector<8x32xf32>, vector<32x32xf32>, vector<8x32xf32> -> vector<8x32xf32>
    %631 = vector.broadcast %473 : vector<1x32xf32> to vector<8x32xf32>
    %632 = arith.addf %630, %631 : vector<8x32xf32>
    %cst_245 = arith.constant dense<0.000000e+00> : vector<8x32xf32>
    %633 = tpu.matmul %591, %463, %cst_245 {dimension_numbers = #tpu.dot_dimension_numbers<[1], [0], [0], [1], [0, 0, 1, 1], [], []>} : vector<8x32xf32>, vector<32x32xf32>, vector<8x32xf32> -> vector<8x32xf32>
    %634 = vector.broadcast %475 : vector<1x32xf32> to vector<8x32xf32>
    %635 = arith.addf %633, %634 : vector<8x32xf32>
    %cst_246 = arith.constant dense<0.000000e+00> : vector<8x32xf32>
    %636 = tpu.matmul %591, %465, %cst_246 {dimension_numbers = #tpu.dot_dimension_numbers<[1], [0], [0], [1], [0, 0, 1, 1], [], []>} : vector<8x32xf32>, vector<32x32xf32>, vector<8x32xf32> -> vector<8x32xf32>
    %637 = vector.broadcast %477 : vector<1x32xf32> to vector<8x32xf32>
    %638 = arith.addf %636, %637 : vector<8x32xf32>
    %639 = arith.addf %623, %632 : vector<8x32xf32>
    %640 = arith.negf %639 : vector<8x32xf32>
    %641 = math.exp %640 : vector<8x32xf32>
    %cst_247 = arith.constant 1.000000e+00 : f32
    %642 = vector.broadcast %cst_247 : f32 to vector<8x32xf32>
    %643 = arith.addf %642, %641 : vector<8x32xf32>
    %644 = arith.divf %642, %643 : vector<8x32xf32>
    %645 = arith.addf %626, %635 : vector<8x32xf32>
    %646 = arith.negf %645 : vector<8x32xf32>
    %647 = math.exp %646 : vector<8x32xf32>
    %cst_248 = arith.constant 1.000000e+00 : f32
    %648 = vector.broadcast %cst_248 : f32 to vector<8x32xf32>
    %649 = arith.addf %648, %647 : vector<8x32xf32>
    %650 = arith.divf %648, %649 : vector<8x32xf32>
    %651 = arith.mulf %644, %638 : vector<8x32xf32>
    %652 = arith.addf %629, %651 : vector<8x32xf32>
    %653 = math.tanh %652 : vector<8x32xf32>
    %cst_249 = arith.constant 1.000000e+00 : f32
    %654 = vector.broadcast %cst_249 : f32 to vector<8x32xf32>
    %655 = arith.subf %654, %650 : vector<8x32xf32>
    %656 = arith.mulf %655, %653 : vector<8x32xf32>
    %657 = arith.mulf %650, %591 : vector<8x32xf32>
    %658 = arith.addf %656, %657 : vector<8x32xf32>
    %cst_250 = arith.constant dense<0.000000e+00> : vector<8x128xf32>
    %659 = tpu.matmul %658, %478, %cst_250 {dimension_numbers = #tpu.dot_dimension_numbers<[1], [0], [0], [1], [0, 0, 1, 1], [], []>} : vector<8x32xf32>, vector<32x128xf32>, vector<8x128xf32> -> vector<8x128xf32>
    %660 = vector.broadcast %479 : vector<1x128xf32> to vector<8x128xf32>
    %661 = arith.addf %659, %660 : vector<8x128xf32>
    %662 = arith.index_cast %c2_i32_240 : i32 to index
    %c0_251 = arith.constant 0 : index
    %c0_252 = arith.constant 0 : index
    %663 = vector.load %arg15[%662, %c0_251, %c0_252] : memref<8x8x128xf32, #tpu.memory_space<vmem>>, vector<1x8x128xf32>
    %664 = vector.shape_cast %663 : vector<1x8x128xf32> to vector<8x128xf32>
    %665 = vector.shape_cast %661 : vector<8x128xf32> to vector<1x8x128xf32>
    tpu.vector_store %arg15[%662, %c0_251, %c0_252], %665 {strides = array<i32>} : memref<8x8x128xf32, #tpu.memory_space<vmem>>, vector<1x8x128xf32>,
    %666 = arith.select %2, %661, %3 : vector<8x128xi1>, vector<8x128xf32>
    %cst_253 = arith.constant dense<0xFF800000> : vector<8xf32>
    %667 = vector.multi_reduction <maximumf>, %666, %cst_253 [1] : vector<8x128xf32> to vector<8xf32>
    %668 = vector.shape_cast %667 : vector<8xf32> to vector<8x1xf32>
    %669 = vector.broadcast %668 : vector<8x1xf32> to vector<8x128xf32>
    %670 = arith.cmpf oeq, %666, %669 : vector<8x128xf32>
    %c128_i32_254 = arith.constant 128 : i32
    %671 = vector.broadcast %c128_i32_254 : i32 to vector<8x128xi32>
    %672 = arith.select %670, %0, %671 : vector<8x128xi1>, vector<8x128xi32>
    %cst_255 = arith.constant dense<2147483647> : vector<8xi32>
    %673 = vector.multi_reduction <minsi>, %672, %cst_255 [1] : vector<8x128xi32> to vector<8xi32>
    %674 = vector.shape_cast %673 : vector<8xi32> to vector<8x1xi32>
    %675 = arith.index_cast %c2_i32_240 : i32 to index
    %676 = memref.load %arg0[%675] : memref<8xi32, #tpu.memory_space<smem>>
    %c0_i32_256 = arith.constant 0 : i32
    %677 = arith.cmpi sgt, %676, %c0_i32_256 : i32
    %c1_i32_257 = arith.constant 1 : i32
    %678 = arith.addi %c2_i32_240, %c1_i32_257 : i32
    %679 = arith.index_cast %678 : i32 to index
    %c0_258 = arith.constant 0 : index
    %c0_259 = arith.constant 0 : index
    %680 = vector.load %arg2[%679, %c0_258, %c0_259] : memref<9x8x1xi32, #tpu.memory_space<vmem>>, vector<1x8x1xi32>
    %681 = vector.shape_cast %680 : vector<1x8x1xi32> to vector<8x1xi32>
    %682 = arith.select %677, %681, %674 : vector<8x1xi32>
    %683 = vector.broadcast %682 : vector<8x1xi32> to vector<8x128xi32>
    %684 = arith.cmpi eq, %0, %683 : vector<8x128xi32>
    %685 = arith.extui %684 : vector<8x128xi1> to vector<8x128xi32>
    %686 = arith.sitofp %685 : vector<8x128xi32> to vector<8x128xf32>
    %cst_260 = arith.constant dense<0.000000e+00> : vector<8x16xf32>
    %687 = tpu.matmul %686, %453, %cst_260 {dimension_numbers = #tpu.dot_dimension_numbers<[1], [0], [0], [1], [0, 0, 1, 1], [], []>} : vector<8x128xf32>, vector<128x16xf32>, vector<8x16xf32> -> vector<8x16xf32>
    %c3_i32_261 = arith.constant 3 : i32
    %cst_262 = arith.constant dense<0.000000e+00> : vector<8x32xf32>
    %688 = tpu.matmul %687, %455, %cst_262 {dimension_numbers = #tpu.dot_dimension_numbers<[1], [0], [0], [1], [0, 0, 1, 1], [], []>} : vector<8x16xf32>, vector<16x32xf32>, vector<8x32xf32> -> vector<8x32xf32>
    %689 = vector.broadcast %467 : vector<1x32xf32> to vector<8x32xf32>
    %690 = arith.addf %688, %689 : vector<8x32xf32>
    %cst_263 = arith.constant dense<0.000000e+00> : vector<8x32xf32>
    %691 = tpu.matmul %687, %457, %cst_263 {dimension_numbers = #tpu.dot_dimension_numbers<[1], [0], [0], [1], [0, 0, 1, 1], [], []>} : vector<8x16xf32>, vector<16x32xf32>, vector<8x32xf32> -> vector<8x32xf32>
    %692 = vector.broadcast %469 : vector<1x32xf32> to vector<8x32xf32>
    %693 = arith.addf %691, %692 : vector<8x32xf32>
    %cst_264 = arith.constant dense<0.000000e+00> : vector<8x32xf32>
    %694 = tpu.matmul %687, %459, %cst_264 {dimension_numbers = #tpu.dot_dimension_numbers<[1], [0], [0], [1], [0, 0, 1, 1], [], []>} : vector<8x16xf32>, vector<16x32xf32>, vector<8x32xf32> -> vector<8x32xf32>
    %695 = vector.broadcast %471 : vector<1x32xf32> to vector<8x32xf32>
    %696 = arith.addf %694, %695 : vector<8x32xf32>
    %cst_265 = arith.constant dense<0.000000e+00> : vector<8x32xf32>
    %697 = tpu.matmul %658, %461, %cst_265 {dimension_numbers = #tpu.dot_dimension_numbers<[1], [0], [0], [1], [0, 0, 1, 1], [], []>} : vector<8x32xf32>, vector<32x32xf32>, vector<8x32xf32> -> vector<8x32xf32>
    %698 = vector.broadcast %473 : vector<1x32xf32> to vector<8x32xf32>
    %699 = arith.addf %697, %698 : vector<8x32xf32>
    %cst_266 = arith.constant dense<0.000000e+00> : vector<8x32xf32>
    %700 = tpu.matmul %658, %463, %cst_266 {dimension_numbers = #tpu.dot_dimension_numbers<[1], [0], [0], [1], [0, 0, 1, 1], [], []>} : vector<8x32xf32>, vector<32x32xf32>, vector<8x32xf32> -> vector<8x32xf32>
    %701 = vector.broadcast %475 : vector<1x32xf32> to vector<8x32xf32>
    %702 = arith.addf %700, %701 : vector<8x32xf32>
    %cst_267 = arith.constant dense<0.000000e+00> : vector<8x32xf32>
    %703 = tpu.matmul %658, %465, %cst_267 {dimension_numbers = #tpu.dot_dimension_numbers<[1], [0], [0], [1], [0, 0, 1, 1], [], []>} : vector<8x32xf32>, vector<32x32xf32>, vector<8x32xf32> -> vector<8x32xf32>
    %704 = vector.broadcast %477 : vector<1x32xf32> to vector<8x32xf32>
    %705 = arith.addf %703, %704 : vector<8x32xf32>
    %706 = arith.addf %690, %699 : vector<8x32xf32>
    %707 = arith.negf %706 : vector<8x32xf32>
    %708 = math.exp %707 : vector<8x32xf32>
    %cst_268 = arith.constant 1.000000e+00 : f32
    %709 = vector.broadcast %cst_268 : f32 to vector<8x32xf32>
    %710 = arith.addf %709, %708 : vector<8x32xf32>
    %711 = arith.divf %709, %710 : vector<8x32xf32>
    %712 = arith.addf %693, %702 : vector<8x32xf32>
    %713 = arith.negf %712 : vector<8x32xf32>
    %714 = math.exp %713 : vector<8x32xf32>
    %cst_269 = arith.constant 1.000000e+00 : f32
    %715 = vector.broadcast %cst_269 : f32 to vector<8x32xf32>
    %716 = arith.addf %715, %714 : vector<8x32xf32>
    %717 = arith.divf %715, %716 : vector<8x32xf32>
    %718 = arith.mulf %711, %705 : vector<8x32xf32>
    %719 = arith.addf %696, %718 : vector<8x32xf32>
    %720 = math.tanh %719 : vector<8x32xf32>
    %cst_270 = arith.constant 1.000000e+00 : f32
    %721 = vector.broadcast %cst_270 : f32 to vector<8x32xf32>
    %722 = arith.subf %721, %717 : vector<8x32xf32>
    %723 = arith.mulf %722, %720 : vector<8x32xf32>
    %724 = arith.mulf %717, %658 : vector<8x32xf32>
    %725 = arith.addf %723, %724 : vector<8x32xf32>
    %cst_271 = arith.constant dense<0.000000e+00> : vector<8x128xf32>
    %726 = tpu.matmul %725, %478, %cst_271 {dimension_numbers = #tpu.dot_dimension_numbers<[1], [0], [0], [1], [0, 0, 1, 1], [], []>} : vector<8x32xf32>, vector<32x128xf32>, vector<8x128xf32> -> vector<8x128xf32>
    %727 = vector.broadcast %479 : vector<1x128xf32> to vector<8x128xf32>
    %728 = arith.addf %726, %727 : vector<8x128xf32>
    %729 = arith.index_cast %c3_i32_261 : i32 to index
    %c0_272 = arith.constant 0 : index
    %c0_273 = arith.constant 0 : index
    %730 = vector.load %arg15[%729, %c0_272, %c0_273] : memref<8x8x128xf32, #tpu.memory_space<vmem>>, vector<1x8x128xf32>
    %731 = vector.shape_cast %730 : vector<1x8x128xf32> to vector<8x128xf32>
    %732 = vector.shape_cast %728 : vector<8x128xf32> to vector<1x8x128xf32>
    tpu.vector_store %arg15[%729, %c0_272, %c0_273], %732 {strides = array<i32>} : memref<8x8x128xf32, #tpu.memory_space<vmem>>, vector<1x8x128xf32>,
    %733 = arith.select %2, %728, %3 : vector<8x128xi1>, vector<8x128xf32>
    %cst_274 = arith.constant dense<0xFF800000> : vector<8xf32>
    %734 = vector.multi_reduction <maximumf>, %733, %cst_274 [1] : vector<8x128xf32> to vector<8xf32>
    %735 = vector.shape_cast %734 : vector<8xf32> to vector<8x1xf32>
    %736 = vector.broadcast %735 : vector<8x1xf32> to vector<8x128xf32>
    %737 = arith.cmpf oeq, %733, %736 : vector<8x128xf32>
    %c128_i32_275 = arith.constant 128 : i32
    %738 = vector.broadcast %c128_i32_275 : i32 to vector<8x128xi32>
    %739 = arith.select %737, %0, %738 : vector<8x128xi1>, vector<8x128xi32>
    %cst_276 = arith.constant dense<2147483647> : vector<8xi32>
    %740 = vector.multi_reduction <minsi>, %739, %cst_276 [1] : vector<8x128xi32> to vector<8xi32>
    %741 = vector.shape_cast %740 : vector<8xi32> to vector<8x1xi32>
    %742 = arith.index_cast %c3_i32_261 : i32 to index
    %743 = memref.load %arg0[%742] : memref<8xi32, #tpu.memory_space<smem>>
    %c0_i32_277 = arith.constant 0 : i32
    %744 = arith.cmpi sgt, %743, %c0_i32_277 : i32
    %c1_i32_278 = arith.constant 1 : i32
    %745 = arith.addi %c3_i32_261, %c1_i32_278 : i32
    %746 = arith.index_cast %745 : i32 to index
    %c0_279 = arith.constant 0 : index
    %c0_280 = arith.constant 0 : index
    %747 = vector.load %arg2[%746, %c0_279, %c0_280] : memref<9x8x1xi32, #tpu.memory_space<vmem>>, vector<1x8x1xi32>
    %748 = vector.shape_cast %747 : vector<1x8x1xi32> to vector<8x1xi32>
    %749 = arith.select %744, %748, %741 : vector<8x1xi32>
    %750 = vector.broadcast %749 : vector<8x1xi32> to vector<8x128xi32>
    %751 = arith.cmpi eq, %0, %750 : vector<8x128xi32>
    %752 = arith.extui %751 : vector<8x128xi1> to vector<8x128xi32>
    %753 = arith.sitofp %752 : vector<8x128xi32> to vector<8x128xf32>
    %cst_281 = arith.constant dense<0.000000e+00> : vector<8x16xf32>
    %754 = tpu.matmul %753, %453, %cst_281 {dimension_numbers = #tpu.dot_dimension_numbers<[1], [0], [0], [1], [0, 0, 1, 1], [], []>} : vector<8x128xf32>, vector<128x16xf32>, vector<8x16xf32> -> vector<8x16xf32>
    %c4_i32_282 = arith.constant 4 : i32
    %cst_283 = arith.constant dense<0.000000e+00> : vector<8x32xf32>
    %755 = tpu.matmul %754, %455, %cst_283 {dimension_numbers = #tpu.dot_dimension_numbers<[1], [0], [0], [1], [0, 0, 1, 1], [], []>} : vector<8x16xf32>, vector<16x32xf32>, vector<8x32xf32> -> vector<8x32xf32>
    %756 = vector.broadcast %467 : vector<1x32xf32> to vector<8x32xf32>
    %757 = arith.addf %755, %756 : vector<8x32xf32>
    %cst_284 = arith.constant dense<0.000000e+00> : vector<8x32xf32>
    %758 = tpu.matmul %754, %457, %cst_284 {dimension_numbers = #tpu.dot_dimension_numbers<[1], [0], [0], [1], [0, 0, 1, 1], [], []>} : vector<8x16xf32>, vector<16x32xf32>, vector<8x32xf32> -> vector<8x32xf32>
    %759 = vector.broadcast %469 : vector<1x32xf32> to vector<8x32xf32>
    %760 = arith.addf %758, %759 : vector<8x32xf32>
    %cst_285 = arith.constant dense<0.000000e+00> : vector<8x32xf32>
    %761 = tpu.matmul %754, %459, %cst_285 {dimension_numbers = #tpu.dot_dimension_numbers<[1], [0], [0], [1], [0, 0, 1, 1], [], []>} : vector<8x16xf32>, vector<16x32xf32>, vector<8x32xf32> -> vector<8x32xf32>
    %762 = vector.broadcast %471 : vector<1x32xf32> to vector<8x32xf32>
    %763 = arith.addf %761, %762 : vector<8x32xf32>
    %cst_286 = arith.constant dense<0.000000e+00> : vector<8x32xf32>
    %764 = tpu.matmul %725, %461, %cst_286 {dimension_numbers = #tpu.dot_dimension_numbers<[1], [0], [0], [1], [0, 0, 1, 1], [], []>} : vector<8x32xf32>, vector<32x32xf32>, vector<8x32xf32> -> vector<8x32xf32>
    %765 = vector.broadcast %473 : vector<1x32xf32> to vector<8x32xf32>
    %766 = arith.addf %764, %765 : vector<8x32xf32>
    %cst_287 = arith.constant dense<0.000000e+00> : vector<8x32xf32>
    %767 = tpu.matmul %725, %463, %cst_287 {dimension_numbers = #tpu.dot_dimension_numbers<[1], [0], [0], [1], [0, 0, 1, 1], [], []>} : vector<8x32xf32>, vector<32x32xf32>, vector<8x32xf32> -> vector<8x32xf32>
    %768 = vector.broadcast %475 : vector<1x32xf32> to vector<8x32xf32>
    %769 = arith.addf %767, %768 : vector<8x32xf32>
    %cst_288 = arith.constant dense<0.000000e+00> : vector<8x32xf32>
    %770 = tpu.matmul %725, %465, %cst_288 {dimension_numbers = #tpu.dot_dimension_numbers<[1], [0], [0], [1], [0, 0, 1, 1], [], []>} : vector<8x32xf32>, vector<32x32xf32>, vector<8x32xf32> -> vector<8x32xf32>
    %771 = vector.broadcast %477 : vector<1x32xf32> to vector<8x32xf32>
    %772 = arith.addf %770, %771 : vector<8x32xf32>
    %773 = arith.addf %757, %766 : vector<8x32xf32>
    %774 = arith.negf %773 : vector<8x32xf32>
    %775 = math.exp %774 : vector<8x32xf32>
    %cst_289 = arith.constant 1.000000e+00 : f32
    %776 = vector.broadcast %cst_289 : f32 to vector<8x32xf32>
    %777 = arith.addf %776, %775 : vector<8x32xf32>
    %778 = arith.divf %776, %777 : vector<8x32xf32>
    %779 = arith.addf %760, %769 : vector<8x32xf32>
    %780 = arith.negf %779 : vector<8x32xf32>
    %781 = math.exp %780 : vector<8x32xf32>
    %cst_290 = arith.constant 1.000000e+00 : f32
    %782 = vector.broadcast %cst_290 : f32 to vector<8x32xf32>
    %783 = arith.addf %782, %781 : vector<8x32xf32>
    %784 = arith.divf %782, %783 : vector<8x32xf32>
    %785 = arith.mulf %778, %772 : vector<8x32xf32>
    %786 = arith.addf %763, %785 : vector<8x32xf32>
    %787 = math.tanh %786 : vector<8x32xf32>
    %cst_291 = arith.constant 1.000000e+00 : f32
    %788 = vector.broadcast %cst_291 : f32 to vector<8x32xf32>
    %789 = arith.subf %788, %784 : vector<8x32xf32>
    %790 = arith.mulf %789, %787 : vector<8x32xf32>
    %791 = arith.mulf %784, %725 : vector<8x32xf32>
    %792 = arith.addf %790, %791 : vector<8x32xf32>
    %cst_292 = arith.constant dense<0.000000e+00> : vector<8x128xf32>
    %793 = tpu.matmul %792, %478, %cst_292 {dimension_numbers = #tpu.dot_dimension_numbers<[1], [0], [0], [1], [0, 0, 1, 1], [], []>} : vector<8x32xf32>, vector<32x128xf32>, vector<8x128xf32> -> vector<8x128xf32>
    %794 = vector.broadcast %479 : vector<1x128xf32> to vector<8x128xf32>
    %795 = arith.addf %793, %794 : vector<8x128xf32>
    %796 = arith.index_cast %c4_i32_282 : i32 to index
    %c0_293 = arith.constant 0 : index
    %c0_294 = arith.constant 0 : index
    %797 = vector.load %arg15[%796, %c0_293, %c0_294] : memref<8x8x128xf32, #tpu.memory_space<vmem>>, vector<1x8x128xf32>
    %798 = vector.shape_cast %797 : vector<1x8x128xf32> to vector<8x128xf32>
    %799 = vector.shape_cast %795 : vector<8x128xf32> to vector<1x8x128xf32>
    tpu.vector_store %arg15[%796, %c0_293, %c0_294], %799 {strides = array<i32>} : memref<8x8x128xf32, #tpu.memory_space<vmem>>, vector<1x8x128xf32>,
    %800 = arith.select %2, %795, %3 : vector<8x128xi1>, vector<8x128xf32>
    %cst_295 = arith.constant dense<0xFF800000> : vector<8xf32>
    %801 = vector.multi_reduction <maximumf>, %800, %cst_295 [1] : vector<8x128xf32> to vector<8xf32>
    %802 = vector.shape_cast %801 : vector<8xf32> to vector<8x1xf32>
    %803 = vector.broadcast %802 : vector<8x1xf32> to vector<8x128xf32>
    %804 = arith.cmpf oeq, %800, %803 : vector<8x128xf32>
    %c128_i32_296 = arith.constant 128 : i32
    %805 = vector.broadcast %c128_i32_296 : i32 to vector<8x128xi32>
    %806 = arith.select %804, %0, %805 : vector<8x128xi1>, vector<8x128xi32>
    %cst_297 = arith.constant dense<2147483647> : vector<8xi32>
    %807 = vector.multi_reduction <minsi>, %806, %cst_297 [1] : vector<8x128xi32> to vector<8xi32>
    %808 = vector.shape_cast %807 : vector<8xi32> to vector<8x1xi32>
    %809 = arith.index_cast %c4_i32_282 : i32 to index
    %810 = memref.load %arg0[%809] : memref<8xi32, #tpu.memory_space<smem>>
    %c0_i32_298 = arith.constant 0 : i32
    %811 = arith.cmpi sgt, %810, %c0_i32_298 : i32
    %c1_i32_299 = arith.constant 1 : i32
    %812 = arith.addi %c4_i32_282, %c1_i32_299 : i32
    %813 = arith.index_cast %812 : i32 to index
    %c0_300 = arith.constant 0 : index
    %c0_301 = arith.constant 0 : index
    %814 = vector.load %arg2[%813, %c0_300, %c0_301] : memref<9x8x1xi32, #tpu.memory_space<vmem>>, vector<1x8x1xi32>
    %815 = vector.shape_cast %814 : vector<1x8x1xi32> to vector<8x1xi32>
    %816 = arith.select %811, %815, %808 : vector<8x1xi32>
    %817 = vector.broadcast %816 : vector<8x1xi32> to vector<8x128xi32>
    %818 = arith.cmpi eq, %0, %817 : vector<8x128xi32>
    %819 = arith.extui %818 : vector<8x128xi1> to vector<8x128xi32>
    %820 = arith.sitofp %819 : vector<8x128xi32> to vector<8x128xf32>
    %cst_302 = arith.constant dense<0.000000e+00> : vector<8x16xf32>
    %821 = tpu.matmul %820, %453, %cst_302 {dimension_numbers = #tpu.dot_dimension_numbers<[1], [0], [0], [1], [0, 0, 1, 1], [], []>} : vector<8x128xf32>, vector<128x16xf32>, vector<8x16xf32> -> vector<8x16xf32>
    %c5_i32_303 = arith.constant 5 : i32
    %cst_304 = arith.constant dense<0.000000e+00> : vector<8x32xf32>
    %822 = tpu.matmul %821, %455, %cst_304 {dimension_numbers = #tpu.dot_dimension_numbers<[1], [0], [0], [1], [0, 0, 1, 1], [], []>} : vector<8x16xf32>, vector<16x32xf32>, vector<8x32xf32> -> vector<8x32xf32>
    %823 = vector.broadcast %467 : vector<1x32xf32> to vector<8x32xf32>
    %824 = arith.addf %822, %823 : vector<8x32xf32>
    %cst_305 = arith.constant dense<0.000000e+00> : vector<8x32xf32>
    %825 = tpu.matmul %821, %457, %cst_305 {dimension_numbers = #tpu.dot_dimension_numbers<[1], [0], [0], [1], [0, 0, 1, 1], [], []>} : vector<8x16xf32>, vector<16x32xf32>, vector<8x32xf32> -> vector<8x32xf32>
    %826 = vector.broadcast %469 : vector<1x32xf32> to vector<8x32xf32>
    %827 = arith.addf %825, %826 : vector<8x32xf32>
    %cst_306 = arith.constant dense<0.000000e+00> : vector<8x32xf32>
    %828 = tpu.matmul %821, %459, %cst_306 {dimension_numbers = #tpu.dot_dimension_numbers<[1], [0], [0], [1], [0, 0, 1, 1], [], []>} : vector<8x16xf32>, vector<16x32xf32>, vector<8x32xf32> -> vector<8x32xf32>
    %829 = vector.broadcast %471 : vector<1x32xf32> to vector<8x32xf32>
    %830 = arith.addf %828, %829 : vector<8x32xf32>
    %cst_307 = arith.constant dense<0.000000e+00> : vector<8x32xf32>
    %831 = tpu.matmul %792, %461, %cst_307 {dimension_numbers = #tpu.dot_dimension_numbers<[1], [0], [0], [1], [0, 0, 1, 1], [], []>} : vector<8x32xf32>, vector<32x32xf32>, vector<8x32xf32> -> vector<8x32xf32>
    %832 = vector.broadcast %473 : vector<1x32xf32> to vector<8x32xf32>
    %833 = arith.addf %831, %832 : vector<8x32xf32>
    %cst_308 = arith.constant dense<0.000000e+00> : vector<8x32xf32>
    %834 = tpu.matmul %792, %463, %cst_308 {dimension_numbers = #tpu.dot_dimension_numbers<[1], [0], [0], [1], [0, 0, 1, 1], [], []>} : vector<8x32xf32>, vector<32x32xf32>, vector<8x32xf32> -> vector<8x32xf32>
    %835 = vector.broadcast %475 : vector<1x32xf32> to vector<8x32xf32>
    %836 = arith.addf %834, %835 : vector<8x32xf32>
    %cst_309 = arith.constant dense<0.000000e+00> : vector<8x32xf32>
    %837 = tpu.matmul %792, %465, %cst_309 {dimension_numbers = #tpu.dot_dimension_numbers<[1], [0], [0], [1], [0, 0, 1, 1], [], []>} : vector<8x32xf32>, vector<32x32xf32>, vector<8x32xf32> -> vector<8x32xf32>
    %838 = vector.broadcast %477 : vector<1x32xf32> to vector<8x32xf32>
    %839 = arith.addf %837, %838 : vector<8x32xf32>
    %840 = arith.addf %824, %833 : vector<8x32xf32>
    %841 = arith.negf %840 : vector<8x32xf32>
    %842 = math.exp %841 : vector<8x32xf32>
    %cst_310 = arith.constant 1.000000e+00 : f32
    %843 = vector.broadcast %cst_310 : f32 to vector<8x32xf32>
    %844 = arith.addf %843, %842 : vector<8x32xf32>
    %845 = arith.divf %843, %844 : vector<8x32xf32>
    %846 = arith.addf %827, %836 : vector<8x32xf32>
    %847 = arith.negf %846 : vector<8x32xf32>
    %848 = math.exp %847 : vector<8x32xf32>
    %cst_311 = arith.constant 1.000000e+00 : f32
    %849 = vector.broadcast %cst_311 : f32 to vector<8x32xf32>
    %850 = arith.addf %849, %848 : vector<8x32xf32>
    %851 = arith.divf %849, %850 : vector<8x32xf32>
    %852 = arith.mulf %845, %839 : vector<8x32xf32>
    %853 = arith.addf %830, %852 : vector<8x32xf32>
    %854 = math.tanh %853 : vector<8x32xf32>
    %cst_312 = arith.constant 1.000000e+00 : f32
    %855 = vector.broadcast %cst_312 : f32 to vector<8x32xf32>
    %856 = arith.subf %855, %851 : vector<8x32xf32>
    %857 = arith.mulf %856, %854 : vector<8x32xf32>
    %858 = arith.mulf %851, %792 : vector<8x32xf32>
    %859 = arith.addf %857, %858 : vector<8x32xf32>
    %cst_313 = arith.constant dense<0.000000e+00> : vector<8x128xf32>
    %860 = tpu.matmul %859, %478, %cst_313 {dimension_numbers = #tpu.dot_dimension_numbers<[1], [0], [0], [1], [0, 0, 1, 1], [], []>} : vector<8x32xf32>, vector<32x128xf32>, vector<8x128xf32> -> vector<8x128xf32>
    %861 = vector.broadcast %479 : vector<1x128xf32> to vector<8x128xf32>
    %862 = arith.addf %860, %861 : vector<8x128xf32>
    %863 = arith.index_cast %c5_i32_303 : i32 to index
    %c0_314 = arith.constant 0 : index
    %c0_315 = arith.constant 0 : index
    %864 = vector.load %arg15[%863, %c0_314, %c0_315] : memref<8x8x128xf32, #tpu.memory_space<vmem>>, vector<1x8x128xf32>
    %865 = vector.shape_cast %864 : vector<1x8x128xf32> to vector<8x128xf32>
    %866 = vector.shape_cast %862 : vector<8x128xf32> to vector<1x8x128xf32>
    tpu.vector_store %arg15[%863, %c0_314, %c0_315], %866 {strides = array<i32>} : memref<8x8x128xf32, #tpu.memory_space<vmem>>, vector<1x8x128xf32>,
    %867 = arith.select %2, %862, %3 : vector<8x128xi1>, vector<8x128xf32>
    %cst_316 = arith.constant dense<0xFF800000> : vector<8xf32>
    %868 = vector.multi_reduction <maximumf>, %867, %cst_316 [1] : vector<8x128xf32> to vector<8xf32>
    %869 = vector.shape_cast %868 : vector<8xf32> to vector<8x1xf32>
    %870 = vector.broadcast %869 : vector<8x1xf32> to vector<8x128xf32>
    %871 = arith.cmpf oeq, %867, %870 : vector<8x128xf32>
    %c128_i32_317 = arith.constant 128 : i32
    %872 = vector.broadcast %c128_i32_317 : i32 to vector<8x128xi32>
    %873 = arith.select %871, %0, %872 : vector<8x128xi1>, vector<8x128xi32>
    %cst_318 = arith.constant dense<2147483647> : vector<8xi32>
    %874 = vector.multi_reduction <minsi>, %873, %cst_318 [1] : vector<8x128xi32> to vector<8xi32>
    %875 = vector.shape_cast %874 : vector<8xi32> to vector<8x1xi32>
    %876 = arith.index_cast %c5_i32_303 : i32 to index
    %877 = memref.load %arg0[%876] : memref<8xi32, #tpu.memory_space<smem>>
    %c0_i32_319 = arith.constant 0 : i32
    %878 = arith.cmpi sgt, %877, %c0_i32_319 : i32
    %c1_i32_320 = arith.constant 1 : i32
    %879 = arith.addi %c5_i32_303, %c1_i32_320 : i32
    %880 = arith.index_cast %879 : i32 to index
    %c0_321 = arith.constant 0 : index
    %c0_322 = arith.constant 0 : index
    %881 = vector.load %arg2[%880, %c0_321, %c0_322] : memref<9x8x1xi32, #tpu.memory_space<vmem>>, vector<1x8x1xi32>
    %882 = vector.shape_cast %881 : vector<1x8x1xi32> to vector<8x1xi32>
    %883 = arith.select %878, %882, %875 : vector<8x1xi32>
    %884 = vector.broadcast %883 : vector<8x1xi32> to vector<8x128xi32>
    %885 = arith.cmpi eq, %0, %884 : vector<8x128xi32>
    %886 = arith.extui %885 : vector<8x128xi1> to vector<8x128xi32>
    %887 = arith.sitofp %886 : vector<8x128xi32> to vector<8x128xf32>
    %cst_323 = arith.constant dense<0.000000e+00> : vector<8x16xf32>
    %888 = tpu.matmul %887, %453, %cst_323 {dimension_numbers = #tpu.dot_dimension_numbers<[1], [0], [0], [1], [0, 0, 1, 1], [], []>} : vector<8x128xf32>, vector<128x16xf32>, vector<8x16xf32> -> vector<8x16xf32>
    %c6_i32_324 = arith.constant 6 : i32
    %cst_325 = arith.constant dense<0.000000e+00> : vector<8x32xf32>
    %889 = tpu.matmul %888, %455, %cst_325 {dimension_numbers = #tpu.dot_dimension_numbers<[1], [0], [0], [1], [0, 0, 1, 1], [], []>} : vector<8x16xf32>, vector<16x32xf32>, vector<8x32xf32> -> vector<8x32xf32>
    %890 = vector.broadcast %467 : vector<1x32xf32> to vector<8x32xf32>
    %891 = arith.addf %889, %890 : vector<8x32xf32>
    %cst_326 = arith.constant dense<0.000000e+00> : vector<8x32xf32>
    %892 = tpu.matmul %888, %457, %cst_326 {dimension_numbers = #tpu.dot_dimension_numbers<[1], [0], [0], [1], [0, 0, 1, 1], [], []>} : vector<8x16xf32>, vector<16x32xf32>, vector<8x32xf32> -> vector<8x32xf32>
    %893 = vector.broadcast %469 : vector<1x32xf32> to vector<8x32xf32>
    %894 = arith.addf %892, %893 : vector<8x32xf32>
    %cst_327 = arith.constant dense<0.000000e+00> : vector<8x32xf32>
    %895 = tpu.matmul %888, %459, %cst_327 {dimension_numbers = #tpu.dot_dimension_numbers<[1], [0], [0], [1], [0, 0, 1, 1], [], []>} : vector<8x16xf32>, vector<16x32xf32>, vector<8x32xf32> -> vector<8x32xf32>
    %896 = vector.broadcast %471 : vector<1x32xf32> to vector<8x32xf32>
    %897 = arith.addf %895, %896 : vector<8x32xf32>
    %cst_328 = arith.constant dense<0.000000e+00> : vector<8x32xf32>
    %898 = tpu.matmul %859, %461, %cst_328 {dimension_numbers = #tpu.dot_dimension_numbers<[1], [0], [0], [1], [0, 0, 1, 1], [], []>} : vector<8x32xf32>, vector<32x32xf32>, vector<8x32xf32> -> vector<8x32xf32>
    %899 = vector.broadcast %473 : vector<1x32xf32> to vector<8x32xf32>
    %900 = arith.addf %898, %899 : vector<8x32xf32>
    %cst_329 = arith.constant dense<0.000000e+00> : vector<8x32xf32>
    %901 = tpu.matmul %859, %463, %cst_329 {dimension_numbers = #tpu.dot_dimension_numbers<[1], [0], [0], [1], [0, 0, 1, 1], [], []>} : vector<8x32xf32>, vector<32x32xf32>, vector<8x32xf32> -> vector<8x32xf32>
    %902 = vector.broadcast %475 : vector<1x32xf32> to vector<8x32xf32>
    %903 = arith.addf %901, %902 : vector<8x32xf32>
    %cst_330 = arith.constant dense<0.000000e+00> : vector<8x32xf32>
    %904 = tpu.matmul %859, %465, %cst_330 {dimension_numbers = #tpu.dot_dimension_numbers<[1], [0], [0], [1], [0, 0, 1, 1], [], []>} : vector<8x32xf32>, vector<32x32xf32>, vector<8x32xf32> -> vector<8x32xf32>
    %905 = vector.broadcast %477 : vector<1x32xf32> to vector<8x32xf32>
    %906 = arith.addf %904, %905 : vector<8x32xf32>
    %907 = arith.addf %891, %900 : vector<8x32xf32>
    %908 = arith.negf %907 : vector<8x32xf32>
    %909 = math.exp %908 : vector<8x32xf32>
    %cst_331 = arith.constant 1.000000e+00 : f32
    %910 = vector.broadcast %cst_331 : f32 to vector<8x32xf32>
    %911 = arith.addf %910, %909 : vector<8x32xf32>
    %912 = arith.divf %910, %911 : vector<8x32xf32>
    %913 = arith.addf %894, %903 : vector<8x32xf32>
    %914 = arith.negf %913 : vector<8x32xf32>
    %915 = math.exp %914 : vector<8x32xf32>
    %cst_332 = arith.constant 1.000000e+00 : f32
    %916 = vector.broadcast %cst_332 : f32 to vector<8x32xf32>
    %917 = arith.addf %916, %915 : vector<8x32xf32>
    %918 = arith.divf %916, %917 : vector<8x32xf32>
    %919 = arith.mulf %912, %906 : vector<8x32xf32>
    %920 = arith.addf %897, %919 : vector<8x32xf32>
    %921 = math.tanh %920 : vector<8x32xf32>
    %cst_333 = arith.constant 1.000000e+00 : f32
    %922 = vector.broadcast %cst_333 : f32 to vector<8x32xf32>
    %923 = arith.subf %922, %918 : vector<8x32xf32>
    %924 = arith.mulf %923, %921 : vector<8x32xf32>
    %925 = arith.mulf %918, %859 : vector<8x32xf32>
    %926 = arith.addf %924, %925 : vector<8x32xf32>
    %cst_334 = arith.constant dense<0.000000e+00> : vector<8x128xf32>
    %927 = tpu.matmul %926, %478, %cst_334 {dimension_numbers = #tpu.dot_dimension_numbers<[1], [0], [0], [1], [0, 0, 1, 1], [], []>} : vector<8x32xf32>, vector<32x128xf32>, vector<8x128xf32> -> vector<8x128xf32>
    %928 = vector.broadcast %479 : vector<1x128xf32> to vector<8x128xf32>
    %929 = arith.addf %927, %928 : vector<8x128xf32>
    %930 = arith.index_cast %c6_i32_324 : i32 to index
    %c0_335 = arith.constant 0 : index
    %c0_336 = arith.constant 0 : index
    %931 = vector.load %arg15[%930, %c0_335, %c0_336] : memref<8x8x128xf32, #tpu.memory_space<vmem>>, vector<1x8x128xf32>
    %932 = vector.shape_cast %931 : vector<1x8x128xf32> to vector<8x128xf32>
    %933 = vector.shape_cast %929 : vector<8x128xf32> to vector<1x8x128xf32>
    tpu.vector_store %arg15[%930, %c0_335, %c0_336], %933 {strides = array<i32>} : memref<8x8x128xf32, #tpu.memory_space<vmem>>, vector<1x8x128xf32>,
    %934 = arith.select %2, %929, %3 : vector<8x128xi1>, vector<8x128xf32>
    %cst_337 = arith.constant dense<0xFF800000> : vector<8xf32>
    %935 = vector.multi_reduction <maximumf>, %934, %cst_337 [1] : vector<8x128xf32> to vector<8xf32>
    %936 = vector.shape_cast %935 : vector<8xf32> to vector<8x1xf32>
    %937 = vector.broadcast %936 : vector<8x1xf32> to vector<8x128xf32>
    %938 = arith.cmpf oeq, %934, %937 : vector<8x128xf32>
    %c128_i32_338 = arith.constant 128 : i32
    %939 = vector.broadcast %c128_i32_338 : i32 to vector<8x128xi32>
    %940 = arith.select %938, %0, %939 : vector<8x128xi1>, vector<8x128xi32>
    %cst_339 = arith.constant dense<2147483647> : vector<8xi32>
    %941 = vector.multi_reduction <minsi>, %940, %cst_339 [1] : vector<8x128xi32> to vector<8xi32>
    %942 = vector.shape_cast %941 : vector<8xi32> to vector<8x1xi32>
    %943 = arith.index_cast %c6_i32_324 : i32 to index
    %944 = memref.load %arg0[%943] : memref<8xi32, #tpu.memory_space<smem>>
    %c0_i32_340 = arith.constant 0 : i32
    %945 = arith.cmpi sgt, %944, %c0_i32_340 : i32
    %c1_i32_341 = arith.constant 1 : i32
    %946 = arith.addi %c6_i32_324, %c1_i32_341 : i32
    %947 = arith.index_cast %946 : i32 to index
    %c0_342 = arith.constant 0 : index
    %c0_343 = arith.constant 0 : index
    %948 = vector.load %arg2[%947, %c0_342, %c0_343] : memref<9x8x1xi32, #tpu.memory_space<vmem>>, vector<1x8x1xi32>
    %949 = vector.shape_cast %948 : vector<1x8x1xi32> to vector<8x1xi32>
    %950 = arith.select %945, %949, %942 : vector<8x1xi32>
    %951 = vector.broadcast %950 : vector<8x1xi32> to vector<8x128xi32>
    %952 = arith.cmpi eq, %0, %951 : vector<8x128xi32>
    %953 = arith.extui %952 : vector<8x128xi1> to vector<8x128xi32>
    %954 = arith.sitofp %953 : vector<8x128xi32> to vector<8x128xf32>
    %cst_344 = arith.constant dense<0.000000e+00> : vector<8x16xf32>
    %955 = tpu.matmul %954, %453, %cst_344 {dimension_numbers = #tpu.dot_dimension_numbers<[1], [0], [0], [1], [0, 0, 1, 1], [], []>} : vector<8x128xf32>, vector<128x16xf32>, vector<8x16xf32> -> vector<8x16xf32>
    %c7_i32_345 = arith.constant 7 : i32
    %cst_346 = arith.constant dense<0.000000e+00> : vector<8x32xf32>
    %956 = tpu.matmul %955, %455, %cst_346 {dimension_numbers = #tpu.dot_dimension_numbers<[1], [0], [0], [1], [0, 0, 1, 1], [], []>} : vector<8x16xf32>, vector<16x32xf32>, vector<8x32xf32> -> vector<8x32xf32>
    %957 = vector.broadcast %467 : vector<1x32xf32> to vector<8x32xf32>
    %958 = arith.addf %956, %957 : vector<8x32xf32>
    %cst_347 = arith.constant dense<0.000000e+00> : vector<8x32xf32>
    %959 = tpu.matmul %955, %457, %cst_347 {dimension_numbers = #tpu.dot_dimension_numbers<[1], [0], [0], [1], [0, 0, 1, 1], [], []>} : vector<8x16xf32>, vector<16x32xf32>, vector<8x32xf32> -> vector<8x32xf32>
    %960 = vector.broadcast %469 : vector<1x32xf32> to vector<8x32xf32>
    %961 = arith.addf %959, %960 : vector<8x32xf32>
    %cst_348 = arith.constant dense<0.000000e+00> : vector<8x32xf32>
    %962 = tpu.matmul %955, %459, %cst_348 {dimension_numbers = #tpu.dot_dimension_numbers<[1], [0], [0], [1], [0, 0, 1, 1], [], []>} : vector<8x16xf32>, vector<16x32xf32>, vector<8x32xf32> -> vector<8x32xf32>
    %963 = vector.broadcast %471 : vector<1x32xf32> to vector<8x32xf32>
    %964 = arith.addf %962, %963 : vector<8x32xf32>
    %cst_349 = arith.constant dense<0.000000e+00> : vector<8x32xf32>
    %965 = tpu.matmul %926, %461, %cst_349 {dimension_numbers = #tpu.dot_dimension_numbers<[1], [0], [0], [1], [0, 0, 1, 1], [], []>} : vector<8x32xf32>, vector<32x32xf32>, vector<8x32xf32> -> vector<8x32xf32>
    %966 = vector.broadcast %473 : vector<1x32xf32> to vector<8x32xf32>
    %967 = arith.addf %965, %966 : vector<8x32xf32>
    %cst_350 = arith.constant dense<0.000000e+00> : vector<8x32xf32>
    %968 = tpu.matmul %926, %463, %cst_350 {dimension_numbers = #tpu.dot_dimension_numbers<[1], [0], [0], [1], [0, 0, 1, 1], [], []>} : vector<8x32xf32>, vector<32x32xf32>, vector<8x32xf32> -> vector<8x32xf32>
    %969 = vector.broadcast %475 : vector<1x32xf32> to vector<8x32xf32>
    %970 = arith.addf %968, %969 : vector<8x32xf32>
    %cst_351 = arith.constant dense<0.000000e+00> : vector<8x32xf32>
    %971 = tpu.matmul %926, %465, %cst_351 {dimension_numbers = #tpu.dot_dimension_numbers<[1], [0], [0], [1], [0, 0, 1, 1], [], []>} : vector<8x32xf32>, vector<32x32xf32>, vector<8x32xf32> -> vector<8x32xf32>
    %972 = vector.broadcast %477 : vector<1x32xf32> to vector<8x32xf32>
    %973 = arith.addf %971, %972 : vector<8x32xf32>
    %974 = arith.addf %958, %967 : vector<8x32xf32>
    %975 = arith.negf %974 : vector<8x32xf32>
    %976 = math.exp %975 : vector<8x32xf32>
    %cst_352 = arith.constant 1.000000e+00 : f32
    %977 = vector.broadcast %cst_352 : f32 to vector<8x32xf32>
    %978 = arith.addf %977, %976 : vector<8x32xf32>
    %979 = arith.divf %977, %978 : vector<8x32xf32>
    %980 = arith.addf %961, %970 : vector<8x32xf32>
    %981 = arith.negf %980 : vector<8x32xf32>
    %982 = math.exp %981 : vector<8x32xf32>
    %cst_353 = arith.constant 1.000000e+00 : f32
    %983 = vector.broadcast %cst_353 : f32 to vector<8x32xf32>
    %984 = arith.addf %983, %982 : vector<8x32xf32>
    %985 = arith.divf %983, %984 : vector<8x32xf32>
    %986 = arith.mulf %979, %973 : vector<8x32xf32>
    %987 = arith.addf %964, %986 : vector<8x32xf32>
    %988 = math.tanh %987 : vector<8x32xf32>
    %cst_354 = arith.constant 1.000000e+00 : f32
    %989 = vector.broadcast %cst_354 : f32 to vector<8x32xf32>
    %990 = arith.subf %989, %985 : vector<8x32xf32>
    %991 = arith.mulf %990, %988 : vector<8x32xf32>
    %992 = arith.mulf %985, %926 : vector<8x32xf32>
    %993 = arith.addf %991, %992 : vector<8x32xf32>
    %cst_355 = arith.constant dense<0.000000e+00> : vector<8x128xf32>
    %994 = tpu.matmul %993, %478, %cst_355 {dimension_numbers = #tpu.dot_dimension_numbers<[1], [0], [0], [1], [0, 0, 1, 1], [], []>} : vector<8x32xf32>, vector<32x128xf32>, vector<8x128xf32> -> vector<8x128xf32>
    %995 = vector.broadcast %479 : vector<1x128xf32> to vector<8x128xf32>
    %996 = arith.addf %994, %995 : vector<8x128xf32>
    %997 = arith.index_cast %c7_i32_345 : i32 to index
    %c0_356 = arith.constant 0 : index
    %c0_357 = arith.constant 0 : index
    %998 = vector.load %arg15[%997, %c0_356, %c0_357] : memref<8x8x128xf32, #tpu.memory_space<vmem>>, vector<1x8x128xf32>
    %999 = vector.shape_cast %998 : vector<1x8x128xf32> to vector<8x128xf32>
    %1000 = vector.shape_cast %996 : vector<8x128xf32> to vector<1x8x128xf32>
    tpu.vector_store %arg15[%997, %c0_356, %c0_357], %1000 {strides = array<i32>} : memref<8x8x128xf32, #tpu.memory_space<vmem>>, vector<1x8x128xf32>,
    %1001 = arith.select %2, %996, %3 : vector<8x128xi1>, vector<8x128xf32>
    %cst_358 = arith.constant dense<0xFF800000> : vector<8xf32>
    %1002 = vector.multi_reduction <maximumf>, %1001, %cst_358 [1] : vector<8x128xf32> to vector<8xf32>
    %1003 = vector.shape_cast %1002 : vector<8xf32> to vector<8x1xf32>
    %1004 = vector.broadcast %1003 : vector<8x1xf32> to vector<8x128xf32>
    %1005 = arith.cmpf oeq, %1001, %1004 : vector<8x128xf32>
    %c128_i32_359 = arith.constant 128 : i32
    %1006 = vector.broadcast %c128_i32_359 : i32 to vector<8x128xi32>
    %1007 = arith.select %1005, %0, %1006 : vector<8x128xi1>, vector<8x128xi32>
    %cst_360 = arith.constant dense<2147483647> : vector<8xi32>
    %1008 = vector.multi_reduction <minsi>, %1007, %cst_360 [1] : vector<8x128xi32> to vector<8xi32>
    %1009 = vector.shape_cast %1008 : vector<8xi32> to vector<8x1xi32>
    %1010 = arith.index_cast %c7_i32_345 : i32 to index
    %1011 = memref.load %arg0[%1010] : memref<8xi32, #tpu.memory_space<smem>>
    %c0_i32_361 = arith.constant 0 : i32
    %1012 = arith.cmpi sgt, %1011, %c0_i32_361 : i32
    %c1_i32_362 = arith.constant 1 : i32
    %1013 = arith.addi %c7_i32_345, %c1_i32_362 : i32
    %1014 = arith.index_cast %1013 : i32 to index
    %c0_363 = arith.constant 0 : index
    %c0_364 = arith.constant 0 : index
    %1015 = vector.load %arg2[%1014, %c0_363, %c0_364] : memref<9x8x1xi32, #tpu.memory_space<vmem>>, vector<1x8x1xi32>
    %1016 = vector.shape_cast %1015 : vector<1x8x1xi32> to vector<8x1xi32>
    %1017 = arith.select %1012, %1016, %1009 : vector<8x1xi32>
    %1018 = vector.broadcast %1017 : vector<8x1xi32> to vector<8x128xi32>
    %1019 = arith.cmpi eq, %0, %1018 : vector<8x128xi32>
    %1020 = arith.extui %1019 : vector<8x128xi1> to vector<8x128xi32>
    %1021 = arith.sitofp %1020 : vector<8x128xi32> to vector<8x128xf32>
    %cst_365 = arith.constant dense<0.000000e+00> : vector<8x16xf32>
    %1022 = tpu.matmul %1021, %453, %cst_365 {dimension_numbers = #tpu.dot_dimension_numbers<[1], [0], [0], [1], [0, 0, 1, 1], [], []>} : vector<8x128xf32>, vector<128x16xf32>, vector<8x16xf32> -> vector<8x16xf32>
    %c8_i32_366 = arith.constant 8 : i32
    return
  }
}

</mosaic_0001>

<bundles_post_ra>
// kernel: seq2seq_forward.1
= control target key start
LH: loop header
LB: loop body
LE: loop exit
PB: predicated region body
PF: predicated region fallthrough
CT: control target
= control target key end

     0   :  { %20 = vsyncpa [#allocation3], 0  ;;  %s4505_s21 = smov [#allocation2]   ;;  %s6508_s0 = inlined_call_operand.vmem [shape: s32[8], index: 0, kind: input, shape index: {}]   ;;  %s6509_s1 = inlined_call_operand.vmem [shape: s32[9,8,1], index: 1, kind: input, shape index: {}]   ;;  %s6510_s2 = inlined_call_operand.vmem [shape: s32[9,8,1], index: 2, kind: input, shape index: {}]   ;;  %s6511_s3 = inlined_call_operand.vmem [shape: f32[128,16], index: 3, kind: input, shape index: {}]   ;;  %s6512_s4 = inlined_call_operand.vmem [shape: f32[3,16,32], index: 4, kind: input, shape index: {}]   ;;  %s6513_s5 = inlined_call_operand.vmem [shape: f32[3,32,32], index: 5, kind: input, shape index: {}]   ;;  %s6514_s6 = inlined_call_operand.vmem [shape: f32[3,1,32], index: 6, kind: input, shape index: {}]   ;;  %s6515_s7 = inlined_call_operand.vmem [shape: f32[3,1,32], index: 7, kind: input, shape index: {}]   ;;  %s6516_s8 = inlined_call_operand.vmem [shape: f32[128,16], index: 8, kind: input, shape index: {}]   ;;  %s6517_s9 = inlined_call_operand.vmem [shape: f32[3,16,32], index: 9, kind: input, shape index: {}]   ;;  %s6518_s10 = inlined_call_operand.vmem [shape: f32[3,32,32], index: 10, kind: input, shape index: {}]   ;;  %s6519_s11 = inlined_call_operand.vmem [shape: f32[3,1,32], index: 11, kind: input, shape index: {}]   ;;  %s6520_s12 = inlined_call_operand.vmem [shape: f32[3,1,32], index: 12, kind: input, shape index: {}]   ;;  %s6521_s13 = inlined_call_operand.vmem [shape: f32[32,128], index: 13, kind: input, shape index: {}]   ;;  %s6522_s14 = inlined_call_operand.vmem [shape: f32[1,128], index: 14, kind: input, shape index: {}]   ;;  %s6523_s15 = inlined_call_operand.vmem [shape: f32[8,8,128], index: 15, kind: output, shape index: {}]  }
   0x1   :  { %s26_s20 = sshll.u32 %s6508_s0, 4  ;;  %s27_s20 = int_to_ptr.vmem [resolvable:$true] %s26_s20 }
   0x2   :  { %29 = dma.vmem_to_smem %s27_s20, 16, %s4505_s21, [#allocation3]  }
   0x3   :  { %4503 = dma.done.wait [#allocation3], 16  }
   0x4   :  { %4504 = vsyncadd [#allocation3], 4294967280 }
   0x5   :  { %62 = sfence }
   0x6   :  { %v3997_v0 = vld [vmem:[%s6509_s1 + $0x40] sm:$0xff]  ;;  %v4506_v1 = vmov 0   ;;  %v4598_v2 = vld [vmem:[%s6511_s3 + $0x78] sm:$0xff]  ;;  %v4603_v3 = vld [vmem:[%s6511_s3 + $0x70] sm:$0xff]  ;;  %v63_v21 = vlaneseq  ;;  %v6524_v31 = vmov 1.0   ;;  %vm145_vm1 = vcmask 130048  }
   0x7   :  { %4220 = vset.pattern.permute.xlu0 %v4506_v1  ;;  %4221 = vset.pattern.permute.xlu1 %v4506_v1  ;;  %v4609_v4 = vld [vmem:[%s6511_s3 + $0x68] sm:$0xff]  ;;  %v4005_v5 = vld [vmem:[%s6509_s1 + $0x38] sm:$0xff]  ;;  %v4618_v6 = vld [vmem:[%s6511_s3 + $0x60] sm:$0xff]  ;;  %v4508_v46 = vmov 0.0   ;;  %vm218_vm12 = vcmask 261120   ;;  %s2259_s17 = sld [smem:[#allocation2]] }
   0x8   :  { %117 = vperm.xlu0 %4220, %v3997_v0   ;;  %122 = vmatpush.msra.mxu0 %v4598_v2  ;;  %v4624_v7 = vld [vmem:[%s6511_s3 + $0x58] sm:$0xff]  ;;  %v4629_v8 = vld [vmem:[%s6511_s3 + $0x50] sm:$0xff]  ;;  %v4636_v9 = vld [vmem:[%s6511_s3 + $0x48] sm:$0xff]  ;;  %v4748_v28 = vand.u32 127, %v63_v21  ;;  %s4146_s26 = sld [smem:[#allocation2 + $0x2]] }
   0x9   :  { %4222 = vset.pattern.permute.xlu2 %v4506_v1  ;;  %v4642_v10 = vld [vmem:[%s6511_s3 + $0x40] sm:$0xff]  ;;  %v4060_v11 = vld [vmem:[%s6509_s1 + $0x10] sm:$0xff]  ;;  %v4651_v12 = vld [vmem:[%s6511_s3 + $0x38] sm:$0xff]  ;;  %s4202_s21 = sld [smem:[#allocation2 + $0x6]] }
   0xa   :  { %123 = vmatpush.msra.mxu0 %v4603_v3  ;;  %v4657_v13 = vld [vmem:[%s6511_s3 + $0x30] sm:$0xff]  ;;  %v4663_v14 = vld [vmem:[%s6511_s3 + $0x28] sm:$0xff]  ;;  %v4669_v15 = vld [vmem:[%s6511_s3 + $0x20] sm:$0xff] }
   0xb   :  { %v1995_v16 = vld [vmem:[%s6510_s2] sm:$0xff]  ;;  %v4678_v17 = vld [vmem:[%s6511_s3 + $0x18] sm:$0xff]  ;;  %v4684_v18 = vld [vmem:[%s6511_s3 + $0x10] sm:$0xff] }
   0xc   :  { %124 = vmatpush.msra.mxu0 %v4609_v4  ;;  %v4690_v19 = vld [vmem:[%s6511_s3 + $0x8] sm:$0xff]  ;;  %v4697_v20 = vld [vmem:[%s6511_s3] sm:$0xff]  ;;  %v4726_v24 = vld [vmem:[%s6513_s5 + $0x18] sm:$0xff] }
   0xd   :  { %v4715_v22 = vld [vmem:[%s6512_s4 + $0x8] sm:$0xff]  ;;  %v4720_v23 = vld [vmem:[%s6512_s4] sm:$0xff]  ;;  %v4731_v25 = vld [vmem:[%s6512_s4 + $0x18] sm:$0xff]  ;;  %p2260_p0 = scmp.gt.s32.totalorder %s2259_s17, 0 }
   0xe   :  { %125 = vmatpush.msra.mxu0 %v4618_v6  ;;  %163 = vmatpush.msra.mxu1 %v4715_v22  ;;  %v4736_v26 = vld [vmem:[%s6512_s4 + $0x28] sm:$0xff]  ;;  %v4745_v27 = vld [vmem:[%s6513_s5 + $0x10] sm:$0xff]  ;;  %v4773_v33 = vld [vmem:[%s6512_s4 + $0x20] sm:$0xff]  ;;  %p2756_p2 = scmp.gt.s32.totalorder %s4146_s26, 0 }
   0xf   :  { %186 = vmatpush.msra.mxu2 %v4731_v25  ;;  %209 = vmatpush.msra.mxu3 %v4736_v26  ;;  %v4754_v29 = vld [vmem:[%s6513_s5 + $0x8] sm:$0xff]  ;;  %v4768_v32 = vld [vmem:[%s6512_s4 + $0x10] sm:$0xff]  ;;  %v4778_v34 = vld [vmem:[%s6513_s5] sm:$0xff]  ;;  %s2263_s18 = scalar_select %p2260_p0, 1, 0 }
  0x10   :  { %338 = vperm.xlu0 %4220, %v4005_v5   ;;  %126 = vmatpush.msra.mxu0 %v4624_v7  ;;  %v4787_v35 = vld [vmem:[%s6513_s5 + $0x38] sm:$0xff]  ;;  %v4793_v36 = vld [vmem:[%s6513_s5 + $0x30] sm:$0xff]  ;;  %v4799_v37 = vld [vmem:[%s6513_s5 + $0x28] sm:$0xff]  ;;  %s2759_s27 = scalar_select %p2756_p2, 1, 0 }
  0x11   :  { %164 = vmatpush.msra.mxu1 %v4720_v23  ;;  %187 = vmatpush.msra.mxu2 %v4768_v32  ;;  %v4805_v38 = vld [vmem:[%s6513_s5 + $0x20] sm:$0xff]  ;;  %v4811_v39 = vld [vmem:[%s6513_s5 + $0x58] sm:$0xff]  ;;  %v4817_v40 = vld [vmem:[%s6513_s5 + $0x50] sm:$0xff]  ;;  %p3748_p6 = scmp.gt.s32.totalorder %s4202_s21, 0 }
  0x12   :  { %127 = vmatpush.msra.mxu0 %v4629_v8  ;;  %210 = vmatpush.msra.mxu3 %v4773_v33  ;;  %v4823_v41 = vld [vmem:[%s6513_s5 + $0x48] sm:$0xff]  ;;  %v4829_v42 = vld [vmem:[%s6513_s5 + $0x40] sm:$0xff]  ;;  %v4016_v44 = vld [vmem:[%s6509_s1 + $0x30] sm:$0xff] }
  0x13   :  { %234 = vmatpush.msrb.mxu1 %v4726_v24  ;;  %257 = vmatpush.msrb.mxu2 %v4787_v35  ;;  %v4027_v45 = vld [vmem:[%s6509_s1 + $0x28] sm:$0xff]  ;;  %v4881_v50 = vld [vmem:[%s6514_s6] ss:$0 sm:$0xff]  ;;  %v4893_v56 = vld [vmem:[%s6514_s6 + $0x1] ss:$0 sm:$0xff] }
  0x14   :  { %128 = vmatpush.msra.mxu0 %v4636_v9  ;;  %280 = vmatpush.msrb.mxu3 %v4811_v39  ;;  %v4071_v47 = vld [vmem:[%s6509_s1 + $0x8] sm:$0xff]  ;;  %v4886_v51 = vld [vmem:[%s6515_s7] ss:$0 sm:$0xff]  ;;  %v4898_v58 = vld [vmem:[%s6515_s7 + $0x1] ss:$0 sm:$0xff] }
  0x15   :  { %235 = vmatpush.msrb.mxu1 %v4745_v27  ;;  %258 = vmatpush.msrb.mxu2 %v4793_v36 }
  0x16   :  { %129 = vmatpush.msra.mxu0 %v4642_v10  ;;  %281 = vmatpush.msrb.mxu3 %v4817_v40 }
  0x17   :  { %236 = vmatpush.msrb.mxu1 %v4754_v29  ;;  %259 = vmatpush.msrb.mxu2 %v4799_v37 }
  0x18   :  { %1343 = vperm.xlu0 %4220, %v4060_v11   ;;  %130 = vmatpush.msra.mxu0 %v4651_v12 }
  0x19   :  { %237 = vmatpush.msrb.mxu1 %v4778_v34  ;;  %260 = vmatpush.msrb.mxu2 %v4805_v38 }
  0x1a   :  { %131 = vmatpush.msra.mxu0 %v4657_v13  ;;  %282 = vmatpush.msrb.mxu3 %v4823_v41 }
  0x1b   :  { %539 = vperm.xlu1 %4221, %v4016_v44  }
  0x1c   :  { %132 = vmatpush.msra.mxu0 %v4663_v14  ;;  %283 = vmatpush.msrb.mxu3 %v4829_v42 }
  0x1e   :  { %133 = vmatpush.msra.mxu0 %v4669_v15 }
  0x20   :  { %1997 = vperm.xlu0 %4220, %v1995_v16   ;;  %134 = vmatpush.msra.mxu0 %v4678_v17 }
  0x22   :  { %135 = vmatpush.msra.mxu0 %v4684_v18 }
  0x23   :  { %740 = vperm.xlu1 %4221, %v4027_v45  }
  0x24   :  { %136 = vmatpush.msra.mxu0 %v4690_v19 }
  0x26   :  { %137 = vmatpush.msra.mxu0 %v4697_v20 }
  0x28   :  { %544 = vmatpush.msrb.mxu0 %v4598_v2 }
  0x2a   :  { %545 = vmatpush.msrb.mxu0 %v4603_v3 }
  0x2b   :  { %1544 = vperm.xlu1 %4221, %v4071_v47  }
  0x2c   :  { %546 = vmatpush.msrb.mxu0 %v4609_v4 }
  0x2e   :  { %547 = vmatpush.msrb.mxu0 %v4618_v6 }
  0x30   :  { %548 = vmatpush.msrb.mxu0 %v4624_v7 }
  0x32   :  { %549 = vmatpush.msrb.mxu0 %v4629_v8 }
  0x34   :  { %550 = vmatpush.msrb.mxu0 %v4636_v9 }
  0x36   :  { %551 = vmatpush.msrb.mxu0 %v4642_v10 }
  0x38   :  { %552 = vmatpush.msrb.mxu0 %v4651_v12 }
  0x3a   :  { %553 = vmatpush.msrb.mxu0 %v4657_v13 }
  0x3c   :  { %554 = vmatpush.msrb.mxu0 %v4663_v14 }
  0x3e   :  { %555 = vmatpush.msrb.mxu0 %v4669_v15 }
  0x40   :  { %556 = vmatpush.msrb.mxu0 %v4678_v17 }
  0x42   :  { %557 = vmatpush.msrb.mxu0 %v4684_v18 }
  0x44   :  { %558 = vmatpush.msrb.mxu0 %v4690_v19 }
  0x46   :  { %559 = vmatpush.msrb.mxu0 %v4697_v20 }
  0x7a   :  { %v118_v30 = vpop.permute.xlu0 %117 }
  0x7b   :  { %vm119_vm0 = vcmp.eq.s32.totalorder %v4748_v28, %v118_v30 }
  0x7c   :  { %3999 = vmatmul.msk.f32.vlgmr.msra.gmra.mxu0 %vm119_vm0, %v6524_v31 }
  0x7d   :  { %843 = vmatpush.msra.mxu0 %v4726_v24 }
  0x7f   :  { %844 = vmatpush.msra.mxu0 %v4745_v27 }
  0x81   :  { %845 = vmatpush.msra.mxu0 %v4754_v29 }
  0x82   :  { %v339_v48 = vpop.permute.xlu0 %338 }
  0x83   :  { %846 = vmatpush.msra.mxu0 %v4778_v34  ;;  %vm340_vm2 = vcmp.eq.s32.totalorder %v4748_v28, %v339_v48 }
  0x8d   :  { %v540_v45 = vpop.permute.xlu1 %539 }
  0x8e   :  { %vm541_vm3 = vcmp.eq.s32.totalorder %v4748_v28, %v540_v45 }
  0x8f   :  { %4018 = vmatmul.msk.f32.vlgmr.msrb.gmra.mxu0 %vm541_vm3, %v6524_v31 }
  0x90   :  { %946 = vmatpush.msrb.mxu0 %v4598_v2 }
  0x92   :  { %947 = vmatpush.msrb.mxu0 %v4603_v3 }
  0x94   :  { %948 = vmatpush.msrb.mxu0 %v4609_v4 }
  0x96   :  { %949 = vmatpush.msrb.mxu0 %v4618_v6 }
  0x98   :  { %950 = vmatpush.msrb.mxu0 %v4624_v7 }
  0x9a   :  { %951 = vmatpush.msrb.mxu0 %v4629_v8 }
  0x9c   :  { %952 = vmatpush.msrb.mxu0 %v4636_v9 }
  0x9e   :  { %953 = vmatpush.msrb.mxu0 %v4642_v10 }
  0xa0   :  { %954 = vmatpush.msrb.mxu0 %v4651_v12 }
  0xa2   :  { %955 = vmatpush.msrb.mxu0 %v4657_v13 }
  0xa4   :  { %956 = vmatpush.msrb.mxu0 %v4663_v14 }
  0xa6   :  { %957 = vmatpush.msrb.mxu0 %v4669_v15 }
  0xa8   :  { %958 = vmatpush.msrb.mxu0 %v4678_v17 }
  0xaa   :  { %959 = vmatpush.msrb.mxu0 %v4684_v18 }
  0xac   :  { %960 = vmatpush.msrb.mxu0 %v4690_v19 }
  0xae   :  { %961 = vmatpush.msrb.mxu0 %v4697_v20 }
  0xf9   :  { %v139_v43 = vpop.f32.mrf.mxu0 }
  0xfa   :  { %4000 = vmatmul.msk.f32.vlgmr.msra.gmra.mxu1 %vm145_vm1, %v139_v43  ;;  %4001 = vmatmul.msk.f32.vlgmr.msra.gmra.mxu2 %vm145_vm1, %v139_v43 }
  0xfb   :  { %4002 = vmatmul.msk.f32.vlgmr.msra.gmra.mxu3 %vm145_vm1, %v139_v43  ;;  %343 = vmatpush.msra.mxu1 %v4598_v2 }
  0xfc   :  { %380 = vmatpush.msra.mxu2 %v4715_v22  ;;  %400 = vmatpush.msra.mxu3 %v4731_v25 }
  0xfd   :  { %344 = vmatpush.msra.mxu1 %v4603_v3 }
  0xfe   :  { %381 = vmatpush.msra.mxu2 %v4720_v23  ;;  %401 = vmatpush.msra.mxu3 %v4768_v32 }
  0xff   :  { %345 = vmatpush.msra.mxu1 %v4609_v4 }
 0x101   :  { %346 = vmatpush.msra.mxu1 %v4618_v6 }
 0x102   :  { %238 = vmatmul.f32.vlgmr.msrb.gmra.mxu1 %v4508_v46  ;;  %261 = vmatmul.f32.vlgmr.msrb.gmra.mxu2 %v4508_v46 }
 0x103   :  { %347 = vmatpush.msra.mxu1 %v4624_v7  ;;  %284 = vmatmul.f32.vlgmr.msrb.gmra.mxu3 %v4508_v46  ;;  %v4907_v46 = vld [vmem:[%s6515_s7 + $0x2] ss:$0 sm:$0xff] }
 0x104   :  { %420 = vmatpush.msrb.mxu2 %v4736_v26  ;;  %441 = vmatpush.msrb.mxu3 %v4726_v24 }
 0x105   :  { %348 = vmatpush.msra.mxu1 %v4629_v8 }
 0x106   :  { %421 = vmatpush.msrb.mxu2 %v4773_v33  ;;  %442 = vmatpush.msrb.mxu3 %v4745_v27 }
 0x107   :  { %349 = vmatpush.msra.mxu1 %v4636_v9 }
 0x108   :  { %443 = vmatpush.msrb.mxu3 %v4754_v29 }
 0x109   :  { %350 = vmatpush.msra.mxu1 %v4642_v10 }
 0x10a   :  { %444 = vmatpush.msrb.mxu3 %v4778_v34 }
 0x10b   :  { %351 = vmatpush.msra.mxu1 %v4651_v12 }
 0x10d   :  { %352 = vmatpush.msra.mxu1 %v4657_v13 }
 0x10f   :  { %353 = vmatpush.msra.mxu1 %v4663_v14 }
 0x111   :  { %354 = vmatpush.msra.mxu1 %v4669_v15 }
 0x113   :  { %355 = vmatpush.msra.mxu1 %v4678_v17 }
 0x115   :  { %356 = vmatpush.msra.mxu1 %v4684_v18 }
 0x117   :  { %357 = vmatpush.msra.mxu1 %v4690_v19 }
 0x119   :  { %358 = vmatpush.msra.mxu1 %v4697_v20 }
 0x11a   :  { %4007 = vmatmul.msk.f32.vlgmr.msra.gmra.mxu1 %vm340_vm2, %v6524_v31 }
 0x11b   :  { %621 = vmatpush.msrb.mxu1 %v4736_v26 }
 0x11d   :  { %622 = vmatpush.msrb.mxu1 %v4773_v33 }
 0x11f   :  { %682 = vmatpush.msra.mxu1 %v4811_v39 }
 0x121   :  { %683 = vmatpush.msra.mxu1 %v4817_v40 }
 0x123   :  { %684 = vmatpush.msra.mxu1 %v4823_v41 }
 0x125   :  { %685 = vmatpush.msra.mxu1 %v4829_v42 }
 0x177   :  { %v166_v49 = vpop.f32.mrf.mxu1 }
 0x178   :  { %v167_v54 = vadd.f32 %v4881_v50, %v166_v49 }
 0x17d   :  { %v189_v52 = vpop.f32.mrf.mxu2 }
 0x17e   :  { %v190_v61 = vadd.f32 %v4893_v56, %v189_v52  ;;  %v212_v11 = vpop.f32.mrf.mxu3 }
 0x17f   :  { %v239_v53 = vpop.f32.mrf.mxu1 }
 0x180   :  { %v240_v55 = vadd.f32 %v4886_v51, %v239_v53 }
 0x182   :  { %v288_v57 = vadd.f32 %v240_v55, %v167_v54  ;;  %v4916_v55 = vld [vmem:[%s6514_s6 + $0x2] ss:$0 sm:$0xff] }
 0x184   :  { %v4003_v59 = vmul.f32 -1.442695, %v288_v57 }
 0x185   :  { %v262_v60 = vpop.f32.mrf.mxu2 }
 0x186   :  { %4236 = vpow2.f32 %v4003_v59  ;;  %v263_v62 = vadd.f32 %v4898_v58, %v262_v60  ;;  %v285_v48 = vpop.f32.mrf.mxu3 }
 0x187   :  { %v286_v59 = vadd.f32 %v4907_v46, %v285_v48 }
 0x188   :  { %v308_v63 = vadd.f32 %v263_v62, %v190_v61 }
 0x18a   :  { %v4004_v0 = vmul.f32 -1.442695, %v308_v63 }
 0x18c   :  { %v4237_v1 = vpop.eup %4236  ;;  %4238 = vpow2.f32 %v4004_v0  ;;  %v213_v0 = vadd.f32 %v4916_v55, %v212_v11 }
 0x18d   :  { %v292_v5 = vadd.f32 1.0, %v4237_v1 }
 0x18f   :  { %4240 = vrcp.f32 %v292_v5  ;;  %v304_v49 = vand.u32 2147483648, %v292_v5  ;;  %v302_v53 = vand.u32 2147483647, %v292_v5  ;;  %vm298_vm5 = vweird.f32 %v292_v5 }
 0x191   :  { %v305_v61 = vor.u32 1.1754944e-38, %v304_v49  ;;  %vm303_vm7 = vcmp.eq.f32.partialorder %v302_v53, 8.507059e+37 }
 0x192   :  { %v4239_v16 = vpop.eup %4238 }
 0x193   :  { %v312_v21 = vadd.f32 1.0, %v4239_v16 }
 0x195   :  { %v4241_v30 = vpop.eup %4240  ;;  %4242 = vrcp.f32 %v312_v21  ;;  %v324_v16 = vand.u32 2147483648, %v312_v21  ;;  %v322_v45 = vand.u32 2147483647, %v312_v21  ;;  %vm318_vm9 = vweird.f32 %v312_v21 }
 0x196   :  { %v294_v43 = vmul.f32 %v4241_v30, %v292_v5  ;;  %vm299_vm4 = vweird.f32 %v4241_v30 }
 0x197   :  { %v360_v44 = vpop.f32.mrf.mxu1  ;;  %vm300_vm6 = vmor %vm298_vm5, %vm299_vm4  ;;  %v325_v11 = vor.u32 1.1754944e-38, %v324_v16  ;;  %vm323_vm11 = vcmp.eq.f32.partialorder %v322_v45, 8.507059e+37 }
 0x198   :  { %4008 = vmatmul.msk.f32.vlgmr.msra.gmra.mxu2 %vm145_vm1, %v360_v44  ;;  %4009 = vmatmul.msk.f32.vlgmr.msra.gmra.mxu3 %vm145_vm1, %v360_v44  ;;  %v295_v47 = vsub.f32 1.0, %v294_v43 }
 0x199   :  { %461 = vmatpush.msra.mxu2 %v4787_v35  ;;  %481 = vmatpush.msra.mxu3 %v4811_v39 }
 0x19a   :  { %v296_v52 = vmul.f32 %v4241_v30, %v295_v47 }
 0x19b   :  { %v4243_v54 = vpop.eup %4242  ;;  %462 = vmatpush.msra.mxu2 %v4793_v36  ;;  %482 = vmatpush.msra.mxu3 %v4817_v40 }
 0x19c   :  { %v314_v57 = vmul.f32 %v4243_v54, %v312_v21  ;;  %v297_v60 = vadd.f32 %v4241_v30, %v296_v52  ;;  %vm319_vm8 = vweird.f32 %v4243_v54 }
 0x19d   :  { %463 = vmatpush.msra.mxu2 %v4799_v37  ;;  %483 = vmatpush.msra.mxu3 %v4823_v41  ;;  %vm320_vm10 = vmor %vm318_vm9, %vm319_vm8 }
 0x19e   :  { %v315_v62 = vsub.f32 1.0, %v314_v57  ;;  %v301_v63 = vsel %vm300_vm6, %v4241_v30, %v297_v60 }
 0x19f   :  { %v306_v1 = vsel %vm303_vm7, %v305_v61, %v301_v63  ;;  %464 = vmatpush.msra.mxu2 %v4805_v38  ;;  %484 = vmatpush.msra.mxu3 %v4829_v42  ;;  %v561_v61 = vpop.f32.mrf.mxu0 }
 0x1a0   :  { %v316_v5 = vmul.f32 %v4243_v54, %v315_v62  ;;  %v328_v43 = vmul.f32 %v306_v1, %v286_v59  ;;  %4010 = vmatmul.msk.f32.vlgmr.msrb.gmra.mxu2 %vm145_vm1, %v360_v44  ;;  %4021 = vmatmul.msk.f32.vlgmr.msrb.gmra.mxu1 %vm145_vm1, %v561_v61 }
 0x1a1   :  { %581 = vmatpush.msrb.mxu2 %v4715_v22  ;;  %802 = vmatpush.msrb.mxu1 %v4731_v25 }
 0x1a2   :  { %v317_v30 = vadd.f32 %v4243_v54, %v316_v5  ;;  %v329_v47 = vadd.f32 %v328_v43, %v213_v0 }
 0x1a3   :  { %582 = vmatpush.msrb.mxu2 %v4720_v23  ;;  %803 = vmatpush.msrb.mxu1 %v4768_v32 }
 0x1a4   :  { %v321_v48 = vsel %vm320_vm10, %v4243_v54, %v317_v30  ;;  %4244 = vtanh.f32 %v329_v47 }
 0x1a5   :  { %v326_v44 = vsel %vm323_vm11, %v325_v11, %v321_v48 }
 0x1a6   :  { %v331_v49 = vsub.f32 1.0, %v326_v44  ;;  %v333_v53 = vmul.f32 0.0, %v326_v44 }
 0x1aa   :  { %v4245_v21 = vpop.eup %4244 }
 0x1ab   :  { %v332_v52 = vmul.f32 %v4245_v21, %v331_v49 }
 0x1ad   :  { %v4938_v57 = vadd.f32 %v333_v53, %v332_v52 }
 0x1af   :  { %4011 = vmatmul.msk.f32.vlgmr.msrb.gmra.mxu3 %vm218_vm12, %v4938_v57  ;;  %4012 = vmatmul.msk.f32.vlgmr.msra.gmra.mxu2 %vm218_vm12, %v4938_v57 }
 0x1b0   :  { %642 = vmatpush.msra.mxu2 %v4726_v24  ;;  %601 = vmatpush.msrb.mxu3 %v4731_v25 }
 0x1b2   :  { %643 = vmatpush.msra.mxu2 %v4745_v27  ;;  %602 = vmatpush.msrb.mxu3 %v4768_v32 }
 0x1b4   :  { %644 = vmatpush.msra.mxu2 %v4754_v29 }
 0x1b6   :  { %645 = vmatpush.msra.mxu2 %v4778_v34 }
 0x1b7   :  { %4013 = vmatmul.msk.f32.vlgmr.msra.gmra.mxu3 %vm218_vm12, %v4938_v57  ;;  %4019 = vmatmul.msk.f32.vlgmr.msrb.gmra.mxu2 %vm145_vm1, %v561_v61 }
 0x1b8   :  { %662 = vmatpush.msra.mxu3 %v4787_v35  ;;  %745 = vmatpush.msrb.mxu2 %v4598_v2 }
 0x1ba   :  { %663 = vmatpush.msra.mxu3 %v4793_v36  ;;  %746 = vmatpush.msrb.mxu2 %v4603_v3 }
 0x1bc   :  { %664 = vmatpush.msra.mxu3 %v4799_v37  ;;  %747 = vmatpush.msrb.mxu2 %v4609_v4 }
 0x1be   :  { %665 = vmatpush.msra.mxu3 %v4805_v38  ;;  %748 = vmatpush.msrb.mxu2 %v4618_v6 }
 0x1bf   :  { %4020 = vmatmul.msk.f32.vlgmr.msrb.gmra.mxu3 %vm145_vm1, %v561_v61 }
 0x1c0   :  { %782 = vmatpush.msrb.mxu3 %v4715_v22  ;;  %749 = vmatpush.msrb.mxu2 %v4624_v7 }
 0x1c2   :  { %783 = vmatpush.msrb.mxu3 %v4720_v23  ;;  %750 = vmatpush.msrb.mxu2 %v4629_v8 }
 0x1c4   :  { %751 = vmatpush.msrb.mxu2 %v4636_v9 }
 0x1c6   :  { %752 = vmatpush.msrb.mxu2 %v4642_v10 }
 0x1c8   :  { %753 = vmatpush.msrb.mxu2 %v4651_v12 }
 0x1ca   :  { %754 = vmatpush.msrb.mxu2 %v4657_v13 }
 0x1cc   :  { %755 = vmatpush.msrb.mxu2 %v4663_v14 }
 0x1ce   :  { %756 = vmatpush.msrb.mxu2 %v4669_v15 }
 0x1d0   :  { %757 = vmatpush.msrb.mxu2 %v4678_v17 }
 0x1d2   :  { %758 = vmatpush.msrb.mxu2 %v4684_v18 }
 0x1d4   :  { %759 = vmatpush.msrb.mxu2 %v4690_v19 }
 0x1d6   :  { %760 = vmatpush.msrb.mxu2 %v4697_v20 }
 0x21b   :  { %v383_v54 = vpop.f32.mrf.mxu2  ;;  %v403_v59 = vpop.f32.mrf.mxu3 }
 0x21c   :  { %v384_v0 = vadd.f32 %v4881_v50, %v383_v54  ;;  %v404_v1 = vadd.f32 %v4893_v56, %v403_v59 }
 0x223   :  { %v4963_v60 = vpop.f32.mrf.mxu2 }
 0x232   :  { %v446_v62 = vpop.f32.mrf.mxu3  ;;  %v466_v63 = vpop.f32.mrf.mxu2 }
 0x233   :  { %v447_v5 = vadd.f32 %v4886_v51, %v446_v62  ;;  %v467_v16 = vadd.f32 %v4898_v58, %v466_v63 }
 0x235   :  { %v489_v43 = vadd.f32 %v447_v5, %v384_v0  ;;  %v509_v45 = vadd.f32 %v467_v16, %v404_v1 }
 0x237   :  { %v4014_v30 = vmul.f32 -1.442695, %v489_v43  ;;  %v4015_v47 = vmul.f32 -1.442695, %v509_v45 }
 0x239   :  { %4246 = vpow2.f32 %v4014_v30 }
 0x23a   :  { %4248 = vpow2.f32 %v4015_v47  ;;  %v486_v5 = vpop.f32.mrf.mxu3 }
 0x23b   :  { %v487_v45 = vadd.f32 %v4907_v46, %v486_v5 }
 0x23f   :  { %v4247_v11 = vpop.eup %4246 }
 0x240   :  { %v4249_v48 = vpop.eup %4248  ;;  %v493_v44 = vadd.f32 1.0, %v4247_v11 }
 0x241   :  { %v513_v49 = vadd.f32 1.0, %v4249_v48  ;;  %v424_v48 = vadd.f32 %v4916_v55, %v4963_v60  ;;  %v4038_v60 = vld [vmem:[%s6509_s1 + $0x20] sm:$0xff] }
 0x242   :  { %4250 = vrcp.f32 %v493_v44  ;;  %v505_v62 = vand.u32 2147483648, %v493_v44  ;;  %v503_v0 = vand.u32 2147483647, %v493_v44  ;;  %vm499_vm14 = vweird.f32 %v493_v44  ;;  %941 = vperm.xlu2 %4222, %v4038_v60  }
 0x243   :  { %4252 = vrcp.f32 %v513_v49  ;;  %vm519_vm3 = vweird.f32 %v513_v49 }
 0x244   :  { %v506_v43 = vor.u32 1.1754944e-38, %v505_v62  ;;  %vm504_vm0 = vcmp.eq.f32.partialorder %v503_v0, 8.507059e+37 }
 0x248   :  { %v4251_v21 = vpop.eup %4250 }
 0x249   :  { %v4253_v52 = vpop.eup %4252  ;;  %v495_v53 = vmul.f32 %v4251_v21, %v493_v44  ;;  %vm500_vm13 = vweird.f32 %v4251_v21 }
 0x24a   :  { %v515_v54 = vmul.f32 %v4253_v52, %v513_v49  ;;  %vm501_vm15 = vmor %vm499_vm14, %vm500_vm13  ;;  %vm520_vm2 = vweird.f32 %v4253_v52 }
 0x24b   :  { %v496_v59 = vsub.f32 1.0, %v495_v53  ;;  %v525_v53 = vand.u32 2147483648, %v513_v49  ;;  %vm521_vm4 = vmor %vm519_vm3, %vm520_vm2 }
 0x24c   :  { %v516_v61 = vsub.f32 1.0, %v515_v54 }
 0x24d   :  { %v497_v63 = vmul.f32 %v4251_v21, %v496_v59  ;;  %v523_v59 = vand.u32 2147483647, %v513_v49  ;;  %v526_v44 = vor.u32 1.1754944e-38, %v525_v53  ;;  %v4049_v49 = vld [vmem:[%s6509_s1 + $0x18] sm:$0xff] }
 0x24e   :  { %v517_v1 = vmul.f32 %v4253_v52, %v516_v61  ;;  %1142 = vperm.xlu2 %4222, %v4049_v49  }
 0x24f   :  { %v498_v16 = vadd.f32 %v4251_v21, %v497_v63  ;;  %vm524_vm5 = vcmp.eq.f32.partialorder %v523_v59, 8.507059e+37 }
 0x250   :  { %v518_v11 = vadd.f32 %v4253_v52, %v517_v1 }
 0x251   :  { %v502_v30 = vsel %vm501_vm15, %v4251_v21, %v498_v16 }
 0x252   :  { %v507_v47 = vsel %vm504_vm0, %v506_v43, %v502_v30  ;;  %v522_v63 = vsel %vm521_vm4, %v4253_v52, %v518_v11  ;;  %v1742_v52 = vld [vmem:[%s6509_s1] sm:$0xff]  ;;  %v584_v43 = vpop.f32.mrf.mxu2 }
 0x253   :  { %v529_v54 = vmul.f32 %v507_v47, %v487_v45  ;;  %v527_v62 = vsel %vm524_vm5, %v526_v44, %v522_v63  ;;  %v604_v45 = vpop.f32.mrf.mxu3  ;;  %v585_v11 = vadd.f32 %v4881_v50, %v584_v43 }
 0x254   :  { %v532_v5 = vsub.f32 1.0, %v527_v62  ;;  %v534_v16 = vmul.f32 %v527_v62, %v4938_v57  ;;  %v741_v57 = vpop.permute.xlu1 %740 }
 0x255   :  { %v530_v61 = vadd.f32 %v529_v54, %v424_v48  ;;  %vm742_vm6 = vcmp.eq.s32.totalorder %v4748_v28, %v741_v57  ;;  %v605_v48 = vadd.f32 %v4893_v56, %v604_v45  ;;  %v624_v57 = vpop.f32.mrf.mxu1 }
 0x256   :  { %1744 = vperm.xlu2 %4222, %v1742_v52  }
 0x257   :  { %4254 = vtanh.f32 %v530_v61 }
 0x25d   :  { %v4255_v21 = vpop.eup %4254 }
 0x25e   :  { %v533_v0 = vmul.f32 %v4255_v21, %v532_v5 }
 0x260   :  { %v4996_v1 = vadd.f32 %v534_v16, %v533_v0 }
 0x262   :  { %4022 = vmatmul.msk.f32.vlgmr.msra.gmra.mxu2 %vm218_vm12, %v4996_v1  ;;  %4023 = vmatmul.msk.f32.vlgmr.msra.gmra.mxu3 %vm218_vm12, %v4996_v1 }
 0x263   :  { %4024 = vmatmul.msk.f32.vlgmr.msra.gmra.mxu1 %vm218_vm12, %v4996_v1  ;;  %822 = vmatpush.msra.mxu3 %v4736_v26 }
 0x264   :  { %863 = vmatpush.msra.mxu1 %v4787_v35  ;;  %1044 = vmatpush.msra.mxu2 %v4726_v24 }
 0x265   :  { %823 = vmatpush.msra.mxu3 %v4773_v33 }
 0x266   :  { %864 = vmatpush.msra.mxu1 %v4793_v36  ;;  %1045 = vmatpush.msra.mxu2 %v4745_v27 }
 0x268   :  { %865 = vmatpush.msra.mxu1 %v4799_v37  ;;  %1046 = vmatpush.msra.mxu2 %v4754_v29 }
 0x26a   :  { %4029 = vmatmul.msk.f32.vlgmr.msrb.gmra.mxu2 %vm742_vm6, %v6524_v31  ;;  %866 = vmatpush.msra.mxu1 %v4805_v38 }
 0x26b   :  { %1047 = vmatpush.msra.mxu2 %v4778_v34 }
 0x26d   :  { %1147 = vmatpush.msrb.mxu2 %v4598_v2 }
 0x26f   :  { %1148 = vmatpush.msrb.mxu2 %v4603_v3 }
 0x271   :  { %1149 = vmatpush.msrb.mxu2 %v4609_v4 }
 0x273   :  { %1150 = vmatpush.msrb.mxu2 %v4618_v6 }
 0x275   :  { %1151 = vmatpush.msrb.mxu2 %v4624_v7 }
 0x277   :  { %1152 = vmatpush.msrb.mxu2 %v4629_v8 }
 0x279   :  { %1153 = vmatpush.msrb.mxu2 %v4636_v9 }
 0x27b   :  { %1154 = vmatpush.msrb.mxu2 %v4642_v10 }
 0x27d   :  { %1155 = vmatpush.msrb.mxu2 %v4651_v12 }
 0x27f   :  { %1156 = vmatpush.msrb.mxu2 %v4657_v13 }
 0x281   :  { %1157 = vmatpush.msrb.mxu2 %v4663_v14 }
 0x283   :  { %1158 = vmatpush.msrb.mxu2 %v4669_v15 }
 0x285   :  { %1159 = vmatpush.msrb.mxu2 %v4678_v17 }
 0x287   :  { %1160 = vmatpush.msrb.mxu2 %v4684_v18 }
 0x289   :  { %1161 = vmatpush.msrb.mxu2 %v4690_v19 }
 0x28b   :  { %1162 = vmatpush.msrb.mxu2 %v4697_v20 }
 0x2e5   :  { %v647_v30 = vpop.f32.mrf.mxu2  ;;  %v667_v47 = vpop.f32.mrf.mxu3 }
 0x2e6   :  { %v648_v53 = vadd.f32 %v4886_v51, %v647_v30  ;;  %v668_v54 = vadd.f32 %v4898_v58, %v667_v47 }
 0x2e8   :  { %v690_v59 = vadd.f32 %v648_v53, %v585_v11  ;;  %v710_v61 = vadd.f32 %v668_v54, %v605_v48  ;;  %v687_v53 = vpop.f32.mrf.mxu1 }
 0x2ea   :  { %v4025_v63 = vmul.f32 -1.442695, %v690_v59  ;;  %v4026_v44 = vmul.f32 -1.442695, %v710_v61 }
 0x2ec   :  { %4256 = vpow2.f32 %v4025_v63  ;;  %v688_v63 = vadd.f32 %v4907_v46, %v687_v53 }
 0x2ed   :  { %4258 = vpow2.f32 %v4026_v44  ;;  %v762_v62 = vpop.f32.mrf.mxu2 }
 0x2ee   :  { %4030 = vmatmul.msk.f32.vlgmr.msrb.gmra.mxu3 %vm145_vm1, %v762_v62  ;;  %4031 = vmatmul.msk.f32.vlgmr.msrb.gmra.mxu1 %vm145_vm1, %v762_v62 }
 0x2ef   :  { %883 = vmatpush.msrb.mxu3 %v4811_v39  ;;  %983 = vmatpush.msrb.mxu1 %v4715_v22 }
 0x2f1   :  { %884 = vmatpush.msrb.mxu3 %v4817_v40  ;;  %984 = vmatpush.msrb.mxu1 %v4720_v23 }
 0x2f2   :  { %v4257_v5 = vpop.eup %4256 }
 0x2f3   :  { %v4259_v21 = vpop.eup %4258  ;;  %v694_v0 = vadd.f32 1.0, %v4257_v5  ;;  %885 = vmatpush.msrb.mxu3 %v4823_v41 }
 0x2f4   :  { %v714_v16 = vadd.f32 1.0, %v4259_v21  ;;  %v625_v21 = vadd.f32 %v4916_v55, %v624_v57 }
 0x2f5   :  { %4260 = vrcp.f32 %v694_v0  ;;  %886 = vmatpush.msrb.mxu3 %v4829_v42  ;;  %v706_v30 = vand.u32 2147483648, %v694_v0  ;;  %v704_v48 = vand.u32 2147483647, %v694_v0  ;;  %vm700_vm8 = vweird.f32 %v694_v0 }
 0x2f6   :  { %4262 = vrcp.f32 %v714_v16  ;;  %4032 = vmatmul.msk.f32.vlgmr.msra.gmra.mxu3 %vm145_vm1, %v762_v62  ;;  %vm720_vm13 = vweird.f32 %v714_v16 }
 0x2f7   :  { %1003 = vmatpush.msra.mxu3 %v4731_v25  ;;  %v707_v61 = vor.u32 1.1754944e-38, %v706_v30  ;;  %vm705_vm10 = vcmp.eq.f32.partialorder %v704_v48, 8.507059e+37 }
 0x2f9   :  { %1004 = vmatpush.msra.mxu3 %v4768_v32 }
 0x2fb   :  { %v4261_v60 = vpop.eup %4260 }
 0x2fc   :  { %v4263_v49 = vpop.eup %4262  ;;  %v696_v52 = vmul.f32 %v4261_v60, %v694_v0  ;;  %vm701_vm7 = vweird.f32 %v4261_v60 }
 0x2fd   :  { %v716_v43 = vmul.f32 %v4263_v49, %v714_v16  ;;  %vm702_vm9 = vmor %vm700_vm8, %vm701_vm7  ;;  %vm721_vm11 = vweird.f32 %v4263_v49 }
 0x2fe   :  { %v697_v45 = vsub.f32 1.0, %v696_v52  ;;  %vm722_vm14 = vmor %vm720_vm13, %vm721_vm11 }
 0x2ff   :  { %v717_v47 = vsub.f32 1.0, %v716_v43  ;;  %v726_v43 = vand.u32 2147483648, %v714_v16 }
 0x300   :  { %v698_v11 = vmul.f32 %v4261_v60, %v697_v45  ;;  %v724_v45 = vand.u32 2147483647, %v714_v16 }
 0x301   :  { %v718_v54 = vmul.f32 %v4263_v49, %v717_v47 }
 0x302   :  { %v699_v59 = vadd.f32 %v4261_v60, %v698_v11  ;;  %v727_v11 = vor.u32 1.1754944e-38, %v726_v43  ;;  %vm725_vm15 = vcmp.eq.f32.partialorder %v724_v45, 8.507059e+37 }
 0x303   :  { %v719_v5 = vadd.f32 %v4263_v49, %v718_v54 }
 0x304   :  { %v703_v44 = vsel %vm702_vm9, %v4261_v60, %v699_v59 }
 0x305   :  { %v708_v62 = vsel %vm705_vm10, %v707_v61, %v703_v44  ;;  %v723_v47 = vsel %vm722_vm14, %v4263_v49, %v719_v5 }
 0x306   :  { %v730_v52 = vmul.f32 %v708_v62, %v688_v63  ;;  %v728_v0 = vsel %vm725_vm15, %v727_v11, %v723_v47 }
 0x307   :  { %v733_v30 = vsub.f32 1.0, %v728_v0  ;;  %v735_v48 = vmul.f32 %v728_v0, %v4996_v1  ;;  %v6545_v1 = vmov 1.0  }
 0x308   :  { %v731_v31 = vadd.f32 %v730_v52, %v625_v21 }
 0x30a   :  { %4264 = vtanh.f32 %v731_v31  ;;  %v942_v31 = vpop.permute.xlu2 %941 }
 0x30b   :  { %vm943_vm0 = vcmp.eq.s32.totalorder %v4748_v28, %v942_v31 }
 0x310   :  { %v4265_v53 = vpop.eup %4264 }
 0x311   :  { %v734_v60 = vmul.f32 %v4265_v53, %v733_v30 }
 0x313   :  { %v5059_v54 = vadd.f32 %v735_v48, %v734_v60 }
 0x315   :  { %4033 = vmatmul.msk.f32.vlgmr.msra.gmra.mxu0 %vm218_vm12, %v5059_v54  ;;  %4034 = vmatmul.msk.f32.vlgmr.msra.gmra.mxu1 %vm218_vm12, %v5059_v54 }
 0x316   :  { %4035 = vmatmul.msk.f32.vlgmr.msrb.gmra.mxu3 %vm218_vm12, %v5059_v54  ;;  %1023 = vmatpush.msra.mxu1 %v4736_v26 }
 0x317   :  { %1064 = vmatpush.msrb.mxu3 %v4787_v35  ;;  %1245 = vmatpush.msra.mxu0 %v4726_v24 }
 0x318   :  { %1024 = vmatpush.msra.mxu1 %v4773_v33 }
 0x319   :  { %1065 = vmatpush.msrb.mxu3 %v4793_v36  ;;  %1246 = vmatpush.msra.mxu0 %v4745_v27 }
 0x31b   :  { %1066 = vmatpush.msrb.mxu3 %v4799_v37  ;;  %1247 = vmatpush.msra.mxu0 %v4754_v29 }
 0x31d   :  { %4040 = vmatmul.msk.f32.vlgmr.msrb.gmra.mxu0 %vm943_vm0, %v6545_v1  ;;  %1067 = vmatpush.msrb.mxu3 %v4805_v38 }
 0x31e   :  { %1248 = vmatpush.msra.mxu0 %v4778_v34 }
 0x320   :  { %1348 = vmatpush.msrb.mxu0 %v4598_v2 }
 0x322   :  { %1349 = vmatpush.msrb.mxu0 %v4603_v3 }
 0x324   :  { %1350 = vmatpush.msrb.mxu0 %v4609_v4 }
 0x326   :  { %1351 = vmatpush.msrb.mxu0 %v4618_v6 }
 0x328   :  { %1352 = vmatpush.msrb.mxu0 %v4624_v7 }
 0x32a   :  { %1353 = vmatpush.msrb.mxu0 %v4629_v8 }
 0x32c   :  { %1354 = vmatpush.msrb.mxu0 %v4636_v9 }
 0x32e   :  { %1355 = vmatpush.msrb.mxu0 %v4642_v10 }
 0x330   :  { %1356 = vmatpush.msrb.mxu0 %v4651_v12 }
 0x332   :  { %1357 = vmatpush.msrb.mxu0 %v4657_v13 }
 0x334   :  { %1358 = vmatpush.msrb.mxu0 %v4663_v14 }
 0x336   :  { %1359 = vmatpush.msrb.mxu0 %v4669_v15 }
 0x338   :  { %1360 = vmatpush.msrb.mxu0 %v4678_v17 }
 0x33a   :  { %1361 = vmatpush.msrb.mxu0 %v4684_v18 }
 0x33c   :  { %1362 = vmatpush.msrb.mxu0 %v4690_v19 }
 0x33e   :  { %1363 = vmatpush.msrb.mxu0 %v4697_v20 }
 0x36b   :  { %v805_v2 = vpop.f32.mrf.mxu1 }
 0x36c   :  { %v806_v7 = vadd.f32 %v4893_v56, %v805_v2 }
 0x371   :  { %v785_v3 = vpop.f32.mrf.mxu3 }
 0x372   :  { %v786_v8 = vadd.f32 %v4881_v50, %v785_v3 }
 0x392   :  { %v848_v4 = vpop.f32.mrf.mxu0  ;;  %v868_v6 = vpop.f32.mrf.mxu1 }
 0x393   :  { %v849_v9 = vadd.f32 %v4886_v51, %v848_v4  ;;  %v869_v10 = vadd.f32 %v4898_v58, %v868_v6  ;;  %v5126_v4 = vld [vmem:[%s6513_s5 + $0x18] sm:$0xff]  ;;  %v5195_v6 = vld [vmem:[%s6511_s3 + $0x30] sm:$0xff] }
 0x395   :  { %v891_v12 = vadd.f32 %v849_v9, %v786_v8  ;;  %v911_v13 = vadd.f32 %v869_v10, %v806_v7  ;;  %v5201_v7 = vld [vmem:[%s6511_s3 + $0x28] sm:$0xff]  ;;  %v5207_v8 = vld [vmem:[%s6511_s3 + $0x20] sm:$0xff]  ;;  %v5213_v9 = vld [vmem:[%s6511_s3 + $0x18] sm:$0xff] }
 0x396   :  { %v5219_v10 = vld [vmem:[%s6511_s3 + $0x10] sm:$0xff] }
 0x397   :  { %v4036_v14 = vmul.f32 -1.442695, %v891_v12  ;;  %v4037_v15 = vmul.f32 -1.442695, %v911_v13  ;;  %v5225_v12 = vld [vmem:[%s6511_s3 + $0x8] sm:$0xff]  ;;  %v5231_v13 = vld [vmem:[%s6511_s3] sm:$0xff] }
 0x399   :  { %4266 = vpow2.f32 %v4036_v14 }
 0x39a   :  { %4268 = vpow2.f32 %v4037_v15  ;;  %v963_v17 = vpop.f32.mrf.mxu0 }
 0x39b   :  { %4041 = vmatmul.msk.f32.vlgmr.msrb.gmra.mxu1 %vm145_vm1, %v963_v17  ;;  %4042 = vmatmul.msk.f32.vlgmr.msra.gmra.mxu3 %vm145_vm1, %v963_v17 }
 0x39c   :  { %1084 = vmatpush.msrb.mxu1 %v4811_v39  ;;  %1184 = vmatpush.msra.mxu3 %v4715_v22  ;;  %v825_v39 = vpop.f32.mrf.mxu3 }
 0x39d   :  { %v826_v52 = vadd.f32 %v4916_v55, %v825_v39 }
 0x39e   :  { %1085 = vmatpush.msrb.mxu1 %v4817_v40  ;;  %1185 = vmatpush.msra.mxu3 %v4720_v23 }
 0x39f   :  { %v4267_v18 = vpop.eup %4266 }
 0x3a0   :  { %v4269_v19 = vpop.eup %4268  ;;  %v895_v20 = vadd.f32 1.0, %v4267_v18  ;;  %1086 = vmatpush.msrb.mxu1 %v4823_v41 }
 0x3a1   :  { %v915_v24 = vadd.f32 1.0, %v4269_v19 }
 0x3a2   :  { %4270 = vrcp.f32 %v895_v20  ;;  %1087 = vmatpush.msrb.mxu1 %v4829_v42  ;;  %v907_v59 = vand.u32 2147483648, %v895_v20  ;;  %v905_v61 = vand.u32 2147483647, %v895_v20  ;;  %vm901_vm3 = vweird.f32 %v895_v20 }
 0x3a3   :  { %4272 = vrcp.f32 %v915_v24  ;;  %4043 = vmatmul.msk.f32.vlgmr.msra.gmra.mxu1 %vm145_vm1, %v963_v17  ;;  %v927_v43 = vand.u32 2147483648, %v915_v24  ;;  %vm921_vm7 = vweird.f32 %v915_v24  ;;  %v925_v47 = vand.u32 2147483647, %v915_v24 }
 0x3a4   :  { %1204 = vmatpush.msra.mxu1 %v4731_v25  ;;  %v888_v42 = vpop.f32.mrf.mxu3  ;;  %v908_v62 = vor.u32 1.1754944e-38, %v907_v59  ;;  %vm906_vm5 = vcmp.eq.f32.partialorder %v905_v61, 8.507059e+37  ;;  %v5267_v61 = vld [vmem:[%s6513_s5 + $0x48] sm:$0xff] }
 0x3a5   :  { %v889_v25 = vadd.f32 %v4907_v46, %v888_v42  ;;  %v928_v30 = vor.u32 1.1754944e-38, %v927_v43  ;;  %vm926_vm9 = vcmp.eq.f32.partialorder %v925_v47, 8.507059e+37  ;;  %v5273_v42 = vld [vmem:[%s6513_s5 + $0x40] sm:$0xff] }
 0x3a6   :  { %1205 = vmatpush.msra.mxu1 %v4768_v32 }
 0x3a8   :  { %v4271_v22 = vpop.eup %4270 }
 0x3a9   :  { %v4273_v40 = vpop.eup %4272  ;;  %v897_v23 = vmul.f32 %v4271_v22, %v895_v20  ;;  %vm902_vm2 = vweird.f32 %v4271_v22 }
 0x3aa   :  { %v917_v16 = vmul.f32 %v4273_v40, %v915_v24  ;;  %vm903_vm4 = vmor %vm901_vm3, %vm902_vm2  ;;  %vm922_vm6 = vweird.f32 %v4273_v40 }
 0x3ab   :  { %v898_v57 = vsub.f32 1.0, %v897_v23  ;;  %vm923_vm8 = vmor %vm921_vm7, %vm922_vm6 }
 0x3ac   :  { %v918_v49 = vsub.f32 1.0, %v917_v16 }
 0x3ad   :  { %v899_v41 = vmul.f32 %v4271_v22, %v898_v57 }
 0x3ae   :  { %v919_v63 = vmul.f32 %v4273_v40, %v918_v49 }
 0x3af   :  { %v900_v44 = vadd.f32 %v4271_v22, %v899_v41 }
 0x3b0   :  { %v920_v21 = vadd.f32 %v4273_v40, %v919_v63 }
 0x3b1   :  { %v904_v5 = vsel %vm903_vm4, %v4271_v22, %v900_v44 }
 0x3b2   :  { %v909_v32 = vsel %vm906_vm5, %v908_v62, %v904_v5  ;;  %v924_v0 = vsel %vm923_vm8, %v4273_v40, %v920_v21  ;;  %v5280_v62 = vld [vmem:[%s6512_s4 + $0x18] sm:$0xff] }
 0x3b3   :  { %v931_v45 = vmul.f32 %v909_v32, %v889_v25  ;;  %v929_v53 = vsel %vm926_vm9, %v928_v30, %v924_v0  ;;  %v5286_v25 = vld [vmem:[%s6512_s4 + $0x10] sm:$0xff] }
 0x3b4   :  { %v934_v60 = vsub.f32 1.0, %v929_v53  ;;  %v936_v2 = vmul.f32 %v929_v53, %v5059_v54  ;;  %v1143_v54 = vpop.permute.xlu2 %1142 }
 0x3b5   :  { %v932_v11 = vadd.f32 %v931_v45, %v826_v52  ;;  %vm1144_vm10 = vcmp.eq.s32.totalorder %v4748_v28, %v1143_v54 }
 0x3b7   :  { %4274 = vtanh.f32 %v932_v11 }
 0x3bd   :  { %v4275_v48 = vpop.eup %4274 }
 0x3be   :  { %v935_v31 = vmul.f32 %v4275_v48, %v934_v60 }
 0x3c0   :  { %v5113_v3 = vadd.f32 %v936_v2, %v935_v31 }
 0x3c2   :  { %4044 = vmatmul.msk.f32.vlgmr.msra.gmra.mxu2 %vm218_vm12, %v5113_v3  ;;  %4045 = vmatmul.msk.f32.vlgmr.msrb.gmra.mxu3 %vm218_vm12, %v5113_v3 }
 0x3c3   :  { %4046 = vmatmul.msk.f32.vlgmr.msrb.gmra.mxu1 %vm218_vm12, %v5113_v3  ;;  %1224 = vmatpush.msrb.mxu3 %v4736_v26  ;;  %v5141_v26 = vld [vmem:[%s6511_s3 + $0x78] sm:$0xff] }
 0x3c4   :  { %1265 = vmatpush.msrb.mxu1 %v4787_v35  ;;  %1446 = vmatpush.msra.mxu2 %v5126_v4  ;;  %v5171_v35 = vld [vmem:[%s6511_s3 + $0x50] sm:$0xff] }
 0x3c5   :  { %1225 = vmatpush.msrb.mxu3 %v4773_v33  ;;  %v5159_v33 = vld [vmem:[%s6511_s3 + $0x60] sm:$0xff] }
 0x3c6   :  { %1266 = vmatpush.msrb.mxu1 %v4793_v36  ;;  %1447 = vmatpush.msra.mxu2 %v4745_v27  ;;  %v5147_v27 = vld [vmem:[%s6511_s3 + $0x70] sm:$0xff]  ;;  %v5177_v36 = vld [vmem:[%s6511_s3 + $0x48] sm:$0xff] }
 0x3c8   :  { %1267 = vmatpush.msrb.mxu1 %v4799_v37  ;;  %1448 = vmatpush.msra.mxu2 %v4754_v29  ;;  %v5153_v29 = vld [vmem:[%s6511_s3 + $0x68] sm:$0xff]  ;;  %v5183_v37 = vld [vmem:[%s6511_s3 + $0x40] sm:$0xff] }
 0x3ca   :  { %4051 = vmatmul.msk.f32.vlgmr.msrb.gmra.mxu2 %vm1144_vm10, %v6545_v1  ;;  %1268 = vmatpush.msrb.mxu1 %v4805_v38  ;;  %v5189_v38 = vld [vmem:[%s6511_s3 + $0x38] sm:$0xff] }
 0x3cb   :  { %1449 = vmatpush.msra.mxu2 %v4778_v34  ;;  %v5165_v34 = vld [vmem:[%s6511_s3 + $0x58] sm:$0xff]  ;;  %s4160_s3 = sld [smem:[#allocation2 + $0x3]] }
 0x3cd   :  { %1549 = vmatpush.msrb.mxu2 %v5141_v26 }
 0x3cf   :  { %1550 = vmatpush.msrb.mxu2 %v5147_v27 }
 0x3d1   :  { %1551 = vmatpush.msrb.mxu2 %v5153_v29  ;;  %p3004_p3 = scmp.gt.s32.totalorder %s4160_s3, 0 }
 0x3d3   :  { %1552 = vmatpush.msrb.mxu2 %v5159_v33  ;;  %s3007_s1 = scalar_select %p3004_p3, 1, 0 }
 0x3d5   :  { %1553 = vmatpush.msrb.mxu2 %v5165_v34 }
 0x3d7   :  { %1554 = vmatpush.msrb.mxu2 %v5171_v35 }
 0x3d9   :  { %1555 = vmatpush.msrb.mxu2 %v5177_v36 }
 0x3db   :  { %1556 = vmatpush.msrb.mxu2 %v5183_v37 }
 0x3dd   :  { %1557 = vmatpush.msrb.mxu2 %v5189_v38 }
 0x3df   :  { %1558 = vmatpush.msrb.mxu2 %v5195_v6 }
 0x3e1   :  { %1559 = vmatpush.msrb.mxu2 %v5201_v7 }
 0x3e3   :  { %1560 = vmatpush.msrb.mxu2 %v5207_v8 }
 0x3e5   :  { %1561 = vmatpush.msrb.mxu2 %v5213_v9 }
 0x3e7   :  { %1562 = vmatpush.msrb.mxu2 %v5219_v10 }
 0x3e9   :  { %1563 = vmatpush.msrb.mxu2 %v5225_v12 }
 0x3eb   :  { %1564 = vmatpush.msrb.mxu2 %v5231_v13 }
 0x418   :  { %v986_v15 = vpop.f32.mrf.mxu1 }
 0x419   :  { %v987_v20 = vadd.f32 %v4881_v50, %v986_v15  ;;  %v5249_v50 = vld [vmem:[%s6512_s4 + $0x8] sm:$0xff] }
 0x41e   :  { %v1006_v14 = vpop.f32.mrf.mxu3 }
 0x41f   :  { %v1007_v17 = vadd.f32 %v4893_v56, %v1006_v14  ;;  %v5243_v56 = vld [vmem:[%s6513_s5 + $0x58] sm:$0xff] }
 0x420   :  { %v1026_v44 = vpop.f32.mrf.mxu1 }
 0x421   :  { %v1027_v15 = vadd.f32 %v4916_v55, %v1026_v44  ;;  %v5303_v55 = vld [vmem:[%s6512_s4 + $0x28] sm:$0xff] }
 0x422   :  { %v5334_v44 = vld [vmem:[%s6513_s5 + $0x28] sm:$0xff] }
 0x440   :  { %v1089_v30 = vpop.f32.mrf.mxu1 }
 0x441   :  { %v1090_v31 = vadd.f32 %v4907_v46, %v1089_v30 }
 0x445   :  { %v1049_v18 = vpop.f32.mrf.mxu2  ;;  %v1069_v19 = vpop.f32.mrf.mxu3 }
 0x446   :  { %v1050_v24 = vadd.f32 %v4886_v51, %v1049_v18  ;;  %v1070_v39 = vadd.f32 %v4898_v58, %v1069_v19  ;;  %v5255_v51 = vld [vmem:[%s6513_s5 + $0x50] sm:$0xff]  ;;  %v5261_v58 = vld [vmem:[%s6512_s4] sm:$0xff] }
 0x448   :  { %v1092_v22 = vadd.f32 %v1050_v24, %v987_v20  ;;  %v1112_v40 = vadd.f32 %v1070_v39, %v1007_v17 }
 0x44a   :  { %v4047_v23 = vmul.f32 -1.442695, %v1092_v22  ;;  %v4048_v16 = vmul.f32 -1.442695, %v1112_v40 }
 0x44c   :  { %4276 = vpow2.f32 %v4047_v23 }
 0x44d   :  { %4278 = vpow2.f32 %v4048_v16  ;;  %v1164_v57 = vpop.f32.mrf.mxu2 }
 0x44e   :  { %4052 = vmatmul.msk.f32.vlgmr.msra.gmra.mxu3 %vm145_vm1, %v1164_v57  ;;  %4053 = vmatmul.msk.f32.vlgmr.msra.gmra.mxu1 %vm145_vm1, %v1164_v57 }
 0x44f   :  { %1285 = vmatpush.msra.mxu3 %v5243_v56  ;;  %1385 = vmatpush.msra.mxu1 %v5249_v50 }
 0x451   :  { %1286 = vmatpush.msra.mxu3 %v5255_v51  ;;  %1386 = vmatpush.msra.mxu1 %v5261_v58 }
 0x452   :  { %v4277_v49 = vpop.eup %4276 }
 0x453   :  { %v4279_v59 = vpop.eup %4278  ;;  %v1096_v41 = vadd.f32 1.0, %v4277_v49  ;;  %1287 = vmatpush.msra.mxu3 %v5267_v61  ;;  %v5316_v49 = vld [vmem:[%s6512_s4 + $0x20] sm:$0xff] }
 0x454   :  { %v1116_v63 = vadd.f32 1.0, %v4279_v59  ;;  %v1344_v59 = vpop.permute.xlu0 %1343 }
 0x455   :  { %4280 = vrcp.f32 %v1096_v41  ;;  %1288 = vmatpush.msra.mxu3 %v5273_v42  ;;  %v1108_v45 = vand.u32 2147483648, %v1096_v41  ;;  %v1106_v0 = vand.u32 2147483647, %v1096_v41  ;;  %vm1102_vm13 = vweird.f32 %v1096_v41 }
 0x456   :  { %4282 = vrcp.f32 %v1116_v63  ;;  %4054 = vmatmul.msk.f32.vlgmr.msrb.gmra.mxu3 %vm145_vm1, %v1164_v57  ;;  %v1128_v18 = vand.u32 2147483648, %v1116_v63  ;;  %vm1122_vm2 = vweird.f32 %v1116_v63  ;;  %v1126_v19 = vand.u32 2147483647, %v1116_v63 }
 0x457   :  { %1405 = vmatpush.msrb.mxu3 %v5280_v62  ;;  %v1109_v48 = vor.u32 1.1754944e-38, %v1108_v45  ;;  %vm1107_vm15 = vcmp.eq.f32.partialorder %v1106_v0, 8.507059e+37  ;;  %vm1345_vm5 = vcmp.eq.s32.totalorder %v4748_v28, %v1344_v59 }
 0x458   :  { %v1129_v39 = vor.u32 1.1754944e-38, %v1128_v18  ;;  %vm1127_vm4 = vcmp.eq.f32.partialorder %v1126_v19, 8.507059e+37 }
 0x459   :  { %1406 = vmatpush.msrb.mxu3 %v5286_v25 }
 0x45b   :  { %v4281_v5 = vpop.eup %4280 }
 0x45c   :  { %v4283_v32 = vpop.eup %4282  ;;  %v1098_v21 = vmul.f32 %v4281_v5, %v1096_v41  ;;  %vm1103_vm11 = vweird.f32 %v4281_v5  ;;  %v5322_v41 = vld [vmem:[%s6513_s5 + $0x30] sm:$0xff] }
 0x45d   :  { %v1118_v52 = vmul.f32 %v4283_v32, %v1116_v63  ;;  %vm1104_vm14 = vmor %vm1102_vm13, %vm1103_vm11  ;;  %vm1123_vm0 = vweird.f32 %v4283_v32  ;;  %v5328_v63 = vld [vmem:[%s6513_s5 + $0x10] sm:$0xff] }
 0x45e   :  { %v1099_v43 = vsub.f32 1.0, %v1098_v21  ;;  %vm1124_vm3 = vmor %vm1122_vm2, %vm1123_vm0  ;;  %v5354_v21 = vld [vmem:[%s6513_s5] sm:$0xff] }
 0x45f   :  { %v1119_v47 = vsub.f32 1.0, %v1118_v52 }
 0x460   :  { %v1100_v11 = vmul.f32 %v4281_v5, %v1099_v43 }
 0x461   :  { %v1120_v53 = vmul.f32 %v4283_v32, %v1119_v47 }
 0x462   :  { %v1101_v60 = vadd.f32 %v4281_v5, %v1100_v11 }
 0x463   :  { %v1121_v14 = vadd.f32 %v4283_v32, %v1120_v53 }
 0x464   :  { %v1105_v2 = vsel %vm1104_vm14, %v4281_v5, %v1101_v60  ;;  %v5340_v5 = vld [vmem:[%s6513_s5 + $0x8] sm:$0xff] }
 0x465   :  { %v1110_v54 = vsel %vm1107_vm15, %v1109_v48, %v1105_v2  ;;  %v1125_v24 = vsel %vm1124_vm3, %v4283_v32, %v1121_v14  ;;  %v5348_v32 = vld [vmem:[%s6513_s5 + $0x20] sm:$0xff] }
 0x466   :  { %v1132_v17 = vmul.f32 %v1110_v54, %v1090_v31  ;;  %v1130_v22 = vsel %vm1127_vm4, %v1129_v39, %v1125_v24  ;;  %v5411_v24 = vld [vmem:[%s6515_s7 + $0x2] ss:$0 sm:$0xff] }
 0x467   :  { %v1135_v40 = vsub.f32 1.0, %v1130_v22  ;;  %v1137_v16 = vmul.f32 %v1130_v22, %v5113_v3  ;;  %v5309_v3 = vld [vmem:[%s6513_s5 + $0x38] sm:$0xff]  ;;  %s4132_s5 = sld [smem:[#allocation2 + $0x1]] }
 0x468   :  { %v1133_v20 = vadd.f32 %v1132_v17, %v1027_v15 }
 0x46a   :  { %4284 = vtanh.f32 %v1133_v20 }
 0x46d   :  { %p2508_p1 = scmp.gt.s32.totalorder %s4132_s5, 0 }
 0x46f   :  { %s2511_s23 = scalar_select %p2508_p1, 1, 0 }
 0x470   :  { %v4285_v46 = vpop.eup %4284 }
 0x471   :  { %v1136_v23 = vmul.f32 %v4285_v46, %v1135_v40 }
 0x473   :  { %v5292_v57 = vadd.f32 %v1137_v16, %v1136_v23  ;;  %v5417_v23 = vld [vmem:[%s6514_s6 + $0x2] ss:$0 sm:$0xff] }
 0x475   :  { %4055 = vmatmul.msk.f32.vlgmr.msra.gmra.mxu0 %vm218_vm12, %v5292_v57  ;;  %4056 = vmatmul.msk.f32.vlgmr.msrb.gmra.mxu1 %vm218_vm12, %v5292_v57 }
 0x476   :  { %4057 = vmatmul.msk.f32.vlgmr.msra.gmra.mxu3 %vm218_vm12, %v5292_v57  ;;  %1425 = vmatpush.msrb.mxu1 %v5303_v55 }
 0x477   :  { %1466 = vmatpush.msra.mxu3 %v5309_v3  ;;  %1647 = vmatpush.msra.mxu0 %v5126_v4 }
 0x478   :  { %1426 = vmatpush.msrb.mxu1 %v5316_v49 }
 0x479   :  { %1467 = vmatpush.msra.mxu3 %v5322_v41  ;;  %1648 = vmatpush.msra.mxu0 %v5328_v63 }
 0x47b   :  { %1468 = vmatpush.msra.mxu3 %v5334_v44  ;;  %1649 = vmatpush.msra.mxu0 %v5340_v5 }
 0x47d   :  { %4062 = vmatmul.msk.f32.vlgmr.msrb.gmra.mxu0 %vm1345_vm5, %v6545_v1  ;;  %1469 = vmatpush.msra.mxu3 %v5348_v32 }
 0x47e   :  { %1650 = vmatpush.msra.mxu0 %v5354_v21 }
 0x480   :  { %1749 = vmatpush.msrb.mxu0 %v5141_v26 }
 0x482   :  { %1750 = vmatpush.msrb.mxu0 %v5147_v27 }
 0x484   :  { %1751 = vmatpush.msrb.mxu0 %v5153_v29 }
 0x486   :  { %1752 = vmatpush.msrb.mxu0 %v5159_v33 }
 0x488   :  { %1753 = vmatpush.msrb.mxu0 %v5165_v34  ;;  %v5376_v34 = vld [vmem:[%s6514_s6 + $0x1] ss:$0 sm:$0xff] }
 0x48a   :  { %1754 = vmatpush.msrb.mxu0 %v5171_v35 }
 0x48c   :  { %1755 = vmatpush.msrb.mxu0 %v5177_v36  ;;  %v5382_v36 = vld [vmem:[%s6514_s6] ss:$0 sm:$0xff] }
 0x48e   :  { %1756 = vmatpush.msrb.mxu0 %v5183_v37 }
 0x490   :  { %1757 = vmatpush.msrb.mxu0 %v5189_v38  ;;  %v5388_v38 = vld [vmem:[%s6515_s7] ss:$0 sm:$0xff] }
 0x492   :  { %1758 = vmatpush.msrb.mxu0 %v5195_v6 }
 0x494   :  { %1759 = vmatpush.msrb.mxu0 %v5201_v7  ;;  %v5394_v7 = vld [vmem:[%s6515_s7 + $0x1] ss:$0 sm:$0xff] }
 0x496   :  { %1760 = vmatpush.msrb.mxu0 %v5207_v8 }
 0x498   :  { %1761 = vmatpush.msrb.mxu0 %v5213_v9 }
 0x49a   :  { %1762 = vmatpush.msrb.mxu0 %v5219_v10 }
 0x49c   :  { %1763 = vmatpush.msrb.mxu0 %v5225_v12 }
 0x49e   :  { %1764 = vmatpush.msrb.mxu0 %v5231_v13 }
 0x4cb   :  { %v1207_v26 = vpop.f32.mrf.mxu1 }
 0x4cc   :  { %v1208_v35 = vadd.f32 %v5376_v34, %v1207_v26 }
 0x4d1   :  { %v1187_v27 = vpop.f32.mrf.mxu3 }
 0x4d2   :  { %v1188_v37 = vadd.f32 %v5382_v36, %v1187_v27 }
 0x4d9   :  { %v1227_v0 = vpop.f32.mrf.mxu3 }
 0x4da   :  { %v1228_v16 = vadd.f32 %v5417_v23, %v1227_v0 }
 0x4f2   :  { %v1250_v29 = vpop.f32.mrf.mxu0  ;;  %v1270_v33 = vpop.f32.mrf.mxu1 }
 0x4f3   :  { %v1251_v6 = vadd.f32 %v5388_v38, %v1250_v29  ;;  %v1271_v8 = vadd.f32 %v5394_v7, %v1270_v33 }
 0x4f5   :  { %v1293_v9 = vadd.f32 %v1251_v6, %v1188_v37  ;;  %v1313_v10 = vadd.f32 %v1271_v8, %v1208_v35 }
 0x4f7   :  { %v4058_v12 = vmul.f32 -1.442695, %v1293_v9  ;;  %v4059_v13 = vmul.f32 -1.442695, %v1313_v10 }
 0x4f9   :  { %4286 = vpow2.f32 %v4058_v12  ;;  %v1290_v18 = vpop.f32.mrf.mxu3 }
 0x4fa   :  { %4288 = vpow2.f32 %v4059_v13  ;;  %v1365_v52 = vpop.f32.mrf.mxu0  ;;  %v1291_v39 = vadd.f32 %v5411_v24, %v1290_v18 }
 0x4fb   :  { %4063 = vmatmul.msk.f32.vlgmr.msra.gmra.mxu1 %vm145_vm1, %v1365_v52  ;;  %4064 = vmatmul.msk.f32.vlgmr.msrb.gmra.mxu3 %vm145_vm1, %v1365_v52 }
 0x4fc   :  { %1486 = vmatpush.msra.mxu1 %v5243_v56  ;;  %1586 = vmatpush.msrb.mxu3 %v5249_v50 }
 0x4fe   :  { %1487 = vmatpush.msra.mxu1 %v5255_v51  ;;  %1587 = vmatpush.msrb.mxu3 %v5261_v58 }
 0x4ff   :  { %v4287_v43 = vpop.eup %4286 }
 0x500   :  { %v4289_v45 = vpop.eup %4288  ;;  %v1297_v47 = vadd.f32 1.0, %v4287_v43  ;;  %1488 = vmatpush.msra.mxu1 %v5267_v61 }
 0x501   :  { %v1317_v11 = vadd.f32 1.0, %v4289_v45 }
 0x502   :  { %4290 = vrcp.f32 %v1297_v47  ;;  %1489 = vmatpush.msra.mxu1 %v5273_v42  ;;  %v1309_v54 = vand.u32 2147483648, %v1297_v47  ;;  %v1307_v15 = vand.u32 2147483647, %v1297_v47  ;;  %vm1303_vm7 = vweird.f32 %v1297_v47 }
 0x503   :  { %4292 = vrcp.f32 %v1317_v11  ;;  %4065 = vmatmul.msk.f32.vlgmr.msrb.gmra.mxu1 %vm145_vm1, %v1365_v52  ;;  %v1329_v59 = vand.u32 2147483648, %v1317_v11  ;;  %vm1323_vm11 = vweird.f32 %v1317_v11  ;;  %v1327_v27 = vand.u32 2147483647, %v1317_v11 }
 0x504   :  { %1606 = vmatpush.msrb.mxu1 %v5280_v62  ;;  %v1310_v20 = vor.u32 1.1754944e-38, %v1309_v54  ;;  %vm1308_vm9 = vcmp.eq.f32.partialorder %v1307_v15, 8.507059e+37 }
 0x505   :  { %v1330_v35 = vor.u32 1.1754944e-38, %v1329_v59  ;;  %vm1328_vm14 = vcmp.eq.f32.partialorder %v1327_v27, 8.507059e+37 }
 0x506   :  { %1607 = vmatpush.msrb.mxu1 %v5286_v25 }
 0x508   :  { %v4291_v30 = vpop.eup %4290 }
 0x509   :  { %v4293_v53 = vpop.eup %4292  ;;  %v1299_v60 = vmul.f32 %v4291_v30, %v1297_v47  ;;  %vm1304_vm6 = vweird.f32 %v4291_v30 }
 0x50a   :  { %v1319_v48 = vmul.f32 %v4293_v53, %v1317_v11  ;;  %vm1305_vm8 = vmor %vm1303_vm7, %vm1304_vm6  ;;  %vm1324_vm10 = vweird.f32 %v4293_v53 }
 0x50b   :  { %v1300_v31 = vsub.f32 1.0, %v1299_v60  ;;  %vm1325_vm13 = vmor %vm1323_vm11, %vm1324_vm10 }
 0x50c   :  { %v1320_v2 = vsub.f32 1.0, %v1319_v48 }
 0x50d   :  { %v1301_v14 = vmul.f32 %v4291_v30, %v1300_v31 }
 0x50e   :  { %v1321_v17 = vmul.f32 %v4293_v53, %v1320_v2 }
 0x50f   :  { %v1302_v19 = vadd.f32 %v4291_v30, %v1301_v14 }
 0x510   :  { %v1322_v46 = vadd.f32 %v4293_v53, %v1321_v17 }
 0x511   :  { %v1306_v22 = vsel %vm1305_vm8, %v4291_v30, %v1302_v19 }
 0x512   :  { %v1311_v40 = vsel %vm1308_vm9, %v1310_v20, %v1306_v22  ;;  %v1326_v33 = vsel %vm1325_vm13, %v4293_v53, %v1322_v46 }
 0x513   :  { %v1333_v26 = vmul.f32 %v1311_v40, %v1291_v39  ;;  %v1331_v37 = vsel %vm1328_vm14, %v1330_v35, %v1326_v33 }
 0x514   :  { %v1336_v6 = vsub.f32 1.0, %v1331_v37  ;;  %v1338_v10 = vmul.f32 %v1331_v37, %v5292_v57  ;;  %v1545_v57 = vpop.permute.xlu1 %1544 }
 0x515   :  { %v1334_v29 = vadd.f32 %v1333_v26, %v1228_v16  ;;  %vm1546_vm15 = vcmp.eq.s32.totalorder %v4748_v28, %v1545_v57 }
 0x517   :  { %4294 = vtanh.f32 %v1334_v29 }
 0x51d   :  { %v4295_v8 = vpop.eup %4294 }
 0x51e   :  { %v1337_v9 = vmul.f32 %v4295_v8, %v1336_v6 }
 0x520   :  { %v5421_v12 = vadd.f32 %v1338_v10, %v1337_v9 }
 0x522   :  { %4066 = vmatmul.msk.f32.vlgmr.msra.gmra.mxu2 %vm218_vm12, %v5421_v12  ;;  %4067 = vmatmul.msk.f32.vlgmr.msra.gmra.mxu3 %vm218_vm12, %v5421_v12 }
 0x523   :  { %4068 = vmatmul.msk.f32.vlgmr.msra.gmra.mxu1 %vm218_vm12, %v5421_v12  ;;  %1626 = vmatpush.msra.mxu3 %v5303_v55 }
 0x524   :  { %1667 = vmatpush.msra.mxu1 %v5309_v3  ;;  %1847 = vmatpush.msra.mxu2 %v5126_v4 }
 0x525   :  { %1627 = vmatpush.msra.mxu3 %v5316_v49 }
 0x526   :  { %1668 = vmatpush.msra.mxu1 %v5322_v41  ;;  %1848 = vmatpush.msra.mxu2 %v5328_v63 }
 0x528   :  { %1669 = vmatpush.msra.mxu1 %v5334_v44  ;;  %1849 = vmatpush.msra.mxu2 %v5340_v5 }
 0x52a   :  { %4073 = vmatmul.msk.f32.vlgmr.msrb.gmra.mxu2 %vm1546_vm15, %v6545_v1  ;;  %1670 = vmatpush.msra.mxu1 %v5348_v32 }
 0x52b   :  { %1850 = vmatpush.msra.mxu2 %v5354_v21 }
 0x578   :  { %v1388_v13 = vpop.f32.mrf.mxu1 }
 0x579   :  { %v1389_v45 = vadd.f32 %v5382_v36, %v1388_v13 }
 0x57e   :  { %v1408_v4 = vpop.f32.mrf.mxu3 }
 0x57f   :  { %v1409_v63 = vadd.f32 %v5376_v34, %v1408_v4 }
 0x580   :  { %v1428_v54 = vpop.f32.mrf.mxu1 }
 0x581   :  { %v1429_v27 = vadd.f32 %v5417_v23, %v1428_v54 }
 0x5a0   :  { %v1491_v22 = vpop.f32.mrf.mxu1 }
 0x5a5   :  { %v1451_v52 = vpop.f32.mrf.mxu2  ;;  %v1471_v43 = vpop.f32.mrf.mxu3 }
 0x5a6   :  { %v1452_v47 = vadd.f32 %v5388_v38, %v1451_v52  ;;  %v1472_v5 = vadd.f32 %v5394_v7, %v1471_v43  ;;  %v1745_v43 = vpop.permute.xlu2 %1744 }
 0x5a7   :  { %vm1746_vm9 = vcmp.eq.s32.totalorder %v4748_v28, %v1745_v43 }
 0x5a8   :  { %v1494_v11 = vadd.f32 %v1452_v47, %v1389_v45  ;;  %v1514_v0 = vadd.f32 %v1472_v5, %v1409_v63 }
 0x5aa   :  { %v4069_v30 = vmul.f32 -1.442695, %v1494_v11  ;;  %v4070_v53 = vmul.f32 -1.442695, %v1514_v0  ;;  %v5506_v0 = vld [vmem:[%s6516_s8 + $0x58] sm:$0xff] }
 0x5ac   :  { %4296 = vpow2.f32 %v4069_v30 }
 0x5ad   :  { %4298 = vpow2.f32 %v4070_v53  ;;  %v1566_v60 = vpop.f32.mrf.mxu2 }
 0x5ae   :  { %4074 = vmatmul.msk.f32.vlgmr.msrb.gmra.mxu3 %vm145_vm1, %v1566_v60  ;;  %4075 = vmatmul.msk.f32.vlgmr.msrb.gmra.mxu1 %vm145_vm1, %v1566_v60 }
 0x5af   :  { %1687 = vmatpush.msrb.mxu3 %v5243_v56  ;;  %1786 = vmatpush.msrb.mxu1 %v5249_v50 }
 0x5b1   :  { %1688 = vmatpush.msrb.mxu3 %v5255_v51  ;;  %1787 = vmatpush.msrb.mxu1 %v5261_v58 }
 0x5b2   :  { %v4297_v21 = vpop.eup %4296 }
 0x5b3   :  { %v4299_v48 = vpop.eup %4298  ;;  %v1498_v31 = vadd.f32 1.0, %v4297_v21  ;;  %1689 = vmatpush.msrb.mxu3 %v5267_v61 }
 0x5b4   :  { %v1518_v2 = vadd.f32 1.0, %v4299_v48 }
 0x5b5   :  { %4300 = vrcp.f32 %v1498_v31  ;;  %1690 = vmatpush.msrb.mxu3 %v5273_v42  ;;  %v1510_v18 = vand.u32 2147483648, %v1498_v31  ;;  %v1508_v39 = vand.u32 2147483647, %v1498_v31  ;;  %vm1504_vm2 = vweird.f32 %v1498_v31 }
 0x5b6   :  { %4302 = vrcp.f32 %v1518_v2  ;;  %4076 = vmatmul.msk.f32.vlgmr.msra.gmra.mxu3 %vm145_vm1, %v1566_v60  ;;  %v1530_v33 = vand.u32 2147483648, %v1518_v2  ;;  %vm1524_vm6 = vweird.f32 %v1518_v2  ;;  %v1528_v35 = vand.u32 2147483647, %v1518_v2  ;;  %v5512_v60 = vld [vmem:[%s6516_s8 + $0x50] sm:$0xff] }
 0x5b7   :  { %1806 = vmatpush.msra.mxu3 %v5280_v62  ;;  %v1511_v16 = vor.u32 1.1754944e-38, %v1510_v18  ;;  %v1492_v62 = vadd.f32 %v5411_v24, %v1491_v22  ;;  %vm1509_vm4 = vcmp.eq.f32.partialorder %v1508_v39, 8.507059e+37  ;;  %v5578_v39 = vld [vmem:[%s6516_s8] sm:$0xff] }
 0x5b8   :  { %v1531_v8 = vor.u32 1.1754944e-38, %v1530_v33  ;;  %vm1529_vm8 = vcmp.eq.f32.partialorder %v1528_v35, 8.507059e+37 }
 0x5b9   :  { %1807 = vmatpush.msra.mxu3 %v5286_v25 }
 0x5bb   :  { %v4301_v50 = vpop.eup %4300 }
 0x5bc   :  { %v4303_v14 = vpop.eup %4302  ;;  %v1500_v58 = vmul.f32 %v4301_v50, %v1498_v31  ;;  %vm1505_vm0 = vweird.f32 %v4301_v50  ;;  %v5518_v31 = vld [vmem:[%s6516_s8 + $0x48] sm:$0xff] }
 0x5bd   :  { %v1520_v15 = vmul.f32 %v4303_v14, %v1518_v2  ;;  %vm1506_vm3 = vmor %vm1504_vm2, %vm1505_vm0  ;;  %vm1525_vm5 = vweird.f32 %v4303_v14  ;;  %v5524_v2 = vld [vmem:[%s6516_s8 + $0x40] sm:$0xff] }
 0x5be   :  { %v1501_v17 = vsub.f32 1.0, %v1500_v58  ;;  %vm1526_vm7 = vmor %vm1524_vm6, %vm1525_vm5  ;;  %v5546_v58 = vld [vmem:[%s6516_s8 + $0x28] sm:$0xff] }
 0x5bf   :  { %v1521_v19 = vsub.f32 1.0, %v1520_v15 }
 0x5c0   :  { %v1502_v20 = vmul.f32 %v4301_v50, %v1501_v17 }
 0x5c1   :  { %v1522_v40 = vmul.f32 %v4303_v14, %v1521_v19  ;;  %v5561_v19 = vld [vmem:[%s6516_s8 + $0x18] sm:$0xff] }
 0x5c2   :  { %v1503_v46 = vadd.f32 %v4301_v50, %v1502_v20 }
 0x5c3   :  { %v1523_v26 = vadd.f32 %v4303_v14, %v1522_v40 }
 0x5c4   :  { %v1507_v59 = vsel %vm1506_vm3, %v4301_v50, %v1503_v46  ;;  %v5532_v50 = vld [vmem:[%s6516_s8 + $0x38] sm:$0xff] }
 0x5c5   :  { %v1512_v25 = vsel %vm1509_vm4, %v1511_v16, %v1507_v59  ;;  %v1527_v6 = vsel %vm1526_vm7, %v4303_v14, %v1523_v26  ;;  %v5539_v14 = vld [vmem:[%s6516_s8 + $0x30] sm:$0xff] }
 0x5c6   :  { %v1534_v29 = vmul.f32 %v1512_v25, %v1492_v62  ;;  %v1532_v9 = vsel %vm1529_vm8, %v1531_v8, %v1527_v6 }
 0x5c7   :  { %v1537_v10 = vsub.f32 1.0, %v1532_v9  ;;  %v1539_v13 = vmul.f32 %v1532_v9, %v5421_v12 }
 0x5c8   :  { %v1535_v37 = vadd.f32 %v1534_v29, %v1429_v27 }
 0x5ca   :  { %4304 = vtanh.f32 %v1535_v37 }
 0x5d0   :  { %v4305_v57 = vpop.eup %4304 }
 0x5d1   :  { %v1538_v4 = vmul.f32 %v4305_v57, %v1537_v10 }
 0x5d3   :  { %v5459_v52 = vadd.f32 %v1539_v13, %v1538_v4 }
 0x5d5   :  { %4077 = vmatmul.msk.f32.vlgmr.msra.gmra.mxu0 %vm218_vm12, %v5459_v52  ;;  %4078 = vmatmul.msk.f32.vlgmr.msra.gmra.mxu1 %vm218_vm12, %v5459_v52 }
 0x5d6   :  { %4079 = vmatmul.msk.f32.vlgmr.msrb.gmra.mxu3 %vm218_vm12, %v5459_v52  ;;  %1826 = vmatpush.msra.mxu1 %v5303_v55  ;;  %v5478_v55 = vld [vmem:[%s6516_s8 + $0x78] sm:$0xff] }
 0x5d7   :  { %1867 = vmatpush.msrb.mxu3 %v5309_v3  ;;  %2002 = vmatpush.msrb.mxu2 %v5478_v55  ;;  %v5484_v3 = vld [vmem:[%s6516_s8 + $0x70] sm:$0xff] }
 0x5d8   :  { %1827 = vmatpush.msra.mxu1 %v5316_v49  ;;  %v5490_v49 = vld [vmem:[%s6516_s8 + $0x68] sm:$0xff] }
 0x5d9   :  { %1868 = vmatpush.msrb.mxu3 %v5322_v41  ;;  %2003 = vmatpush.msrb.mxu2 %v5484_v3 }
 0x5db   :  { %1869 = vmatpush.msrb.mxu3 %v5334_v44  ;;  %2004 = vmatpush.msrb.mxu2 %v5490_v49  ;;  %v5496_v44 = vld [vmem:[%s6516_s8 + $0x60] sm:$0xff] }
 0x5dd   :  { %4083 = vmatmul.msk.f32.vlgmr.msrb.gmra.mxu0 %vm1746_vm9, %v6545_v1  ;;  %1870 = vmatpush.msrb.mxu3 %v5348_v32 }
 0x5de   :  { %2005 = vmatpush.msrb.mxu2 %v5496_v44 }
 0x5e0   :  { %2006 = vmatpush.msrb.mxu2 %v5506_v0 }
 0x5e2   :  { %2007 = vmatpush.msrb.mxu2 %v5512_v60 }
 0x5e4   :  { %2008 = vmatpush.msrb.mxu2 %v5518_v31 }
 0x5e6   :  { %2009 = vmatpush.msrb.mxu2 %v5524_v2 }
 0x5e8   :  { %2010 = vmatpush.msrb.mxu2 %v5532_v50 }
 0x5ea   :  { %2011 = vmatpush.msrb.mxu2 %v5539_v14 }
 0x5ec   :  { %2012 = vmatpush.msrb.mxu2 %v5546_v58 }
 0x62b   :  { %v1609_v12 = vpop.f32.mrf.mxu1 }
 0x62c   :  { %v1610_v63 = vadd.f32 %v5376_v34, %v1609_v12 }
 0x631   :  { %v1589_v41 = vpop.f32.mrf.mxu3 }
 0x632   :  { %v1590_v47 = vadd.f32 %v5382_v36, %v1589_v41 }
 0x639   :  { %v1629_v20 = vpop.f32.mrf.mxu3 }
 0x63a   :  { %v1630_v57 = vadd.f32 %v5417_v23, %v1629_v20 }
 0x652   :  { %v1652_v32 = vpop.f32.mrf.mxu0  ;;  %v1672_v45 = vpop.f32.mrf.mxu1 }
 0x653   :  { %v1653_v5 = vadd.f32 %v5388_v38, %v1652_v32  ;;  %v1673_v11 = vadd.f32 %v5394_v7, %v1672_v45 }
 0x655   :  { %v1695_v30 = vadd.f32 %v1653_v5, %v1590_v47  ;;  %v1715_v53 = vadd.f32 %v1673_v11, %v1610_v63 }
 0x657   :  { %v4080_v21 = vmul.f32 -1.442695, %v1695_v30  ;;  %v4081_v48 = vmul.f32 -1.442695, %v1715_v53  ;;  %v1998_v53 = vpop.permute.xlu0 %1997 }
 0x658   :  { %vm1999_vm4 = vcmp.eq.s32.totalorder %v4748_v28, %v1998_v53 }
 0x659   :  { %4306 = vpow2.f32 %v4080_v21  ;;  %v1692_v33 = vpop.f32.mrf.mxu3  ;;  %v5603_v21 = vld [vmem:[%s6517_s9 + $0x18] sm:$0xff] }
 0x65a   :  { %4308 = vpow2.f32 %v4081_v48  ;;  %v1766_v54 = vpop.f32.mrf.mxu0  ;;  %v1693_v6 = vadd.f32 %v5411_v24, %v1692_v33  ;;  %v5610_v48 = vld [vmem:[%s6517_s9] sm:$0xff]  ;;  %v5680_v33 = vld [vmem:[%s6518_s10 + $0x50] sm:$0xff] }
 0x65b   :  { %4084 = vmatmul.msk.f32.vlgmr.msrb.gmra.mxu1 %vm145_vm1, %v1766_v54  ;;  %4085 = vmatmul.msk.f32.vlgmr.msra.gmra.mxu3 %vm145_vm1, %v1766_v54 }
 0x65c   :  { %1887 = vmatpush.msrb.mxu1 %v5243_v56  ;;  %v5551_v56 = vld [vmem:[%s6516_s8 + $0x20] sm:$0xff] }
 0x65d   :  { %2013 = vmatpush.msrb.mxu2 %v5551_v56 }
 0x65e   :  { %1888 = vmatpush.msrb.mxu1 %v5255_v51 }
 0x65f   :  { %v4307_v15 = vpop.eup %4306  ;;  %2014 = vmatpush.msrb.mxu2 %v5561_v19 }
 0x660   :  { %v4309_v17 = vpop.eup %4308  ;;  %v1699_v18 = vadd.f32 1.0, %v4307_v15  ;;  %1889 = vmatpush.msrb.mxu1 %v5267_v61  ;;  %v5566_v61 = vld [vmem:[%s6516_s8 + $0x10] sm:$0xff]  ;;  %v5622_v15 = vld [vmem:[%s6517_s9 + $0x28] sm:$0xff] }
 0x661   :  { %v1719_v51 = vadd.f32 1.0, %v4309_v17  ;;  %2015 = vmatpush.msrb.mxu2 %v5566_v61  ;;  %6546 = vst [vmem:[#allocation5_spill] sm:$0xff] %v5622_v15  ;;  %v5629_v17 = vld [vmem:[%s6517_s9 + $0x20] sm:$0xff] }
 0x662   :  { %4310 = vrcp.f32 %v1699_v18  ;;  %1890 = vmatpush.msrb.mxu1 %v5273_v42  ;;  %v5572_v42 = vld [vmem:[%s6516_s8 + $0x8] sm:$0xff]  ;;  %v1711_v25 = vand.u32 2147483648, %v1699_v18  ;;  %v1709_v27 = vand.u32 2147483647, %v1699_v18  ;;  %vm1705_vm11 = vweird.f32 %v1699_v18  ;;  %6547 = vst [vmem:[#allocation6_spill] sm:$0xff] %v5629_v17 }
 0x663   :  { %4312 = vrcp.f32 %v1719_v51  ;;  %4086 = vmatmul.msk.f32.vlgmr.msra.gmra.mxu1 %vm145_vm1, %v1766_v54  ;;  %2016 = vmatpush.msrb.mxu2 %v5572_v42  ;;  %v1731_v4 = vand.u32 2147483648, %v1719_v51  ;;  %vm1725_vm0 = vweird.f32 %v1719_v51  ;;  %v1729_v43 = vand.u32 2147483647, %v1719_v51  ;;  %v5615_v54 = vld [vmem:[%s6517_s9 + $0x10] sm:$0xff] }
 0x664   :  { %v1712_v37 = vor.u32 1.1754944e-38, %v1711_v25  ;;  %vm1710_vm14 = vcmp.eq.f32.partialorder %v1709_v27, 8.507059e+37  ;;  %2065 = vmatpush.msra.mxu1 %v5603_v21  ;;  %v5645_v25 = vld [vmem:[%s6518_s10 + $0x38] sm:$0xff]  ;;  %v5667_v27 = vld [vmem:[%s6518_s10 + $0x8] sm:$0xff] }
 0x665   :  { %2017 = vmatpush.msrb.mxu2 %v5578_v39  ;;  %v1732_v32 = vor.u32 1.1754944e-38, %v1731_v4  ;;  %vm1730_vm3 = vcmp.eq.f32.partialorder %v1729_v43, 8.507059e+37 }
 0x666   :  { %2066 = vmatpush.msra.mxu1 %v5615_v54 }
 0x668   :  { %v4311_v22 = vpop.eup %4310 }
 0x669   :  { %v4313_v40 = vpop.eup %4312  ;;  %v1701_v46 = vmul.f32 %v4311_v22, %v1699_v18  ;;  %vm1706_vm10 = vweird.f32 %v4311_v22 }
 0x66a   :  { %v1721_v16 = vmul.f32 %v4313_v40, %v1719_v51  ;;  %vm1707_vm13 = vmor %vm1705_vm11, %vm1706_vm10  ;;  %vm1726_vm15 = vweird.f32 %v4313_v40 }
 0x66b   :  { %v1702_v62 = vsub.f32 1.0, %v1701_v46  ;;  %vm1727_vm2 = vmor %vm1725_vm0, %vm1726_vm15 }
 0x66c   :  { %v1722_v59 = vsub.f32 1.0, %v1721_v16 }
 0x66d   :  { %v1703_v26 = vmul.f32 %v4311_v22, %v1702_v62 }
 0x66e   :  { %v1723_v29 = vmul.f32 %v4313_v40, %v1722_v59  ;;  %v5640_v59 = vld [vmem:[%s6518_s10 + $0x18] sm:$0xff] }
 0x66f   :  { %v1704_v35 = vadd.f32 %v4311_v22, %v1703_v26  ;;  %2112 = vmatpush.msra.mxu0 %v5640_v59 }
 0x670   :  { %v1724_v10 = vadd.f32 %v4313_v40, %v1723_v29  ;;  %v5672_v29 = vld [vmem:[%s6518_s10 + $0x28] sm:$0xff] }
 0x671   :  { %v1708_v8 = vsel %vm1707_vm13, %v4311_v22, %v1704_v35 }
 0x672   :  { %v1713_v9 = vsel %vm1710_vm14, %v1712_v37, %v1708_v8  ;;  %v1728_v41 = vsel %vm1727_vm2, %v4313_v40, %v1724_v10  ;;  %v5690_v8 = vld [vmem:[%s6518_s10 + $0x20] sm:$0xff] }
 0x673   :  { %v1735_v13 = vmul.f32 %v1713_v9, %v1693_v6  ;;  %v1733_v45 = vsel %vm1730_vm3, %v1732_v32, %v1728_v41  ;;  %v5685_v6 = vld [vmem:[%s6518_s10] sm:$0xff]  ;;  %v5698_v9 = vld [vmem:[%s6518_s10 + $0x48] sm:$0xff] }
 0x674   :  { %v1738_v63 = vsub.f32 1.0, %v1733_v45  ;;  %v1740_v11 = vmul.f32 %v1733_v45, %v5459_v52  ;;  %v5598_v52 = vld [vmem:[%s6517_s9 + $0x8] sm:$0xff] }
 0x675   :  { %v1736_v12 = vadd.f32 %v1735_v13, %v1630_v57  ;;  %2042 = vmatpush.msra.mxu3 %v5598_v52  ;;  %v5709_v57 = vld [vmem:[%s6518_s10 + $0x40] sm:$0xff] }
 0x677   :  { %4314 = vtanh.f32 %v1736_v12  ;;  %2043 = vmatpush.msra.mxu3 %v5610_v48 }
 0x67d   :  { %v4315_v47 = vpop.eup %4314 }
 0x67e   :  { %v1739_v5 = vmul.f32 %v4315_v47, %v1738_v63 }
 0x680   :  { %v5585_v30 = vadd.f32 %v1740_v11, %v1739_v5 }
 0x682   :  { %4087 = vmatmul.msk.f32.vlgmr.msra.gmra.mxu2 %vm218_vm12, %v5585_v30  ;;  %4088 = vmatmul.msk.f32.vlgmr.msrb.gmra.mxu3 %vm218_vm12, %v5585_v30 }
 0x683   :  { %4089 = vmatmul.msk.f32.vlgmr.msrb.gmra.mxu1 %vm218_vm12, %v5585_v30  ;;  %2088 = vmatpush.msrb.mxu3 %v5622_v15 }
 0x684   :  { %2350 = vmatpush.msra.mxu2 %v5622_v15  ;;  %2135 = vmatpush.msrb.mxu1 %v5645_v25 }
 0x685   :  { %2089 = vmatpush.msrb.mxu3 %v5629_v17 }
 0x686   :  { %2351 = vmatpush.msra.mxu2 %v5629_v17 }
 0x68a   :  { %4109 = vmatmul.msk.f32.vlgmr.msrb.gmra.mxu2 %vm1999_vm4, %v6545_v1 }
 0x6d8   :  { %v1789_v51 = vpop.f32.mrf.mxu1 }
 0x6d9   :  { %v1790_v40 = vadd.f32 %v5382_v36, %v1789_v51  ;;  %v5657_v36 = vld [vmem:[%s6518_s10 + $0x10] sm:$0xff] }
 0x6da   :  { %2113 = vmatpush.msra.mxu0 %v5657_v36 }
 0x6dc   :  { %2114 = vmatpush.msra.mxu0 %v5667_v27 }
 0x6de   :  { %v1809_v18 = vpop.f32.mrf.mxu3  ;;  %2115 = vmatpush.msra.mxu0 %v5685_v6 }
 0x6df   :  { %v1810_v46 = vadd.f32 %v5376_v34, %v1809_v18  ;;  %v5652_v34 = vld [vmem:[%s6518_s10 + $0x58] sm:$0xff] }
 0x6e0   :  { %2408 = vmatpush.msrb.mxu2 %v5652_v34  ;;  %v1829_v41 = vpop.f32.mrf.mxu1 }
 0x6e2   :  { %2409 = vmatpush.msrb.mxu2 %v5680_v33 }
 0x6e4   :  { %2410 = vmatpush.msrb.mxu2 %v5698_v9 }
 0x6e6   :  { %2411 = vmatpush.msrb.mxu2 %v5709_v57 }
 0x705   :  { %v1852_v20 = vpop.f32.mrf.mxu2  ;;  %v1872_v22 = vpop.f32.mrf.mxu3 }
 0x706   :  { %v1853_v16 = vadd.f32 %v5388_v38, %v1852_v20  ;;  %v1873_v62 = vadd.f32 %v5394_v7, %v1872_v22  ;;  %v5662_v38 = vld [vmem:[%s6518_s10 + $0x30] sm:$0xff]  ;;  %v1892_v20 = vpop.f32.mrf.mxu1 }
 0x707   :  { %2136 = vmatpush.msrb.mxu1 %v5662_v38 }
 0x708   :  { %v1895_v7 = vadd.f32 %v1853_v16, %v1790_v40  ;;  %v1915_v26 = vadd.f32 %v1873_v62, %v1810_v46  ;;  %v1893_v16 = vadd.f32 %v5411_v24, %v1892_v20 }
 0x709   :  { %2137 = vmatpush.msrb.mxu1 %v5672_v29 }
 0x70a   :  { %v4090_v35 = vmul.f32 -1.442695, %v1895_v7  ;;  %v4091_v37 = vmul.f32 -1.442695, %v1915_v26 }
 0x70b   :  { %2138 = vmatpush.msrb.mxu1 %v5690_v8 }
 0x70c   :  { %4316 = vpow2.f32 %v4090_v35  ;;  %v1830_v35 = vadd.f32 %v5417_v23, %v1829_v41 }
 0x70d   :  { %4318 = vpow2.f32 %v4091_v37  ;;  %v2019_v10 = vpop.f32.mrf.mxu2 }
 0x70e   :  { %4110 = vmatmul.msk.f32.vlgmr.msra.gmra.mxu3 %vm145_vm1, %v2019_v10  ;;  %4111 = vmatmul.msk.f32.vlgmr.msra.gmra.mxu1 %vm145_vm1, %v2019_v10 }
 0x70f   :  { %2158 = vmatpush.msra.mxu3 %v5652_v34  ;;  %2273 = vmatpush.msra.mxu1 %v5478_v55 }
 0x711   :  { %2159 = vmatpush.msra.mxu3 %v5680_v33  ;;  %2274 = vmatpush.msra.mxu1 %v5484_v3 }
 0x712   :  { %v4317_v4 = vpop.eup %4316 }
 0x713   :  { %v4319_v13 = vpop.eup %4318  ;;  %v1899_v43 = vadd.f32 1.0, %v4317_v4  ;;  %2160 = vmatpush.msra.mxu3 %v5698_v9  ;;  %2275 = vmatpush.msra.mxu1 %v5490_v49 }
 0x714   :  { %v1919_v12 = vadd.f32 1.0, %v4319_v13 }
 0x715   :  { %4320 = vrcp.f32 %v1899_v43  ;;  %2161 = vmatpush.msra.mxu3 %v5709_v57  ;;  %2276 = vmatpush.msra.mxu1 %v5496_v44  ;;  %v1911_v11 = vand.u32 2147483648, %v1899_v43  ;;  %v1909_v51 = vand.u32 2147483647, %v1899_v43  ;;  %vm1905_vm6 = vweird.f32 %v1899_v43 }
 0x716   :  { %4322 = vrcp.f32 %v1919_v12  ;;  %4112 = vmatmul.msk.f32.vlgmr.msrb.gmra.mxu3 %vm145_vm1, %v2019_v10  ;;  %v1931_v10 = vand.u32 2147483648, %v1919_v12  ;;  %vm1925_vm10 = vweird.f32 %v1919_v12  ;;  %v1929_v4 = vand.u32 2147483647, %v1919_v12 }
 0x717   :  { %2277 = vmatpush.msra.mxu1 %v5506_v0  ;;  %2310 = vmatpush.msrb.mxu3 %v5598_v52  ;;  %v1912_v46 = vor.u32 1.1754944e-38, %v1911_v11  ;;  %vm1910_vm8 = vcmp.eq.f32.partialorder %v1909_v51, 8.507059e+37  ;;  %v5764_v11 = vld [vmem:[%s6520_s12] ss:$0 sm:$0xff] }
 0x718   :  { %v1932_v24 = vor.u32 1.1754944e-38, %v1931_v10  ;;  %vm1930_vm13 = vcmp.eq.f32.partialorder %v1929_v4, 8.507059e+37  ;;  %6550 = vst [vmem:[#allocation9_spill] sm:$0xff] %v5764_v11  ;;  %v5784_v10 = vld [vmem:[%s6521_s13 + $0x10] sm:$0xff]  ;;  %v5790_v4 = vld [vmem:[%s6521_s13 + $0x8] sm:$0xff] }
 0x719   :  { %2278 = vmatpush.msra.mxu1 %v5512_v60  ;;  %2311 = vmatpush.msrb.mxu3 %v5610_v48 }
 0x71b   :  { %v4321_v32 = vpop.eup %4320  ;;  %2279 = vmatpush.msra.mxu1 %v5518_v31 }
 0x71c   :  { %v4323_v45 = vpop.eup %4322  ;;  %v1901_v63 = vmul.f32 %v4321_v32, %v1899_v43  ;;  %vm1906_vm5 = vweird.f32 %v4321_v32 }
 0x71d   :  { %v1921_v47 = vmul.f32 %v4323_v45, %v1919_v12  ;;  %2280 = vmatpush.msra.mxu1 %v5524_v2  ;;  %vm1907_vm7 = vmor %vm1905_vm6, %vm1906_vm5  ;;  %vm1926_vm9 = vweird.f32 %v4323_v45 }
 0x71e   :  { %v1902_v5 = vsub.f32 1.0, %v1901_v63  ;;  %vm1927_vm11 = vmor %vm1925_vm10, %vm1926_vm9 }
 0x71f   :  { %v1922_v53 = vsub.f32 1.0, %v1921_v47  ;;  %2281 = vmatpush.msra.mxu1 %v5532_v50 }
 0x720   :  { %v1903_v18 = vmul.f32 %v4321_v32, %v1902_v5  ;;  %v5759_v5 = vld [vmem:[%s6519_s11] ss:$0 sm:$0xff] }
 0x721   :  { %v1923_v22 = vmul.f32 %v4323_v45, %v1922_v53  ;;  %2282 = vmatpush.msra.mxu1 %v5539_v14  ;;  %6549 = vst [vmem:[#allocation8_spill] sm:$0xff] %v5759_v5  ;;  %v5769_v53 = vld [vmem:[%s6520_s12 + $0x1] ss:$0 sm:$0xff] }
 0x722   :  { %v1904_v40 = vadd.f32 %v4321_v32, %v1903_v18  ;;  %6551 = vst [vmem:[#allocation10_spill] sm:$0xff] %v5769_v53 }
 0x723   :  { %2283 = vmatpush.msra.mxu1 %v5546_v58  ;;  %v1924_v26 = vadd.f32 %v4323_v45, %v1923_v22 }
 0x724   :  { %v1908_v62 = vsel %vm1907_vm7, %v4321_v32, %v1904_v40  ;;  %vm65_vm7 = vcmp.lt.s32.totalorder %v4748_v28, 16 }
 0x725   :  { %v1913_v7 = vsel %vm1910_vm8, %v1912_v46, %v1908_v62  ;;  %2284 = vmatpush.msra.mxu1 %v5551_v56  ;;  %v1928_v43 = vsel %vm1927_vm11, %v4323_v45, %v1924_v26  ;;  %v5754_v45 = vld [vmem:[%s6519_s11 + $0x1] ss:$0 sm:$0xff] }
 0x726   :  { %v1935_v37 = vmul.f32 %v1913_v7, %v1893_v16  ;;  %v1933_v32 = vsel %vm1930_vm13, %v1932_v24, %v1928_v43  ;;  %6548 = vst [vmem:[#allocation7_spill] sm:$0xff] %v5754_v45  ;;  %v5795_v43 = vld [vmem:[%s6521_s13] sm:$0xff] }
 0x727   :  { %2285 = vmatpush.msra.mxu1 %v5561_v19  ;;  %v1938_v23 = vsub.f32 1.0, %v1933_v32  ;;  %v1940_v12 = vmul.f32 %v1933_v32, %v5585_v30 }
 0x728   :  { %v1936_v13 = vadd.f32 %v1935_v37, %v1830_v35  ;;  %v5778_v37 = vld [vmem:[%s6521_s13 + $0x18] sm:$0xff] }
 0x729   :  { %2286 = vmatpush.msra.mxu1 %v5566_v61  ;;  %2231 = vmatpush.msrb.mxu0 %v5778_v37 }
 0x72a   :  { %4324 = vtanh.f32 %v1936_v13 }
 0x72b   :  { %2287 = vmatpush.msra.mxu1 %v5572_v42  ;;  %2232 = vmatpush.msrb.mxu0 %v5784_v10 }
 0x72d   :  { %2288 = vmatpush.msra.mxu1 %v5578_v39  ;;  %2233 = vmatpush.msrb.mxu0 %v5790_v4 }
 0x72f   :  { %2234 = vmatpush.msrb.mxu0 %v5795_v43 }
 0x730   :  { %v4325_v41 = vpop.eup %4324 }
 0x731   :  { %v1939_v63 = vmul.f32 %v4325_v41, %v1938_v23 }
 0x733   :  { %v5737_v47 = vadd.f32 %v1940_v12, %v1939_v63 }
 0x735   :  { %4113 = vmatmul.msk.f32.vlgmr.msra.gmra.mxu0 %vm218_vm12, %v5737_v47  ;;  %4114 = vmatmul.msk.f32.vlgmr.msrb.gmra.mxu1 %vm218_vm12, %v5737_v47 }
 0x736   :  { %4115 = vmatmul.msk.f32.vlgmr.msra.gmra.mxu3 %vm218_vm12, %v5737_v47  ;;  %2598 = vmatpush.msrb.mxu1 %v5622_v15 }
 0x737   :  { %2368 = vmatpush.msra.mxu3 %v5640_v59  ;;  %2330 = vmatpush.msra.mxu0 %v5603_v21 }
 0x738   :  { %2599 = vmatpush.msrb.mxu1 %v5629_v17 }
 0x739   :  { %2369 = vmatpush.msra.mxu3 %v5657_v36  ;;  %2331 = vmatpush.msra.mxu0 %v5615_v54 }
 0x73b   :  { %2370 = vmatpush.msra.mxu3 %v5667_v27 }
 0x73d   :  { %2371 = vmatpush.msra.mxu3 %v5685_v6 }
 0x78b   :  { %v2068_v30 = vpop.f32.mrf.mxu1 }
 0x78c   :  { %v2069_v22 = vadd.f32 %v5754_v45, %v2068_v30 }
 0x791   :  { %v2045_v18 = vpop.f32.mrf.mxu3 }
 0x792   :  { %v2046_v40 = vadd.f32 %v5759_v5, %v2045_v18 }
 0x799   :  { %v2091_v41 = vpop.f32.mrf.mxu3 }
 0x7b2   :  { %v2117_v51 = vpop.f32.mrf.mxu0  ;;  %v2140_v20 = vpop.f32.mrf.mxu1 }
 0x7b3   :  { %v2118_v46 = vadd.f32 %v5764_v11, %v2117_v51  ;;  %v2141_v16 = vadd.f32 %v5769_v53, %v2140_v20 }
 0x7b5   :  { %v2166_v62 = vadd.f32 %v2118_v46, %v2046_v40  ;;  %v2186_v7 = vadd.f32 %v2141_v16, %v2069_v22  ;;  %v5804_v40 = vld [vmem:[%s6520_s12 + $0x2] ss:$0 sm:$0xff] }
 0x7b7   :  { %v4116_v26 = vmul.f32 -1.442695, %v2166_v62  ;;  %v4117_v35 = vmul.f32 -1.442695, %v2186_v7 }
 0x7b9   :  { %4326 = vpow2.f32 %v4116_v26  ;;  %v2163_v7 = vpop.f32.mrf.mxu3  ;;  %v5809_v26 = vld [vmem:[%s6519_s11 + $0x2] ss:$0 sm:$0xff] }
 0x7ba   :  { %4328 = vpow2.f32 %v4117_v35  ;;  %v2092_v11 = vadd.f32 %v5809_v26, %v2091_v41 }
 0x7bf   :  { %v4327_v13 = vpop.eup %4326 }
 0x7c0   :  { %v4329_v24 = vpop.eup %4328  ;;  %v2170_v32 = vadd.f32 1.0, %v4327_v13 }
 0x7c1   :  { %v2190_v23 = vadd.f32 1.0, %v4329_v24  ;;  %v2164_v24 = vadd.f32 %v5804_v40, %v2163_v7 }
 0x7c2   :  { %4330 = vrcp.f32 %v2170_v32  ;;  %v2182_v22 = vand.u32 2147483648, %v2170_v32  ;;  %v2180_v16 = vand.u32 2147483647, %v2170_v32  ;;  %vm2176_vm15 = vweird.f32 %v2170_v32 }
 0x7c3   :  { %4332 = vrcp.f32 %v2190_v23  ;;  %vm2196_vm4 = vweird.f32 %v2190_v23  ;;  %v2200_v53 = vand.u32 2147483647, %v2190_v23 }
 0x7c4   :  { %v2183_v13 = vor.u32 1.1754944e-38, %v2182_v22  ;;  %vm2181_vm2 = vcmp.eq.f32.partialorder %v2180_v16, 8.507059e+37 }
 0x7c5   :  { %vm2201_vm6 = vcmp.eq.f32.partialorder %v2200_v53, 8.507059e+37 }
 0x7c8   :  { %v4331_v63 = vpop.eup %4330 }
 0x7c9   :  { %v4333_v12 = vpop.eup %4332  ;;  %v2172_v30 = vmul.f32 %v4331_v63, %v2170_v32  ;;  %vm2177_vm14 = vweird.f32 %v4331_v63 }
 0x7ca   :  { %v2192_v18 = vmul.f32 %v4333_v12, %v2190_v23  ;;  %vm2178_vm0 = vmor %vm2176_vm15, %vm2177_vm14  ;;  %vm2197_vm3 = vweird.f32 %v4333_v12 }
 0x7cb   :  { %v2173_v51 = vsub.f32 1.0, %v2172_v30  ;;  %vm2198_vm5 = vmor %vm2196_vm4, %vm2197_vm3 }
 0x7cc   :  { %v2193_v20 = vsub.f32 1.0, %v2192_v18 }
 0x7cd   :  { %v2174_v46 = vmul.f32 %v4331_v63, %v2173_v51 }
 0x7ce   :  { %v2194_v62 = vmul.f32 %v4333_v12, %v2193_v20  ;;  %v2202_v20 = vand.u32 2147483648, %v2190_v23 }
 0x7cf   :  { %v2175_v35 = vadd.f32 %v4331_v63, %v2174_v46 }
 0x7d0   :  { %v2195_v51 = vadd.f32 %v4333_v12, %v2194_v62  ;;  %v2203_v46 = vor.u32 1.1754944e-38, %v2202_v20 }
 0x7d1   :  { %v2179_v30 = vsel %vm2178_vm0, %v4331_v63, %v2175_v35 }
 0x7d2   :  { %v2184_v18 = vsel %vm2181_vm2, %v2183_v13, %v2179_v30  ;;  %v2199_v17 = vsel %vm2198_vm5, %v4333_v12, %v2195_v51 }
 0x7d3   :  { %v2206_v5 = vmul.f32 %v2184_v18, %v2164_v24  ;;  %v2204_v32 = vsel %vm2201_vm6, %v2203_v46, %v2199_v17  ;;  %v5825_v17 = vld [vmem:[%s6522_s14] ss:$0 sm:$0xff]  ;;  %v2264_v18 = vstv %s2263_s18  ;;  %s4188_s18 = sld [smem:[#allocation2 + $0x5]] }
 0x7d4   :  { %v2209_v22 = vsub.f32 1.0, %v2204_v32  ;;  %v2211_v16 = vmul.f32 %v2204_v32, %v5737_v47  ;;  %v4119_v32 = vld [vmem:[%s6510_s2 + $0x8] sm:$0xff]  ;;  %vm2265_vm10 = vcmp.eq.s32.totalorder %v2264_v18, 1 }
 0x7d5   :  { %v2207_v45 = vadd.f32 %v2206_v5, %v2092_v11 }
 0x7d7   :  { %4334 = vtanh.f32 %v2207_v45 }
 0x7d9   :  { %p3500_p5 = scmp.gt.s32.totalorder %s4188_s18, 0 }
 0x7dd   :  { %v4335_v7 = vpop.eup %4334 }
 0x7de   :  { %v2210_v63 = vmul.f32 %v4335_v7, %v2209_v22 }
 0x7e0   :  { %v5814_v35 = vadd.f32 %v2211_v16, %v2210_v63 }
 0x7e2   :  { %4118 = vmatmul.msk.f32.vlgmr.msrb.gmra.mxu0 %vm218_vm12, %v5814_v35 }
 0x7e3   :  { %2388 = vmatpush.msrb.mxu0 %v5645_v25 }
 0x7e5   :  { %2389 = vmatpush.msrb.mxu0 %v5662_v38 }
 0x7e7   :  { %2390 = vmatpush.msrb.mxu0 %v5672_v29 }
 0x7e9   :  { %2391 = vmatpush.msrb.mxu0 %v5690_v8 }
 0x85f   :  { %v2236_v45 = vpop.f32.mrf.mxu0 }
 0x860   :  { %v2237_v47 = vadd.f32 %v5825_v17, %v2236_v45  ;;  %v6552_v45 = vld [vmem:[#allocation6_spill] sm:$0xff] }
 0x862   :  { %2239 = vst [vmem:[%s6523_s15] sm:$0xff] %v2237_v47  ;;  %v2240_v5 = vsel %vm65_vm7, %v2237_v47, -inf }
 0x863   :  { %2241 = vmax.xlane.f32.xlu1 %v2240_v5 }
 0x8d6   :  { %v2242_v11 = vpop.xlane.xlu1 %2241 }
 0x8d7   :  { %vm2243_vm8 = vcmp.eq.f32.partialorder %v2240_v5, %v2242_v11 }
 0x8d8   :  { %v2244_v53 = vsel %vm2243_vm8, %v4748_v28, 128 }
 0x8d9   :  { %v2246_v23 = vshra.s32 %v2244_v53, 16  ;;  %v2245_v12 = vand.u32 65535, %v2244_v53  ;;  %v6553_v53 = vld [vmem:[#allocation7_spill] sm:$0xff] }
 0x8db   :  { %v2248_v41 = vcvt.s32.f32 %v2246_v23  ;;  %v2247_v13 = vcvt.s32.f32 %v2245_v12 }
 0x8dd   :  { %2249 = vmin.xlane.f32.xlu2 %v2248_v41 }
 0x950   :  { %v2250_v62 = vpop.xlane.xlu2 %2249 }
 0x951   :  { %vm2251_vm9 = vcmp.eq.f32.partialorder %v2248_v41, %v2250_v62  ;;  %v2256_v30 = vcvt.f32.s32 %v2250_v62  ;;  %v6554_v41 = vld [vmem:[#allocation10_spill] sm:$0xff] }
 0x952   :  { %v2252_v24 = vsel %vm2251_vm9, %v2247_v13, inf }
 0x953   :  { %2253 = vmin.xlane.f32.xlu0 %v2252_v24  ;;  %v2257_v20 = vshll.u32 %v2256_v30, 16  ;;  %v6555_v30 = vld [vmem:[#allocation8_spill] sm:$0xff] }
 0x9c6   :  { %v2254_v51 = vpop.xlane.xlu0 %2253 }
 0x9c7   :  { %v2255_v46 = vcvt.f32.s32 %v2254_v51  ;;  %v6556_v51 = vld [vmem:[#allocation9_spill] sm:$0xff] }
 0x9c9   :  { %v2258_v22 = vadd.s32 %v2257_v20, %v2255_v46 }
 0x9cb   :  { %v2266_v7 = vsel %vm2265_vm10, %v4119_v32, %v2258_v22 }
 0x9cc   :  { %2268 = vperm.xlu2 %4222, %v2266_v7  }
 0xa26   :  { %v2269_v63 = vpop.permute.xlu2 %2268 }
 0xa27   :  { %vm2270_vm11 = vcmp.eq.s32.totalorder %v4748_v28, %v2269_v63 }
 0xa28   :  { %4121 = vmatmul.msk.f32.vlgmr.msra.gmra.mxu1 %vm2270_vm11, %v6545_v1 }
 0xa29   :  { %2656 = vmatpush.msra.mxu1 %v5652_v34 }
 0xa2b   :  { %2657 = vmatpush.msra.mxu1 %v5680_v33 }
 0xa2d   :  { %2658 = vmatpush.msra.mxu1 %v5698_v9 }
 0xa2f   :  { %2659 = vmatpush.msra.mxu1 %v5709_v57 }
 0xaa5   :  { %v2290_v16 = vpop.f32.mrf.mxu1 }
 0xaa6   :  { %4122 = vmatmul.msk.f32.vlgmr.msrb.gmra.mxu3 %vm145_vm1, %v2290_v16  ;;  %4123 = vmatmul.msk.f32.vlgmr.msra.gmra.mxu0 %vm145_vm1, %v2290_v16 }
 0xaa7   :  { %4124 = vmatmul.msk.f32.vlgmr.msra.gmra.mxu2 %vm145_vm1, %v2290_v16  ;;  %2478 = vmatpush.msrb.mxu3 %v5778_v37 }
 0xaa8   :  { %2521 = vmatpush.msra.mxu0 %v5478_v55  ;;  %2558 = vmatpush.msra.mxu2 %v5598_v52 }
 0xaa9   :  { %2479 = vmatpush.msrb.mxu3 %v5784_v10 }
 0xaaa   :  { %2522 = vmatpush.msra.mxu0 %v5484_v3  ;;  %2559 = vmatpush.msra.mxu2 %v5610_v48 }
 0xaab   :  { %2480 = vmatpush.msrb.mxu3 %v5790_v4 }
 0xaac   :  { %2523 = vmatpush.msra.mxu0 %v5490_v49 }
 0xaad   :  { %2481 = vmatpush.msrb.mxu3 %v5795_v43 }
 0xaae   :  { %4125 = vmatmul.msk.f32.vlgmr.msra.gmra.mxu3 %vm218_vm12, %v5814_v35  ;;  %4126 = vmatmul.msk.f32.vlgmr.msrb.gmra.mxu0 %vm218_vm12, %v5814_v35 }
 0xaaf   :  { %4127 = vmatmul.msk.f32.vlgmr.msrb.gmra.mxu2 %vm218_vm12, %v5814_v35  ;;  %2524 = vmatpush.msra.mxu0 %v5496_v44 }
 0xab0   :  { %2578 = vmatpush.msra.mxu3 %v5603_v21  ;;  %2616 = vmatpush.msrb.mxu2 %v5640_v59 }
 0xab1   :  { %2525 = vmatpush.msra.mxu0 %v5506_v0 }
 0xab2   :  { %2579 = vmatpush.msra.mxu3 %v5615_v54  ;;  %2617 = vmatpush.msrb.mxu2 %v5657_v36 }
 0xab3   :  { %2526 = vmatpush.msra.mxu0 %v5512_v60 }
 0xab4   :  { %2618 = vmatpush.msrb.mxu2 %v5667_v27 }
 0xab5   :  { %2527 = vmatpush.msra.mxu0 %v5518_v31 }
 0xab6   :  { %2619 = vmatpush.msrb.mxu2 %v5685_v6 }
 0xab7   :  { %2528 = vmatpush.msra.mxu0 %v5524_v2 }
 0xab9   :  { %2529 = vmatpush.msra.mxu0 %v5532_v50 }
 0xabb   :  { %2530 = vmatpush.msra.mxu0 %v5539_v14 }
 0xabd   :  { %2531 = vmatpush.msra.mxu0 %v5546_v58 }
 0xabf   :  { %2532 = vmatpush.msra.mxu0 %v5551_v56 }
 0xac1   :  { %2533 = vmatpush.msra.mxu0 %v5561_v19 }
 0xac3   :  { %2534 = vmatpush.msra.mxu0 %v5566_v61 }
 0xac5   :  { %2535 = vmatpush.msra.mxu0 %v5572_v42 }
 0xac7   :  { %2536 = vmatpush.msra.mxu0 %v5578_v39 }
 0xac9   :  { %2846 = vmatpush.msrb.mxu0 %v5622_v15 }
 0xacb   :  { %2847 = vmatpush.msrb.mxu0 %v6552_v45 }
 0xb23   :  { %v2333_v47 = vpop.f32.mrf.mxu0 }
 0xb24   :  { %v2334_v23 = vadd.f32 %v6553_v53, %v2333_v47 }
 0xb29   :  { %v2313_v5 = vpop.f32.mrf.mxu3 }
 0xb2a   :  { %v2314_v18 = vadd.f32 %v6555_v30, %v2313_v5  ;;  %v2353_v53 = vpop.f32.mrf.mxu2 }
 0xb2b   :  { %v2393_v11 = vpop.f32.mrf.mxu0 }
 0xb2c   :  { %v2394_v12 = vadd.f32 %v6554_v41, %v2393_v11 }
 0xb2e   :  { %v2436_v62 = vadd.f32 %v2394_v12, %v2334_v23 }
 0xb30   :  { %v4129_v13 = vmul.f32 -1.442695, %v2436_v62 }
 0xb31   :  { %v2373_v24 = vpop.f32.mrf.mxu3 }
 0xb32   :  { %4336 = vpow2.f32 %v4129_v13  ;;  %v2374_v20 = vadd.f32 %v6556_v51, %v2373_v24 }
 0xb34   :  { %v2416_v46 = vadd.f32 %v2374_v20, %v2314_v18  ;;  %v2413_v20 = vpop.f32.mrf.mxu2 }
 0xb36   :  { %v4128_v32 = vmul.f32 -1.442695, %v2416_v46 }
 0xb38   :  { %v4337_v22 = vpop.eup %4336  ;;  %4338 = vpow2.f32 %v4128_v32 }
 0xb39   :  { %v2440_v7 = vadd.f32 1.0, %v4337_v22  ;;  %v2414_v22 = vadd.f32 %v5804_v40, %v2413_v20 }
 0xb3b   :  { %4340 = vrcp.f32 %v2440_v7  ;;  %vm2446_vm3 = vweird.f32 %v2440_v7 }
 0xb3e   :  { %v4339_v63 = vpop.eup %4338 }
 0xb3f   :  { %v2420_v16 = vadd.f32 1.0, %v4339_v63 }
 0xb41   :  { %4342 = vrcp.f32 %v2420_v16  ;;  %v4341_v47 = vpop.eup %4340  ;;  %v2432_v5 = vand.u32 2147483648, %v2420_v16  ;;  %v2430_v24 = vand.u32 2147483647, %v2420_v16  ;;  %vm2426_vm14 = vweird.f32 %v2420_v16 }
 0xb42   :  { %v2442_v11 = vmul.f32 %v4341_v47, %v2440_v7  ;;  %vm2447_vm2 = vweird.f32 %v4341_v47 }
 0xb43   :  { %v2433_v32 = vor.u32 1.1754944e-38, %v2432_v5  ;;  %vm2431_vm0 = vcmp.eq.f32.partialorder %v2430_v24, 8.507059e+37  ;;  %vm2448_vm4 = vmor %vm2446_vm3, %vm2447_vm2 }
 0xb44   :  { %v2443_v62 = vsub.f32 1.0, %v2442_v11  ;;  %v2354_v11 = vadd.f32 %v5809_v26, %v2353_v53 }
 0xb46   :  { %v2444_v18 = vmul.f32 %v4341_v47, %v2443_v62 }
 0xb47   :  { %v4343_v23 = vpop.eup %4342 }
 0xb48   :  { %v2422_v12 = vmul.f32 %v4343_v23, %v2420_v16  ;;  %vm2427_vm13 = vweird.f32 %v4343_v23  ;;  %v2445_v30 = vadd.f32 %v4341_v47, %v2444_v18 }
 0xb49   :  { %vm2428_vm15 = vmor %vm2426_vm14, %vm2427_vm13 }
 0xb4a   :  { %v2423_v41 = vsub.f32 1.0, %v2422_v12  ;;  %v2452_v12 = vand.u32 2147483648, %v2440_v7  ;;  %v2449_v15 = vsel %vm2448_vm4, %v4341_v47, %v2445_v30 }
 0xb4c   :  { %v2424_v13 = vmul.f32 %v4343_v23, %v2423_v41  ;;  %v2450_v41 = vand.u32 2147483647, %v2440_v7 }
 0xb4e   :  { %v2425_v46 = vadd.f32 %v4343_v23, %v2424_v13  ;;  %v2453_v13 = vor.u32 1.1754944e-38, %v2452_v12  ;;  %vm2451_vm5 = vcmp.eq.f32.partialorder %v2450_v41, 8.507059e+37 }
 0xb50   :  { %v2429_v63 = vsel %vm2428_vm15, %v4343_v23, %v2425_v46  ;;  %v2454_v16 = vsel %vm2451_vm5, %v2453_v13, %v2449_v15  ;;  %v4133_v13 = vld [vmem:[%s6510_s2 + $0x10] sm:$0xff] }
 0xb51   :  { %v2434_v51 = vsel %vm2431_vm0, %v2433_v32, %v2429_v63  ;;  %v2459_v5 = vsub.f32 1.0, %v2454_v16  ;;  %v2461_v24 = vmul.f32 %v2454_v16, %v5814_v35 }
 0xb52   :  { %v2456_v45 = vmul.f32 %v2434_v51, %v2414_v22 }
 0xb54   :  { %v2457_v62 = vadd.f32 %v2456_v45, %v2354_v11  ;;  %v2512_v11 = vstv %s2511_s23 }
 0xb55   :  { %vm2513_vm9 = vcmp.eq.s32.totalorder %v2512_v11, 1 }
 0xb56   :  { %4344 = vtanh.f32 %v2457_v62 }
 0xb5c   :  { %v4345_v20 = vpop.eup %4344 }
 0xb5d   :  { %v2460_v23 = vmul.f32 %v4345_v20, %v2459_v5 }
 0xb5f   :  { %v5890_v46 = vadd.f32 %v2461_v24, %v2460_v23 }
 0xb61   :  { %4130 = vmatmul.msk.f32.vlgmr.msrb.gmra.mxu3 %vm218_vm12, %v5890_v46 }
 0xb62   :  { %2636 = vmatpush.msrb.mxu3 %v5645_v25 }
 0xb64   :  { %2637 = vmatpush.msrb.mxu3 %v5662_v38 }
 0xb66   :  { %2638 = vmatpush.msrb.mxu3 %v5672_v29 }
 0xb68   :  { %2639 = vmatpush.msrb.mxu3 %v5690_v8 }
 0xbe4   :  { %v2483_v45 = vpop.f32.mrf.mxu3 }
 0xbe5   :  { %v2484_v15 = vadd.f32 %v5825_v17, %v2483_v45 }
 0xbe7   :  { %4131 = vst [vmem:[%s6523_s15 + $0x8] sm:$0xff] %v2484_v15  ;;  %v2488_v35 = vsel %vm65_vm7, %v2484_v15, -inf }
 0xbe8   :  { %2489 = vmax.xlane.f32.xlu1 %v2488_v35 }
 0xc5b   :  { %v2490_v53 = vpop.xlane.xlu1 %2489 }
 0xc5c   :  { %vm2491_vm6 = vcmp.eq.f32.partialorder %v2488_v35, %v2490_v53 }
 0xc5d   :  { %v2492_v30 = vsel %vm2491_vm6, %v4748_v28, 128 }
 0xc5e   :  { %v2494_v51 = vshra.s32 %v2492_v30, 16  ;;  %v2493_v47 = vand.u32 65535, %v2492_v30 }
 0xc60   :  { %v2496_v7 = vcvt.s32.f32 %v2494_v51  ;;  %v2495_v32 = vcvt.s32.f32 %v2493_v47 }
 0xc62   :  { %2497 = vmin.xlane.f32.xlu0 %v2496_v7 }
 0xcd5   :  { %v2498_v18 = vpop.xlane.xlu0 %2497 }
 0xcd6   :  { %vm2499_vm8 = vcmp.eq.f32.partialorder %v2496_v7, %v2498_v18  ;;  %v2504_v63 = vcvt.f32.s32 %v2498_v18 }
 0xcd7   :  { %v2500_v22 = vsel %vm2499_vm8, %v2495_v32, inf }
 0xcd8   :  { %2501 = vmin.xlane.f32.xlu1 %v2500_v22  ;;  %v2505_v41 = vshll.u32 %v2504_v63, 16 }
 0xd4b   :  { %v2502_v12 = vpop.xlane.xlu1 %2501 }
 0xd4c   :  { %v2503_v62 = vcvt.f32.s32 %v2502_v12 }
 0xd4e   :  { %v2506_v16 = vadd.s32 %v2505_v41, %v2503_v62 }
 0xd50   :  { %v2514_v5 = vsel %vm2513_vm9, %v4133_v13, %v2506_v16 }
 0xd51   :  { %2516 = vperm.xlu0 %4220, %v2514_v5  }
 0xdc3   :  { %v2517_v20 = vpop.permute.xlu0 %2516 }
 0xdc4   :  { %vm2518_vm10 = vcmp.eq.s32.totalorder %v4748_v28, %v2517_v20 }
 0xdc5   :  { %4135 = vmatmul.msk.f32.vlgmr.msra.gmra.mxu0 %vm2518_vm10, %v6545_v1 }
 0xdc6   :  { %2904 = vmatpush.msra.mxu0 %v5652_v34 }
 0xdc8   :  { %2905 = vmatpush.msra.mxu0 %v5680_v33 }
 0xdca   :  { %2906 = vmatpush.msra.mxu0 %v5698_v9 }
 0xdcc   :  { %2907 = vmatpush.msra.mxu0 %v5709_v57 }
 0xe42   :  { %v2538_v23 = vpop.f32.mrf.mxu0 }
 0xe43   :  { %4136 = vmatmul.msk.f32.vlgmr.msra.gmra.mxu2 %vm145_vm1, %v2538_v23  ;;  %4137 = vmatmul.msk.f32.vlgmr.msra.gmra.mxu3 %vm145_vm1, %v2538_v23 }
 0xe44   :  { %4138 = vmatmul.msk.f32.vlgmr.msrb.gmra.mxu1 %vm145_vm1, %v2538_v23  ;;  %2726 = vmatpush.msra.mxu2 %v5778_v37 }
 0xe45   :  { %2769 = vmatpush.msra.mxu3 %v5478_v55  ;;  %2806 = vmatpush.msrb.mxu1 %v5598_v52  ;;  %v6557_v55 = vld [vmem:[#allocation5_spill] sm:$0xff] }
 0xe46   :  { %2727 = vmatpush.msra.mxu2 %v5784_v10 }
 0xe47   :  { %2770 = vmatpush.msra.mxu3 %v5484_v3  ;;  %2807 = vmatpush.msrb.mxu1 %v5610_v48  ;;  %v6558_v3 = vld [vmem:[#allocation6_spill] sm:$0xff] }
 0xe48   :  { %2728 = vmatpush.msra.mxu2 %v5790_v4 }
 0xe49   :  { %2771 = vmatpush.msra.mxu3 %v5490_v49 }
 0xe4a   :  { %2729 = vmatpush.msra.mxu2 %v5795_v43 }
 0xe4b   :  { %4139 = vmatmul.msk.f32.vlgmr.msrb.gmra.mxu2 %vm218_vm12, %v5890_v46  ;;  %4140 = vmatmul.msk.f32.vlgmr.msrb.gmra.mxu3 %vm218_vm12, %v5890_v46 }
 0xe4c   :  { %4141 = vmatmul.msk.f32.vlgmr.msra.gmra.mxu1 %vm218_vm12, %v5890_v46  ;;  %2772 = vmatpush.msra.mxu3 %v5496_v44 }
 0xe4d   :  { %2826 = vmatpush.msrb.mxu2 %v5603_v21  ;;  %2864 = vmatpush.msra.mxu1 %v5640_v59 }
 0xe4e   :  { %2773 = vmatpush.msra.mxu3 %v5506_v0 }
 0xe4f   :  { %2827 = vmatpush.msrb.mxu2 %v5615_v54  ;;  %2865 = vmatpush.msra.mxu1 %v5657_v36 }
 0xe50   :  { %2774 = vmatpush.msra.mxu3 %v5512_v60 }
 0xe51   :  { %2866 = vmatpush.msra.mxu1 %v5667_v27 }
 0xe52   :  { %2775 = vmatpush.msra.mxu3 %v5518_v31  ;;  %v6559_v31 = vld [vmem:[#allocation8_spill] sm:$0xff] }
 0xe53   :  { %2867 = vmatpush.msra.mxu1 %v5685_v6 }
 0xe54   :  { %2776 = vmatpush.msra.mxu3 %v5524_v2 }
 0xe56   :  { %2777 = vmatpush.msra.mxu3 %v5532_v50  ;;  %v6560_v50 = vld [vmem:[#allocation7_spill] sm:$0xff] }
 0xe58   :  { %2778 = vmatpush.msra.mxu3 %v5539_v14 }
 0xe5a   :  { %2779 = vmatpush.msra.mxu3 %v5546_v58  ;;  %v6561_v58 = vld [vmem:[#allocation9_spill] sm:$0xff] }
 0xe5c   :  { %2780 = vmatpush.msra.mxu3 %v5551_v56 }
 0xe5e   :  { %2781 = vmatpush.msra.mxu3 %v5561_v19  ;;  %v6562_v19 = vld [vmem:[#allocation10_spill] sm:$0xff] }
 0xe60   :  { %2782 = vmatpush.msra.mxu3 %v5566_v61 }
 0xe62   :  { %2783 = vmatpush.msra.mxu3 %v5572_v42 }
 0xe64   :  { %2784 = vmatpush.msra.mxu3 %v5578_v39 }
 0xe66   :  { %3094 = vmatpush.msrb.mxu3 %v6557_v55 }
 0xe68   :  { %3095 = vmatpush.msrb.mxu3 %v6558_v3 }
 0xec1   :  { %v2601_v27 = vpop.f32.mrf.mxu1 }
 0xec2   :  { %v2602_v62 = vadd.f32 %v5809_v26, %v2601_v27  ;;  %v4147_v27 = vld [vmem:[%s6510_s2 + $0x18] sm:$0xff] }
 0xec6   :  { %v2561_v49 = vpop.f32.mrf.mxu2  ;;  %v2581_v44 = vpop.f32.mrf.mxu3 }
 0xec7   :  { %v2562_v2 = vadd.f32 %v6559_v31, %v2561_v49  ;;  %v2582_v14 = vadd.f32 %v6560_v50, %v2581_v44 }
 0xec9   :  { %v2661_v47 = vpop.f32.mrf.mxu1 }
 0xeca   :  { %v2662_v63 = vadd.f32 %v5804_v40, %v2661_v47  ;;  %v6078_v47 = vld [vmem:[%s6516_s8 + $0x48] sm:$0xff] }
 0xece   :  { %v2621_v0 = vpop.f32.mrf.mxu2  ;;  %v2641_v60 = vpop.f32.mrf.mxu3 }
 0xecf   :  { %v2622_v56 = vadd.f32 %v6561_v58, %v2621_v0  ;;  %v2642_v61 = vadd.f32 %v6562_v19, %v2641_v60 }
 0xed1   :  { %v2664_v52 = vadd.f32 %v2622_v56, %v2562_v2  ;;  %v2684_v42 = vadd.f32 %v2642_v61, %v2582_v14 }
 0xed3   :  { %v4142_v21 = vmul.f32 -1.442695, %v2664_v52  ;;  %v4143_v39 = vmul.f32 -1.442695, %v2684_v42 }
 0xed5   :  { %4346 = vpow2.f32 %v4142_v21 }
 0xed6   :  { %4348 = vpow2.f32 %v4143_v39 }
 0xedb   :  { %v4347_v48 = vpop.eup %4346 }
 0xedc   :  { %v4349_v54 = vpop.eup %4348  ;;  %v2668_v59 = vadd.f32 1.0, %v4347_v48  ;;  %v2760_v48 = vstv %s2759_s27 }
 0xedd   :  { %v2688_v36 = vadd.f32 1.0, %v4349_v54  ;;  %vm2761_vm8 = vcmp.eq.s32.totalorder %v2760_v48, 1 }
 0xede   :  { %4350 = vrcp.f32 %v2668_v59  ;;  %v2680_v53 = vand.u32 2147483648, %v2668_v59  ;;  %v2678_v7 = vand.u32 2147483647, %v2668_v59  ;;  %vm2674_vm13 = vweird.f32 %v2668_v59 }
 0xedf   :  { %4352 = vrcp.f32 %v2688_v36  ;;  %v2700_v16 = vand.u32 2147483648, %v2688_v36  ;;  %vm2694_vm2 = vweird.f32 %v2688_v36  ;;  %v2698_v5 = vand.u32 2147483647, %v2688_v36 }
 0xee0   :  { %v2681_v22 = vor.u32 1.1754944e-38, %v2680_v53  ;;  %vm2679_vm15 = vcmp.eq.f32.partialorder %v2678_v7, 8.507059e+37  ;;  %v6054_v53 = vld [vmem:[%s6517_s9 + $0x10] sm:$0xff]  ;;  %v6072_v7 = vld [vmem:[%s6518_s10 + $0x8] sm:$0xff] }
 0xee1   :  { %v2701_v55 = vor.u32 1.1754944e-38, %v2700_v16  ;;  %vm2699_vm4 = vcmp.eq.f32.partialorder %v2698_v5, 8.507059e+37  ;;  %v6138_v16 = vld [vmem:[%s6516_s8] sm:$0xff]  ;;  %v6144_v5 = vld [vmem:[%s6517_s9 + $0x28] sm:$0xff] }
 0xee4   :  { %v4351_v6 = vpop.eup %4350 }
 0xee5   :  { %v4353_v24 = vpop.eup %4352  ;;  %v2670_v45 = vmul.f32 %v4351_v6, %v2668_v59  ;;  %vm2675_vm11 = vweird.f32 %v4351_v6 }
 0xee6   :  { %v2690_v15 = vmul.f32 %v4353_v24, %v2688_v36  ;;  %vm2676_vm14 = vmor %vm2674_vm13, %vm2675_vm11  ;;  %vm2695_vm0 = vweird.f32 %v4353_v24 }
 0xee7   :  { %v2671_v35 = vsub.f32 1.0, %v2670_v45  ;;  %vm2696_vm3 = vmor %vm2694_vm2, %vm2695_vm0 }
 0xee8   :  { %v2691_v30 = vsub.f32 1.0, %v2690_v15 }
 0xee9   :  { %v2672_v51 = vmul.f32 %v4351_v6, %v2671_v35  ;;  %v5991_v35 = vld [vmem:[%s6516_s8 + $0x78] sm:$0xff] }
 0xeea   :  { %v2692_v18 = vmul.f32 %v4353_v24, %v2691_v30  ;;  %v6060_v30 = vld [vmem:[%s6518_s10 + $0x10] sm:$0xff] }
 0xeeb   :  { %v2673_v32 = vadd.f32 %v4351_v6, %v2672_v51  ;;  %v6066_v51 = vld [vmem:[%s6516_s8 + $0x50] sm:$0xff] }
 0xeec   :  { %v2693_v41 = vadd.f32 %v4353_v24, %v2692_v18  ;;  %v6084_v18 = vld [vmem:[%s6518_s10] sm:$0xff] }
 0xeed   :  { %v2677_v11 = vsel %vm2676_vm14, %v4351_v6, %v2673_v32  ;;  %v6090_v32 = vld [vmem:[%s6516_s8 + $0x40] sm:$0xff] }
 0xeee   :  { %v2682_v12 = vsel %vm2679_vm15, %v2681_v22, %v2677_v11  ;;  %v2697_v23 = vsel %vm2696_vm3, %v4353_v24, %v2693_v41  ;;  %v6096_v22 = vld [vmem:[%s6516_s8 + $0x38] sm:$0xff]  ;;  %v6108_v11 = vld [vmem:[%s6516_s8 + $0x28] sm:$0xff] }
 0xeef   :  { %v2704_v13 = vmul.f32 %v2682_v12, %v2662_v63  ;;  %v2702_v3 = vsel %vm2699_vm4, %v2701_v55, %v2697_v23  ;;  %v6102_v63 = vld [vmem:[%s6516_s8 + $0x30] sm:$0xff]  ;;  %v6114_v12 = vld [vmem:[%s6516_s8 + $0x20] sm:$0xff]  ;;  %v6120_v41 = vld [vmem:[%s6516_s8 + $0x18] sm:$0xff] }
 0xef0   :  { %v2707_v49 = vsub.f32 1.0, %v2702_v3  ;;  %v2709_v60 = vmul.f32 %v2702_v3, %v5890_v46 }
 0xef1   :  { %v2705_v20 = vadd.f32 %v2704_v13, %v2602_v62  ;;  %v6126_v62 = vld [vmem:[%s6516_s8 + $0x10] sm:$0xff]  ;;  %v6132_v13 = vld [vmem:[%s6516_s8 + $0x8] sm:$0xff] }
 0xef3   :  { %4354 = vtanh.f32 %v2705_v20  ;;  %v6150_v20 = vld [vmem:[%s6517_s9 + $0x20] sm:$0xff] }
 0xef9   :  { %v4355_v44 = vpop.eup %4354 }
 0xefa   :  { %v2708_v0 = vmul.f32 %v4355_v44, %v2707_v49 }
 0xefc   :  { %v5960_v2 = vadd.f32 %v2709_v60, %v2708_v0 }
 0xefe   :  { %4144 = vmatmul.msk.f32.vlgmr.msra.gmra.mxu2 %vm218_vm12, %v5960_v2 }
 0xeff   :  { %2884 = vmatpush.msra.mxu2 %v5645_v25 }
 0xf01   :  { %2885 = vmatpush.msra.mxu2 %v5662_v38 }
 0xf03   :  { %2886 = vmatpush.msra.mxu2 %v5672_v29 }
 0xf05   :  { %2887 = vmatpush.msra.mxu2 %v5690_v8 }
 0xf81   :  { %v2731_v14 = vpop.f32.mrf.mxu2 }
 0xf82   :  { %v2732_v56 = vadd.f32 %v5825_v17, %v2731_v14 }
 0xf84   :  { %4145 = vst [vmem:[%s6523_s15 + $0x10] sm:$0xff] %v2732_v56  ;;  %v2736_v46 = vsel %vm65_vm7, %v2732_v56, -inf }
 0xf85   :  { %2737 = vmax.xlane.f32.xlu1 %v2736_v46 }
 0xff8   :  { %v2738_v61 = vpop.xlane.xlu1 %2737 }
 0xff9   :  { %vm2739_vm5 = vcmp.eq.f32.partialorder %v2736_v46, %v2738_v61 }
 0xffa   :  { %v2740_v25 = vsel %vm2739_vm5, %v4748_v28, 128 }
 0xffb   :  { %v2742_v38 = vshra.s32 %v2740_v25, 16  ;;  %v2741_v29 = vand.u32 65535, %v2740_v25 }
 0xffd   :  { %v2744_v52 = vcvt.s32.f32 %v2742_v38  ;;  %v2743_v42 = vcvt.s32.f32 %v2741_v29 }
 0xfff   :  { %2745 = vmin.xlane.f32.xlu2 %v2744_v52 }
0x1072   :  { %v2746_v8 = vpop.xlane.xlu2 %2745 }
0x1073   :  { %vm2747_vm6 = vcmp.eq.f32.partialorder %v2744_v52, %v2746_v8  ;;  %v2752_v39 = vcvt.f32.s32 %v2746_v8 }
0x1074   :  { %v2748_v21 = vsel %vm2747_vm6, %v2743_v42, inf }
0x1075   :  { %2749 = vmin.xlane.f32.xlu1 %v2748_v21  ;;  %v2753_v59 = vshll.u32 %v2752_v39, 16 }
0x10e8   :  { %v2750_v54 = vpop.xlane.xlu1 %2749 }
0x10e9   :  { %v2751_v36 = vcvt.f32.s32 %v2750_v54 }
0x10eb   :  { %v2754_v6 = vadd.s32 %v2753_v59, %v2751_v36 }
0x10ed   :  { %v2762_v24 = vsel %vm2761_vm8, %v4147_v27, %v2754_v6 }
0x10ee   :  { %2764 = vperm.xlu1 %4221, %v2762_v24  }
0x1160   :  { %v2765_v45 = vpop.permute.xlu1 %2764 }
0x1161   :  { %vm2766_vm9 = vcmp.eq.s32.totalorder %v4748_v28, %v2765_v45 }
0x1162   :  { %4149 = vmatmul.msk.f32.vlgmr.msra.gmra.mxu3 %vm2766_vm9, %v6545_v1 }
0x1163   :  { %3152 = vmatpush.msra.mxu3 %v5652_v34  ;;  %v5997_v34 = vld [vmem:[%s6517_s9 + $0x8] sm:$0xff] }
0x1165   :  { %3153 = vmatpush.msra.mxu3 %v5680_v33  ;;  %v6004_v33 = vld [vmem:[%s6516_s8 + $0x70] sm:$0xff] }
0x1167   :  { %3154 = vmatpush.msra.mxu3 %v5698_v9  ;;  %v6010_v9 = vld [vmem:[%s6517_s9] sm:$0xff] }
0x1169   :  { %3155 = vmatpush.msra.mxu3 %v5709_v57  ;;  %v6017_v57 = vld [vmem:[%s6516_s8 + $0x68] sm:$0xff] }
0x11e5   :  { %v2786_v15 = vpop.f32.mrf.mxu3 }
0x11e6   :  { %4150 = vmatmul.msk.f32.vlgmr.msrb.gmra.mxu1 %vm145_vm1, %v2786_v15  ;;  %4151 = vmatmul.msk.f32.vlgmr.msrb.gmra.mxu2 %vm145_vm1, %v2786_v15 }
0x11e7   :  { %4152 = vmatmul.msk.f32.vlgmr.msrb.gmra.mxu0 %vm145_vm1, %v2786_v15  ;;  %2974 = vmatpush.msrb.mxu1 %v5778_v37  ;;  %v6030_v37 = vld [vmem:[%s6516_s8 + $0x60] sm:$0xff] }
0x11e8   :  { %3017 = vmatpush.msrb.mxu2 %v5991_v35  ;;  %3054 = vmatpush.msrb.mxu0 %v5997_v34 }
0x11e9   :  { %2975 = vmatpush.msrb.mxu1 %v5784_v10  ;;  %v6036_v10 = vld [vmem:[%s6517_s9 + $0x18] sm:$0xff] }
0x11ea   :  { %3018 = vmatpush.msrb.mxu2 %v6004_v33  ;;  %3055 = vmatpush.msrb.mxu0 %v6010_v9 }
0x11eb   :  { %2976 = vmatpush.msrb.mxu1 %v5790_v4  ;;  %v6042_v4 = vld [vmem:[%s6518_s10 + $0x18] sm:$0xff] }
0x11ec   :  { %3019 = vmatpush.msrb.mxu2 %v6017_v57 }
0x11ed   :  { %2977 = vmatpush.msrb.mxu1 %v5795_v43  ;;  %v6048_v43 = vld [vmem:[%s6516_s8 + $0x58] sm:$0xff] }
0x11ee   :  { %4153 = vmatmul.msk.f32.vlgmr.msra.gmra.mxu1 %vm218_vm12, %v5960_v2  ;;  %4154 = vmatmul.msk.f32.vlgmr.msra.gmra.mxu2 %vm218_vm12, %v5960_v2 }
0x11ef   :  { %4155 = vmatmul.msk.f32.vlgmr.msra.gmra.mxu0 %vm218_vm12, %v5960_v2  ;;  %3020 = vmatpush.msrb.mxu2 %v6030_v37 }
0x11f0   :  { %3074 = vmatpush.msra.mxu1 %v6036_v10  ;;  %3112 = vmatpush.msra.mxu0 %v6042_v4 }
0x11f1   :  { %3021 = vmatpush.msrb.mxu2 %v6048_v43 }
0x11f2   :  { %3075 = vmatpush.msra.mxu1 %v6054_v53  ;;  %3113 = vmatpush.msra.mxu0 %v6060_v30 }
0x11f3   :  { %3022 = vmatpush.msrb.mxu2 %v6066_v51 }
0x11f4   :  { %3114 = vmatpush.msra.mxu0 %v6072_v7 }
0x11f5   :  { %3023 = vmatpush.msrb.mxu2 %v6078_v47 }
0x11f6   :  { %3115 = vmatpush.msra.mxu0 %v6084_v18 }
0x11f7   :  { %3024 = vmatpush.msrb.mxu2 %v6090_v32 }
0x11f9   :  { %3025 = vmatpush.msrb.mxu2 %v6096_v22 }
0x11fb   :  { %3026 = vmatpush.msrb.mxu2 %v6102_v63 }
0x11fd   :  { %3027 = vmatpush.msrb.mxu2 %v6108_v11 }
0x11ff   :  { %3028 = vmatpush.msrb.mxu2 %v6114_v12 }
0x1201   :  { %3029 = vmatpush.msrb.mxu2 %v6120_v41 }
0x1203   :  { %3030 = vmatpush.msrb.mxu2 %v6126_v62 }
0x1205   :  { %3031 = vmatpush.msrb.mxu2 %v6132_v13 }
0x1207   :  { %3032 = vmatpush.msrb.mxu2 %v6138_v16 }
0x1209   :  { %3342 = vmatpush.msra.mxu2 %v6144_v5 }
0x120b   :  { %3343 = vmatpush.msra.mxu2 %v6150_v20 }
0x1263   :  { %v2809_v23 = vpop.f32.mrf.mxu1 }
0x1264   :  { %v2810_v49 = vadd.f32 %v6559_v31, %v2809_v23  ;;  %v2849_v29 = vpop.f32.mrf.mxu0 }
0x1265   :  { %v2850_v15 = vadd.f32 %v5809_v26, %v2849_v29  ;;  %v6173_v29 = vld [vmem:[%s6518_s10 + $0x30] sm:$0xff] }
0x1269   :  { %v2829_v55 = vpop.f32.mrf.mxu2 }
0x126a   :  { %v2830_v56 = vadd.f32 %v6560_v50, %v2829_v55 }
0x126b   :  { %v2869_v3 = vpop.f32.mrf.mxu1 }
0x126c   :  { %v2870_v44 = vadd.f32 %v6561_v58, %v2869_v3  ;;  %v2909_v59 = vpop.f32.mrf.mxu0 }
0x126d   :  { %v2910_v6 = vadd.f32 %v5804_v40, %v2909_v59 }
0x126e   :  { %v2912_v0 = vadd.f32 %v2870_v44, %v2810_v49 }
0x1270   :  { %v4156_v60 = vmul.f32 -1.442695, %v2912_v0 }
0x1271   :  { %v2889_v14 = vpop.f32.mrf.mxu2 }
0x1272   :  { %4356 = vpow2.f32 %v4156_v60  ;;  %v2890_v46 = vadd.f32 %v6562_v19, %v2889_v14 }
0x1274   :  { %v2932_v61 = vadd.f32 %v2890_v46, %v2830_v56 }
0x1276   :  { %v4157_v25 = vmul.f32 -1.442695, %v2932_v61 }
0x1278   :  { %v4357_v38 = vpop.eup %4356  ;;  %4358 = vpow2.f32 %v4157_v25 }
0x1279   :  { %v2916_v52 = vadd.f32 1.0, %v4357_v38 }
0x127b   :  { %4360 = vrcp.f32 %v2916_v52  ;;  %v2928_v39 = vand.u32 2147483648, %v2916_v52  ;;  %v2926_v50 = vand.u32 2147483647, %v2916_v52  ;;  %vm2922_vm11 = vweird.f32 %v2916_v52 }
0x127d   :  { %v2929_v27 = vor.u32 1.1754944e-38, %v2928_v39  ;;  %vm2927_vm14 = vcmp.eq.f32.partialorder %v2926_v50, 8.507059e+37 }
0x127e   :  { %v4359_v8 = vpop.eup %4358 }
0x127f   :  { %v2936_v42 = vadd.f32 1.0, %v4359_v8  ;;  %v6185_v8 = vld [vmem:[%s6518_s10 + $0x20] sm:$0xff] }
0x1281   :  { %v4361_v31 = vpop.eup %4360  ;;  %4362 = vrcp.f32 %v2936_v42  ;;  %v2948_v49 = vand.u32 2147483648, %v2936_v42  ;;  %v2946_v44 = vand.u32 2147483647, %v2936_v42  ;;  %vm2942_vm0 = vweird.f32 %v2936_v42 }
0x1282   :  { %v2918_v58 = vmul.f32 %v4361_v31, %v2916_v52  ;;  %vm2923_vm10 = vweird.f32 %v4361_v31  ;;  %v6167_v52 = vld [vmem:[%s6518_s10 + $0x38] sm:$0xff] }
0x1283   :  { %vm2924_vm13 = vmor %vm2922_vm11, %vm2923_vm10  ;;  %v2949_v56 = vor.u32 1.1754944e-38, %v2948_v49  ;;  %vm2947_vm3 = vcmp.eq.f32.partialorder %v2946_v44, 8.507059e+37  ;;  %v6203_v49 = vld [vmem:[%s6518_s10 + $0x58] sm:$0xff]  ;;  %v6209_v44 = vld [vmem:[%s6518_s10 + $0x50] sm:$0xff] }
0x1284   :  { %v2919_v21 = vsub.f32 1.0, %v2918_v58 }
0x1286   :  { %v2920_v48 = vmul.f32 %v4361_v31, %v2919_v21 }
0x1287   :  { %v4363_v54 = vpop.eup %4362 }
0x1288   :  { %v2921_v19 = vadd.f32 %v4361_v31, %v2920_v48  ;;  %v2938_v36 = vmul.f32 %v4363_v54, %v2936_v42  ;;  %vm2943_vm15 = vweird.f32 %v4363_v54 }
0x1289   :  { %vm2944_vm2 = vmor %vm2942_vm0, %vm2943_vm15 }
0x128a   :  { %v2925_v24 = vsel %vm2924_vm13, %v4361_v31, %v2921_v19  ;;  %v2939_v45 = vsub.f32 1.0, %v2938_v36 }
0x128b   :  { %v2930_v23 = vsel %vm2927_vm14, %v2929_v27, %v2925_v24  ;;  %v3008_v27 = vstv %s3007_s1 }
0x128c   :  { %v2952_v55 = vmul.f32 %v2930_v23, %v2910_v6  ;;  %v2940_v3 = vmul.f32 %v4363_v54, %v2939_v45  ;;  %vm3009_vm6 = vcmp.eq.s32.totalorder %v3008_v27, 1 }
0x128e   :  { %v2953_v0 = vadd.f32 %v2952_v55, %v2850_v15  ;;  %v2941_v60 = vadd.f32 %v4363_v54, %v2940_v3  ;;  %v4161_v15 = vld [vmem:[%s6510_s2 + $0x20] sm:$0xff] }
0x1290   :  { %4364 = vtanh.f32 %v2953_v0  ;;  %v2945_v14 = vsel %vm2944_vm2, %v4363_v54, %v2941_v60  ;;  %v6215_v0 = vld [vmem:[%s6518_s10 + $0x48] sm:$0xff]  ;;  %v6221_v60 = vld [vmem:[%s6518_s10 + $0x40] sm:$0xff] }
0x1291   :  { %v2950_v40 = vsel %vm2947_vm3, %v2949_v56, %v2945_v14  ;;  %v6230_v56 = vld [vmem:[%s6521_s13 + $0x18] sm:$0xff] }
0x1292   :  { %v2955_v46 = vsub.f32 1.0, %v2950_v40  ;;  %v2957_v26 = vmul.f32 %v2950_v40, %v5960_v2  ;;  %v6179_v2 = vld [vmem:[%s6518_s10 + $0x28] sm:$0xff]  ;;  %v6238_v40 = vld [vmem:[%s6521_s13 + $0x10] sm:$0xff]  ;;  %s3503_s10 = scalar_select %p3500_p5, 1, 0 }
0x1296   :  { %v4365_v61 = vpop.eup %4364 }
0x1297   :  { %v2956_v25 = vmul.f32 %v4365_v61, %v2955_v46  ;;  %v6246_v46 = vld [vmem:[%s6521_s13 + $0x8] sm:$0xff]  ;;  %v6253_v61 = vld [vmem:[%s6521_s13] sm:$0xff]  ;;  %s3751_s13 = scalar_select %p3748_p6, 1, 0 }
0x1299   :  { %v6160_v38 = vadd.f32 %v2957_v26, %v2956_v25 }
0x129b   :  { %4158 = vmatmul.msk.f32.vlgmr.msrb.gmra.mxu1 %vm218_vm12, %v6160_v38 }
0x129c   :  { %3132 = vmatpush.msrb.mxu1 %v6167_v52 }
0x129e   :  { %3133 = vmatpush.msrb.mxu1 %v6173_v29 }
0x12a0   :  { %3134 = vmatpush.msrb.mxu1 %v6179_v2 }
0x12a2   :  { %3135 = vmatpush.msrb.mxu1 %v6185_v8 }
0x1318   :  { %v2979_v42 = vpop.f32.mrf.mxu1 }
0x1319   :  { %v2980_v31 = vadd.f32 %v5825_v17, %v2979_v42 }
0x131b   :  { %4159 = vst [vmem:[%s6523_s15 + $0x18] sm:$0xff] %v2980_v31  ;;  %v2984_v58 = vsel %vm65_vm7, %v2980_v31, -inf }
0x131c   :  { %2985 = vmax.xlane.f32.xlu0 %v2984_v58 }
0x138f   :  { %v2986_v21 = vpop.xlane.xlu0 %2985 }
0x1390   :  { %vm2987_vm4 = vcmp.eq.f32.partialorder %v2984_v58, %v2986_v21  ;;  %v6286_v58 = vld [vmem:[%s6519_s11] ss:$0 sm:$0xff] }
0x1391   :  { %v2988_v39 = vsel %vm2987_vm4, %v4748_v28, 128  ;;  %6563 = vst [vmem:[#allocation5_spill] sm:$0xff] %v6286_v58 }
0x1392   :  { %v2990_v48 = vshra.s32 %v2988_v39, 16  ;;  %v2989_v54 = vand.u32 65535, %v2988_v39  ;;  %v6292_v39 = vld [vmem:[%s6519_s11 + $0x1] ss:$0 sm:$0xff] }
0x1393   :  { %6564 = vst [vmem:[#allocation6_spill] sm:$0xff] %v6292_v39 }
0x1394   :  { %v2992_v50 = vcvt.s32.f32 %v2990_v48  ;;  %v2991_v19 = vcvt.s32.f32 %v2989_v54 }
0x1396   :  { %2993 = vmin.xlane.f32.xlu1 %v2992_v50 }
0x1409   :  { %v2994_v59 = vpop.xlane.xlu1 %2993 }
0x140a   :  { %vm2995_vm5 = vcmp.eq.f32.partialorder %v2992_v50, %v2994_v59  ;;  %v3000_v36 = vcvt.f32.s32 %v2994_v59  ;;  %v6298_v50 = vld [vmem:[%s6520_s12] ss:$0 sm:$0xff]  ;;  %v6304_v59 = vld [vmem:[%s6520_s12 + $0x1] ss:$0 sm:$0xff] }
0x140b   :  { %v2996_v17 = vsel %vm2995_vm5, %v2991_v19, inf  ;;  %6565 = vst [vmem:[#allocation8_spill] sm:$0xff] %v6298_v50 }
0x140c   :  { %2997 = vmin.xlane.f32.xlu2 %v2996_v17  ;;  %v3001_v24 = vshll.u32 %v3000_v36, 16  ;;  %6566 = vst [vmem:[#allocation7_spill] sm:$0xff] %v6304_v59 }
0x147f   :  { %v2998_v6 = vpop.xlane.xlu2 %2997 }
0x1480   :  { %v2999_v45 = vcvt.f32.s32 %v2998_v6 }
0x1482   :  { %v3002_v23 = vadd.s32 %v3001_v24, %v2999_v45 }
0x1484   :  { %v3010_v55 = vsel %vm3009_vm6, %v4161_v15, %v3002_v23 }
0x1485   :  { %3012 = vperm.xlu2 %4222, %v3010_v55  }
0x14df   :  { %v3013_v3 = vpop.permute.xlu2 %3012 }
0x14e0   :  { %vm3014_vm8 = vcmp.eq.s32.totalorder %v4748_v28, %v3013_v3 }
0x14e1   :  { %4163 = vmatmul.msk.f32.vlgmr.msrb.gmra.mxu2 %vm3014_vm8, %v6545_v1 }
0x14e2   :  { %3400 = vmatpush.msrb.mxu2 %v6203_v49 }
0x14e4   :  { %3401 = vmatpush.msrb.mxu2 %v6209_v44 }
0x14e6   :  { %3402 = vmatpush.msrb.mxu2 %v6215_v0 }
0x14e8   :  { %3403 = vmatpush.msrb.mxu2 %v6221_v60 }
0x1564   :  { %v3034_v14 = vpop.f32.mrf.mxu2 }
0x1565   :  { %4164 = vmatmul.msk.f32.vlgmr.msrb.gmra.mxu0 %vm145_vm1, %v3034_v14  ;;  %4165 = vmatmul.msk.f32.vlgmr.msra.gmra.mxu1 %vm145_vm1, %v3034_v14 }
0x1566   :  { %4166 = vmatmul.msk.f32.vlgmr.msrb.gmra.mxu3 %vm145_vm1, %v3034_v14  ;;  %3222 = vmatpush.msrb.mxu0 %v6230_v56 }
0x1567   :  { %3265 = vmatpush.msra.mxu1 %v5991_v35  ;;  %3302 = vmatpush.msrb.mxu3 %v5997_v34 }
0x1568   :  { %3223 = vmatpush.msrb.mxu0 %v6238_v40 }
0x1569   :  { %3266 = vmatpush.msra.mxu1 %v6004_v33  ;;  %3303 = vmatpush.msrb.mxu3 %v6010_v9 }
0x156a   :  { %3224 = vmatpush.msrb.mxu0 %v6246_v46 }
0x156b   :  { %3267 = vmatpush.msra.mxu1 %v6017_v57 }
0x156c   :  { %3225 = vmatpush.msrb.mxu0 %v6253_v61 }
0x156d   :  { %4167 = vmatmul.msk.f32.vlgmr.msra.gmra.mxu0 %vm218_vm12, %v6160_v38  ;;  %4168 = vmatmul.msk.f32.vlgmr.msrb.gmra.mxu1 %vm218_vm12, %v6160_v38 }
0x156e   :  { %4169 = vmatmul.msk.f32.vlgmr.msra.gmra.mxu3 %vm218_vm12, %v6160_v38  ;;  %3268 = vmatpush.msra.mxu1 %v6030_v37 }
0x156f   :  { %3322 = vmatpush.msra.mxu0 %v6036_v10  ;;  %3360 = vmatpush.msra.mxu3 %v6042_v4 }
0x1570   :  { %3269 = vmatpush.msra.mxu1 %v6048_v43 }
0x1571   :  { %3323 = vmatpush.msra.mxu0 %v6054_v53  ;;  %3361 = vmatpush.msra.mxu3 %v6060_v30 }
0x1572   :  { %3270 = vmatpush.msra.mxu1 %v6066_v51 }
0x1573   :  { %3362 = vmatpush.msra.mxu3 %v6072_v7 }
0x1574   :  { %3271 = vmatpush.msra.mxu1 %v6078_v47 }
0x1575   :  { %3363 = vmatpush.msra.mxu3 %v6084_v18 }
0x1576   :  { %3272 = vmatpush.msra.mxu1 %v6090_v32 }
0x1578   :  { %3273 = vmatpush.msra.mxu1 %v6096_v22 }
0x157a   :  { %3274 = vmatpush.msra.mxu1 %v6102_v63 }
0x157c   :  { %3275 = vmatpush.msra.mxu1 %v6108_v11 }
0x157e   :  { %3276 = vmatpush.msra.mxu1 %v6114_v12 }
0x1580   :  { %3277 = vmatpush.msra.mxu1 %v6120_v41 }
0x1582   :  { %3278 = vmatpush.msra.mxu1 %v6126_v62 }
0x1584   :  { %3279 = vmatpush.msra.mxu1 %v6132_v13 }
0x1586   :  { %3280 = vmatpush.msra.mxu1 %v6138_v16 }
0x1588   :  { %3590 = vmatpush.msrb.mxu1 %v6144_v5 }
0x158a   :  { %3591 = vmatpush.msrb.mxu1 %v6150_v20 }
0x15e2   :  { %v3057_v25 = vpop.f32.mrf.mxu0  ;;  %v3077_v26 = vpop.f32.mrf.mxu1 }
0x15e3   :  { %v3058_v21 = vadd.f32 %v6286_v58, %v3057_v25  ;;  %v3078_v48 = vadd.f32 %v6292_v39, %v3077_v26 }
0x15e9   :  { %v3097_v55 = vpop.f32.mrf.mxu3 }
0x15ea   :  { %v3117_v42 = vpop.f32.mrf.mxu0  ;;  %v3137_v31 = vpop.f32.mrf.mxu1 }
0x15eb   :  { %v3118_v54 = vadd.f32 %v6298_v50, %v3117_v42  ;;  %v3138_v19 = vadd.f32 %v6304_v59, %v3137_v31 }
0x15ed   :  { %v3160_v17 = vadd.f32 %v3118_v54, %v3058_v21  ;;  %v3180_v36 = vadd.f32 %v3138_v19, %v3078_v48 }
0x15ef   :  { %v4170_v27 = vmul.f32 -1.442695, %v3160_v17  ;;  %v4171_v6 = vmul.f32 -1.442695, %v3180_v36 }
0x15f1   :  { %4366 = vpow2.f32 %v4170_v27  ;;  %v3157_v19 = vpop.f32.mrf.mxu3  ;;  %v6310_v27 = vld [vmem:[%s6520_s12 + $0x2] ss:$0 sm:$0xff] }
0x15f2   :  { %4368 = vpow2.f32 %v4171_v6  ;;  %v3158_v6 = vadd.f32 %v6310_v27, %v3157_v19 }
0x15f7   :  { %v4367_v24 = vpop.eup %4366 }
0x15f8   :  { %v4369_v45 = vpop.eup %4368  ;;  %v3164_v15 = vadd.f32 1.0, %v4367_v24 }
0x15f9   :  { %v3184_v23 = vadd.f32 1.0, %v4369_v45 }
0x15fa   :  { %4370 = vrcp.f32 %v3164_v15  ;;  %v3176_v31 = vand.u32 2147483648, %v3164_v15  ;;  %v3174_v48 = vand.u32 2147483647, %v3164_v15  ;;  %vm3170_vm10 = vweird.f32 %v3164_v15 }
0x15fb   :  { %4372 = vrcp.f32 %v3184_v23  ;;  %vm3190_vm15 = vweird.f32 %v3184_v23 }
0x15fc   :  { %v3177_v36 = vor.u32 1.1754944e-38, %v3176_v31  ;;  %vm3175_vm13 = vcmp.eq.f32.partialorder %v3174_v48, 8.507059e+37  ;;  %v3194_v31 = vand.u32 2147483647, %v3184_v23 }
0x15fe   :  { %vm3195_vm2 = vcmp.eq.f32.partialorder %v3194_v31, 8.507059e+37 }
0x1600   :  { %v4371_v3 = vpop.eup %4370 }
0x1601   :  { %v4373_v14 = vpop.eup %4372  ;;  %v3166_v25 = vmul.f32 %v4371_v3, %v3164_v15  ;;  %vm3171_vm9 = vweird.f32 %v4371_v3 }
0x1602   :  { %v3186_v26 = vmul.f32 %v4373_v14, %v3184_v23  ;;  %vm3172_vm11 = vmor %vm3170_vm10, %vm3171_vm9  ;;  %vm3191_vm14 = vweird.f32 %v4373_v14 }
0x1603   :  { %v3167_v42 = vsub.f32 1.0, %v3166_v25  ;;  %vm3192_vm0 = vmor %vm3190_vm15, %vm3191_vm14 }
0x1604   :  { %v3187_v50 = vsub.f32 1.0, %v3186_v26  ;;  %v3196_v26 = vand.u32 2147483648, %v3184_v23 }
0x1605   :  { %v3168_v21 = vmul.f32 %v4371_v3, %v3167_v42 }
0x1606   :  { %v3188_v54 = vmul.f32 %v4373_v14, %v3187_v50  ;;  %v6316_v50 = vld [vmem:[%s6519_s11 + $0x2] ss:$0 sm:$0xff]  ;;  %v3197_v19 = vor.u32 1.1754944e-38, %v3196_v26 }
0x1607   :  { %v3169_v17 = vadd.f32 %v4371_v3, %v3168_v21  ;;  %v3098_v15 = vadd.f32 %v6316_v50, %v3097_v55 }
0x1608   :  { %v3189_v25 = vadd.f32 %v4373_v14, %v3188_v54 }
0x1609   :  { %v3173_v24 = vsel %vm3172_vm11, %v4371_v3, %v3169_v17 }
0x160a   :  { %v3178_v45 = vsel %vm3175_vm13, %v3177_v36, %v3173_v24  ;;  %v3193_v58 = vsel %vm3192_vm0, %v4373_v14, %v3189_v25 }
0x160b   :  { %v3200_v42 = vmul.f32 %v3178_v45, %v3158_v6  ;;  %v3198_v3 = vsel %vm3195_vm2, %v3197_v19, %v3193_v58  ;;  %v6331_v58 = vld [vmem:[%s6522_s14] ss:$0 sm:$0xff]  ;;  %s4174_s14 = sld [smem:[#allocation2 + $0x4]] }
0x160c   :  { %v3203_v48 = vsub.f32 1.0, %v3198_v3  ;;  %v3205_v36 = vmul.f32 %v3198_v3, %v6160_v38 }
0x160d   :  { %v3201_v21 = vadd.f32 %v3200_v42, %v3098_v15 }
0x160f   :  { %4374 = vtanh.f32 %v3201_v21 }
0x1611   :  { %p3252_p4 = scmp.gt.s32.totalorder %s4174_s14, 0 }
0x1613   :  { %s3255_s6 = scalar_select %p3252_p4, 1, 0 }
0x1615   :  { %v4375_v54 = vpop.eup %4374  ;;  %v3256_v19 = vstv %s3255_s6 }
0x1616   :  { %v3204_v17 = vmul.f32 %v4375_v54, %v3203_v48  ;;  %vm3257_vm5 = vcmp.eq.s32.totalorder %v3256_v19, 1 }
0x1618   :  { %v6320_v24 = vadd.f32 %v3205_v36, %v3204_v17  ;;  %v4175_v17 = vld [vmem:[%s6510_s2 + $0x28] sm:$0xff] }
0x161a   :  { %4172 = vmatmul.msk.f32.vlgmr.msrb.gmra.mxu0 %vm218_vm12, %v6320_v24 }
0x161b   :  { %3380 = vmatpush.msrb.mxu0 %v6167_v52 }
0x161d   :  { %3381 = vmatpush.msrb.mxu0 %v6173_v29 }
0x161f   :  { %3382 = vmatpush.msrb.mxu0 %v6179_v2 }
0x1621   :  { %3383 = vmatpush.msrb.mxu0 %v6185_v8 }
0x1697   :  { %v3227_v23 = vpop.f32.mrf.mxu0 }
0x1698   :  { %v3228_v38 = vadd.f32 %v6331_v58, %v3227_v23 }
0x169a   :  { %4173 = vst [vmem:[%s6523_s15 + $0x20] sm:$0xff] %v3228_v38  ;;  %v3232_v55 = vsel %vm65_vm7, %v3228_v38, -inf }
0x169b   :  { %3233 = vmax.xlane.f32.xlu0 %v3232_v55 }
0x170e   :  { %v3234_v14 = vpop.xlane.xlu0 %3233 }
0x170f   :  { %vm3235_vm3 = vcmp.eq.f32.partialorder %v3232_v55, %v3234_v14 }
0x1710   :  { %v3236_v6 = vsel %vm3235_vm3, %v4748_v28, 128 }
0x1711   :  { %v3238_v45 = vshra.s32 %v3236_v6, 16  ;;  %v3237_v15 = vand.u32 65535, %v3236_v6 }
0x1713   :  { %v3240_v25 = vcvt.s32.f32 %v3238_v45  ;;  %v3239_v42 = vcvt.s32.f32 %v3237_v15 }
0x1715   :  { %3241 = vmin.xlane.f32.xlu0 %v3240_v25 }
0x1788   :  { %v3242_v26 = vpop.xlane.xlu0 %3241 }
0x1789   :  { %vm3243_vm4 = vcmp.eq.f32.partialorder %v3240_v25, %v3242_v26  ;;  %v3248_v21 = vcvt.f32.s32 %v3242_v26 }
0x178a   :  { %v3244_v31 = vsel %vm3243_vm4, %v3239_v42, inf }
0x178b   :  { %3245 = vmin.xlane.f32.xlu0 %v3244_v31  ;;  %v3249_v48 = vshll.u32 %v3248_v21, 16  ;;  %v6567_v21 = vld [vmem:[#allocation5_spill] sm:$0xff] }
0x17fe   :  { %v3246_v3 = vpop.xlane.xlu0 %3245 }
0x17ff   :  { %v3247_v54 = vcvt.f32.s32 %v3246_v3  ;;  %v6568_v3 = vld [vmem:[#allocation8_spill] sm:$0xff] }
0x1801   :  { %v3250_v36 = vadd.s32 %v3249_v48, %v3247_v54 }
0x1803   :  { %v3258_v23 = vsel %vm3257_vm5, %v4175_v17, %v3250_v36 }
0x1804   :  { %3260 = vperm.xlu2 %4222, %v3258_v23  }
0x185e   :  { %v3261_v38 = vpop.permute.xlu2 %3260 }
0x185f   :  { %vm3262_vm6 = vcmp.eq.s32.totalorder %v4748_v28, %v3261_v38 }
0x1860   :  { %4177 = vmatmul.msk.f32.vlgmr.msra.gmra.mxu1 %vm3262_vm6, %v6545_v1 }
0x1861   :  { %3648 = vmatpush.msra.mxu1 %v6203_v49 }
0x1863   :  { %3649 = vmatpush.msra.mxu1 %v6209_v44 }
0x1865   :  { %3650 = vmatpush.msra.mxu1 %v6215_v0 }
0x1867   :  { %3651 = vmatpush.msra.mxu1 %v6221_v60 }
0x18dd   :  { %v3282_v55 = vpop.f32.mrf.mxu1 }
0x18de   :  { %4178 = vmatmul.msk.f32.vlgmr.msrb.gmra.mxu3 %vm145_vm1, %v3282_v55  ;;  %4179 = vmatmul.msk.f32.vlgmr.msra.gmra.mxu0 %vm145_vm1, %v3282_v55 }
0x18df   :  { %4180 = vmatmul.msk.f32.vlgmr.msra.gmra.mxu2 %vm145_vm1, %v3282_v55  ;;  %3470 = vmatpush.msrb.mxu3 %v6230_v56 }
0x18e0   :  { %3513 = vmatpush.msra.mxu0 %v5991_v35  ;;  %3550 = vmatpush.msra.mxu2 %v5997_v34 }
0x18e1   :  { %3471 = vmatpush.msrb.mxu3 %v6238_v40 }
0x18e2   :  { %3514 = vmatpush.msra.mxu0 %v6004_v33  ;;  %3551 = vmatpush.msra.mxu2 %v6010_v9 }
0x18e3   :  { %3472 = vmatpush.msrb.mxu3 %v6246_v46 }
0x18e4   :  { %3515 = vmatpush.msra.mxu0 %v6017_v57 }
0x18e5   :  { %3473 = vmatpush.msrb.mxu3 %v6253_v61 }
0x18e6   :  { %4181 = vmatmul.msk.f32.vlgmr.msra.gmra.mxu3 %vm218_vm12, %v6320_v24  ;;  %4182 = vmatmul.msk.f32.vlgmr.msrb.gmra.mxu0 %vm218_vm12, %v6320_v24 }
0x18e7   :  { %4183 = vmatmul.msk.f32.vlgmr.msrb.gmra.mxu2 %vm218_vm12, %v6320_v24  ;;  %3516 = vmatpush.msra.mxu0 %v6030_v37 }
0x18e8   :  { %3570 = vmatpush.msra.mxu3 %v6036_v10  ;;  %3608 = vmatpush.msrb.mxu2 %v6042_v4 }
0x18e9   :  { %3517 = vmatpush.msra.mxu0 %v6048_v43 }
0x18ea   :  { %3571 = vmatpush.msra.mxu3 %v6054_v53  ;;  %3609 = vmatpush.msrb.mxu2 %v6060_v30 }
0x18eb   :  { %3518 = vmatpush.msra.mxu0 %v6066_v51 }
0x18ec   :  { %3610 = vmatpush.msrb.mxu2 %v6072_v7 }
0x18ed   :  { %3519 = vmatpush.msra.mxu0 %v6078_v47 }
0x18ee   :  { %3611 = vmatpush.msrb.mxu2 %v6084_v18 }
0x18ef   :  { %3520 = vmatpush.msra.mxu0 %v6090_v32 }
0x18f1   :  { %3521 = vmatpush.msra.mxu0 %v6096_v22 }
0x18f3   :  { %3522 = vmatpush.msra.mxu0 %v6102_v63 }
0x18f5   :  { %3523 = vmatpush.msra.mxu0 %v6108_v11 }
0x18f7   :  { %3524 = vmatpush.msra.mxu0 %v6114_v12 }
0x18f9   :  { %3525 = vmatpush.msra.mxu0 %v6120_v41 }
0x18fb   :  { %3526 = vmatpush.msra.mxu0 %v6126_v62 }
0x18fd   :  { %3527 = vmatpush.msra.mxu0 %v6132_v13 }
0x18ff   :  { %3528 = vmatpush.msra.mxu0 %v6138_v16 }
0x1901   :  { %3838 = vmatpush.msrb.mxu0 %v6144_v5 }
0x1903   :  { %3839 = vmatpush.msrb.mxu0 %v6150_v20 }
0x195b   :  { %v3325_v14 = vpop.f32.mrf.mxu0 }
0x195c   :  { %v3326_v25 = vadd.f32 %v6292_v39, %v3325_v14 }
0x1961   :  { %v3305_v6 = vpop.f32.mrf.mxu3 }
0x1962   :  { %v3306_v19 = vadd.f32 %v6567_v21, %v3305_v6  ;;  %v3345_v55 = vpop.f32.mrf.mxu2 }
0x1963   :  { %v3385_v45 = vpop.f32.mrf.mxu0 }
0x1964   :  { %v3386_v15 = vadd.f32 %v6304_v59, %v3385_v45 }
0x1966   :  { %v3428_v26 = vadd.f32 %v3386_v15, %v3326_v25 }
0x1968   :  { %v4185_v42 = vmul.f32 -1.442695, %v3428_v26 }
0x1969   :  { %v3365_v31 = vpop.f32.mrf.mxu3 }
0x196a   :  { %4376 = vpow2.f32 %v4185_v42  ;;  %v3366_v48 = vadd.f32 %v6568_v3, %v3365_v31 }
0x196c   :  { %v3408_v54 = vadd.f32 %v3366_v48, %v3306_v19  ;;  %v3405_v48 = vpop.f32.mrf.mxu2 }
0x196e   :  { %v4184_v17 = vmul.f32 -1.442695, %v3408_v54 }
0x1970   :  { %v4377_v5 = vpop.eup %4376  ;;  %4378 = vpow2.f32 %v4184_v17 }
0x1971   :  { %v3432_v20 = vadd.f32 1.0, %v4377_v5  ;;  %v3406_v5 = vadd.f32 %v6310_v27, %v3405_v48 }
0x1973   :  { %4380 = vrcp.f32 %v3432_v20  ;;  %vm3438_vm14 = vweird.f32 %v3432_v20 }
0x1976   :  { %v4379_v36 = vpop.eup %4378 }
0x1977   :  { %v3412_v23 = vadd.f32 1.0, %v4379_v36 }
0x1979   :  { %4382 = vrcp.f32 %v3412_v23  ;;  %v4381_v38 = vpop.eup %4380  ;;  %v3424_v6 = vand.u32 2147483648, %v3412_v23  ;;  %v3422_v31 = vand.u32 2147483647, %v3412_v23  ;;  %vm3418_vm9 = vweird.f32 %v3412_v23 }
0x197a   :  { %v3434_v14 = vmul.f32 %v4381_v38, %v3432_v20  ;;  %vm3439_vm13 = vweird.f32 %v4381_v38 }
0x197b   :  { %v3425_v17 = vor.u32 1.1754944e-38, %v3424_v6  ;;  %vm3423_vm11 = vcmp.eq.f32.partialorder %v3422_v31, 8.507059e+37  ;;  %vm3440_vm15 = vmor %vm3438_vm14, %vm3439_vm13 }
0x197c   :  { %v3435_v15 = vsub.f32 1.0, %v3434_v14  ;;  %v3346_v14 = vadd.f32 %v6316_v50, %v3345_v55 }
0x197e   :  { %v3436_v19 = vmul.f32 %v4381_v38, %v3435_v15 }
0x197f   :  { %v4383_v45 = vpop.eup %4382 }
0x1980   :  { %v3414_v25 = vmul.f32 %v4383_v45, %v3412_v23  ;;  %vm3419_vm8 = vweird.f32 %v4383_v45  ;;  %v3437_v3 = vadd.f32 %v4381_v38, %v3436_v19 }
0x1981   :  { %vm3420_vm10 = vmor %vm3418_vm9, %vm3419_vm8 }
0x1982   :  { %v3415_v26 = vsub.f32 1.0, %v3414_v25  ;;  %v3444_v25 = vand.u32 2147483648, %v3432_v20  ;;  %v3441_v21 = vsel %vm3440_vm15, %v4381_v38, %v3437_v3 }
0x1984   :  { %v3416_v42 = vmul.f32 %v4383_v45, %v3415_v26  ;;  %v3442_v26 = vand.u32 2147483647, %v3432_v20 }
0x1986   :  { %v3417_v54 = vadd.f32 %v4383_v45, %v3416_v42  ;;  %v3445_v42 = vor.u32 1.1754944e-38, %v3444_v25  ;;  %vm3443_vm0 = vcmp.eq.f32.partialorder %v3442_v26, 8.507059e+37 }
0x1988   :  { %v3421_v36 = vsel %vm3420_vm10, %v4383_v45, %v3417_v54  ;;  %v3446_v23 = vsel %vm3443_vm0, %v3445_v42, %v3441_v21  ;;  %v4189_v42 = vld [vmem:[%s6510_s2 + $0x30] sm:$0xff] }
0x1989   :  { %v3426_v59 = vsel %vm3423_vm11, %v3425_v17, %v3421_v36  ;;  %v3451_v6 = vsub.f32 1.0, %v3446_v23  ;;  %v3453_v31 = vmul.f32 %v3446_v23, %v6320_v24 }
0x198a   :  { %v3448_v39 = vmul.f32 %v3426_v59, %v3406_v5 }
0x198c   :  { %v3449_v15 = vadd.f32 %v3448_v39, %v3346_v14  ;;  %v3504_v14 = vstv %s3503_s10 }
0x198d   :  { %vm3505_vm4 = vcmp.eq.s32.totalorder %v3504_v14, 1 }
0x198e   :  { %4384 = vtanh.f32 %v3449_v15 }
0x1994   :  { %v4385_v48 = vpop.eup %4384 }
0x1995   :  { %v3452_v45 = vmul.f32 %v4385_v48, %v3451_v6 }
0x1997   :  { %v6395_v54 = vadd.f32 %v3453_v31, %v3452_v45 }
0x1999   :  { %4186 = vmatmul.msk.f32.vlgmr.msrb.gmra.mxu3 %vm218_vm12, %v6395_v54 }
0x199a   :  { %3628 = vmatpush.msrb.mxu3 %v6167_v52 }
0x199c   :  { %3629 = vmatpush.msrb.mxu3 %v6173_v29 }
0x199e   :  { %3630 = vmatpush.msrb.mxu3 %v6179_v2 }
0x19a0   :  { %3631 = vmatpush.msrb.mxu3 %v6185_v8 }
0x1a1c   :  { %v3475_v39 = vpop.f32.mrf.mxu3 }
0x1a1d   :  { %v3476_v59 = vadd.f32 %v6331_v58, %v3475_v39 }
0x1a1f   :  { %4187 = vst [vmem:[%s6523_s15 + $0x28] sm:$0xff] %v3476_v59  ;;  %v3480_v24 = vsel %vm65_vm7, %v3476_v59, -inf }
0x1a20   :  { %3481 = vmax.xlane.f32.xlu1 %v3480_v24 }
0x1a93   :  { %v3482_v21 = vpop.xlane.xlu1 %3481 }
0x1a94   :  { %vm3483_vm2 = vcmp.eq.f32.partialorder %v3480_v24, %v3482_v21 }
0x1a95   :  { %v3484_v3 = vsel %vm3483_vm2, %v4748_v28, 128 }
0x1a96   :  { %v3486_v20 = vshra.s32 %v3484_v3, 16  ;;  %v3485_v55 = vand.u32 65535, %v3484_v3 }
0x1a98   :  { %v3488_v38 = vcvt.s32.f32 %v3486_v20  ;;  %v3487_v17 = vcvt.s32.f32 %v3485_v55 }
0x1a9a   :  { %3489 = vmin.xlane.f32.xlu0 %v3488_v38 }
0x1b0d   :  { %v3490_v19 = vpop.xlane.xlu0 %3489 }
0x1b0e   :  { %vm3491_vm3 = vcmp.eq.f32.partialorder %v3488_v38, %v3490_v19  ;;  %v3496_v36 = vcvt.f32.s32 %v3490_v19 }
0x1b0f   :  { %v3492_v5 = vsel %vm3491_vm3, %v3487_v17, inf }
0x1b10   :  { %3493 = vmin.xlane.f32.xlu2 %v3492_v5  ;;  %v3497_v26 = vshll.u32 %v3496_v36, 16 }
0x1b83   :  { %v3494_v25 = vpop.xlane.xlu2 %3493 }
0x1b84   :  { %v3495_v15 = vcvt.f32.s32 %v3494_v25 }
0x1b86   :  { %v3498_v23 = vadd.s32 %v3497_v26, %v3495_v15 }
0x1b88   :  { %v3506_v6 = vsel %vm3505_vm4, %v4189_v42, %v3498_v23 }
0x1b89   :  { %3508 = vperm.xlu1 %4221, %v3506_v6  }
0x1bfb   :  { %v3509_v48 = vpop.permute.xlu1 %3508 }
0x1bfc   :  { %vm3510_vm5 = vcmp.eq.s32.totalorder %v4748_v28, %v3509_v48 }
0x1bfd   :  { %4191 = vmatmul.msk.f32.vlgmr.msra.gmra.mxu0 %vm3510_vm5, %v6545_v1 }
0x1bfe   :  { %3896 = vmatpush.msra.mxu0 %v6203_v49 }
0x1c00   :  { %3897 = vmatpush.msra.mxu0 %v6209_v44 }
0x1c02   :  { %3898 = vmatpush.msra.mxu0 %v6215_v0 }
0x1c04   :  { %3899 = vmatpush.msra.mxu0 %v6221_v60 }
0x1c7a   :  { %v3530_v45 = vpop.f32.mrf.mxu0 }
0x1c7b   :  { %4192 = vmatmul.msk.f32.vlgmr.msra.gmra.mxu2 %vm145_vm1, %v3530_v45  ;;  %4193 = vmatmul.msk.f32.vlgmr.msra.gmra.mxu3 %vm145_vm1, %v3530_v45 }
0x1c7c   :  { %4194 = vmatmul.msk.f32.vlgmr.msrb.gmra.mxu1 %vm145_vm1, %v3530_v45  ;;  %3718 = vmatpush.msra.mxu2 %v6230_v56 }
0x1c7d   :  { %3761 = vmatpush.msra.mxu3 %v5991_v35  ;;  %3798 = vmatpush.msrb.mxu1 %v5997_v34 }
0x1c7e   :  { %3719 = vmatpush.msra.mxu2 %v6238_v40 }
0x1c7f   :  { %3762 = vmatpush.msra.mxu3 %v6004_v33  ;;  %3799 = vmatpush.msrb.mxu1 %v6010_v9 }
0x1c80   :  { %3720 = vmatpush.msra.mxu2 %v6246_v46 }
0x1c81   :  { %3763 = vmatpush.msra.mxu3 %v6017_v57  ;;  %v6569_v57 = vld [vmem:[#allocation5_spill] sm:$0xff] }
0x1c82   :  { %3721 = vmatpush.msra.mxu2 %v6253_v61 }
0x1c83   :  { %4195 = vmatmul.msk.f32.vlgmr.msrb.gmra.mxu2 %vm218_vm12, %v6395_v54  ;;  %4196 = vmatmul.msk.f32.vlgmr.msrb.gmra.mxu3 %vm218_vm12, %v6395_v54 }
0x1c84   :  { %4197 = vmatmul.msk.f32.vlgmr.msra.gmra.mxu1 %vm218_vm12, %v6395_v54  ;;  %3764 = vmatpush.msra.mxu3 %v6030_v37 }
0x1c85   :  { %3818 = vmatpush.msrb.mxu2 %v6036_v10  ;;  %3856 = vmatpush.msra.mxu1 %v6042_v4  ;;  %v6570_v10 = vld [vmem:[#allocation6_spill] sm:$0xff] }
0x1c86   :  { %3765 = vmatpush.msra.mxu3 %v6048_v43  ;;  %v6571_v43 = vld [vmem:[#allocation8_spill] sm:$0xff] }
0x1c87   :  { %3819 = vmatpush.msrb.mxu2 %v6054_v53  ;;  %3857 = vmatpush.msra.mxu1 %v6060_v30  ;;  %v6572_v30 = vld [vmem:[#allocation7_spill] sm:$0xff] }
0x1c88   :  { %3766 = vmatpush.msra.mxu3 %v6066_v51 }
0x1c89   :  { %3858 = vmatpush.msra.mxu1 %v6072_v7 }
0x1c8a   :  { %3767 = vmatpush.msra.mxu3 %v6078_v47 }
0x1c8b   :  { %3859 = vmatpush.msra.mxu1 %v6084_v18 }
0x1c8c   :  { %3768 = vmatpush.msra.mxu3 %v6090_v32 }
0x1c8e   :  { %3769 = vmatpush.msra.mxu3 %v6096_v22 }
0x1c90   :  { %3770 = vmatpush.msra.mxu3 %v6102_v63 }
0x1c92   :  { %3771 = vmatpush.msra.mxu3 %v6108_v11 }
0x1c94   :  { %3772 = vmatpush.msra.mxu3 %v6114_v12 }
0x1c96   :  { %3773 = vmatpush.msra.mxu3 %v6120_v41 }
0x1c98   :  { %3774 = vmatpush.msra.mxu3 %v6126_v62 }
0x1c9a   :  { %3775 = vmatpush.msra.mxu3 %v6132_v13 }
0x1c9c   :  { %3776 = vmatpush.msra.mxu3 %v6138_v16 }
0x1cf9   :  { %v3593_v41 = vpop.f32.mrf.mxu1 }
0x1cfa   :  { %v3594_v17 = vadd.f32 %v6316_v50, %v3593_v41 }
0x1cfe   :  { %v3553_v35 = vpop.f32.mrf.mxu2  ;;  %v3573_v34 = vpop.f32.mrf.mxu3 }
0x1cff   :  { %v3554_v37 = vadd.f32 %v6569_v57, %v3553_v35  ;;  %v3574_v4 = vadd.f32 %v6570_v10, %v3573_v34 }
0x1d01   :  { %v3653_v59 = vpop.f32.mrf.mxu1 }
0x1d02   :  { %v3654_v20 = vadd.f32 %v6310_v27, %v3653_v59 }
0x1d06   :  { %v3613_v33 = vpop.f32.mrf.mxu2  ;;  %v3633_v9 = vpop.f32.mrf.mxu3 }
0x1d07   :  { %v3614_v53 = vadd.f32 %v6571_v43, %v3613_v33  ;;  %v3634_v51 = vadd.f32 %v6572_v30, %v3633_v9 }
0x1d09   :  { %v3656_v7 = vadd.f32 %v3614_v53, %v3554_v37  ;;  %v3676_v47 = vadd.f32 %v3634_v51, %v3574_v4 }
0x1d0b   :  { %v4198_v18 = vmul.f32 -1.442695, %v3656_v7  ;;  %v4199_v32 = vmul.f32 -1.442695, %v3676_v47  ;;  %v3752_v7 = vstv %s3751_s13 }
0x1d0d   :  { %4386 = vpow2.f32 %v4198_v18 }
0x1d0e   :  { %4388 = vpow2.f32 %v4199_v32 }
0x1d13   :  { %v4387_v22 = vpop.eup %4386 }
0x1d14   :  { %v4389_v63 = vpop.eup %4388  ;;  %v3660_v11 = vadd.f32 1.0, %v4387_v22  ;;  %v4203_v22 = vld [vmem:[%s6510_s2 + $0x38] sm:$0xff] }
0x1d15   :  { %v3680_v12 = vadd.f32 1.0, %v4389_v63 }
0x1d16   :  { %4390 = vrcp.f32 %v3660_v11  ;;  %v3672_v0 = vand.u32 2147483648, %v3660_v11  ;;  %v3670_v39 = vand.u32 2147483647, %v3660_v11  ;;  %vm3666_vm8 = vweird.f32 %v3660_v11 }
0x1d17   :  { %4392 = vrcp.f32 %v3680_v12  ;;  %v3692_v36 = vand.u32 2147483648, %v3680_v12  ;;  %vm3686_vm13 = vweird.f32 %v3680_v12  ;;  %v3690_v14 = vand.u32 2147483647, %v3680_v12 }
0x1d18   :  { %v3673_v3 = vor.u32 1.1754944e-38, %v3672_v0  ;;  %vm3671_vm10 = vcmp.eq.f32.partialorder %v3670_v39, 8.507059e+37 }
0x1d19   :  { %v3693_v15 = vor.u32 1.1754944e-38, %v3692_v36  ;;  %vm3691_vm15 = vcmp.eq.f32.partialorder %v3690_v14, 8.507059e+37 }
0x1d1c   :  { %v4391_v62 = vpop.eup %4390 }
0x1d1d   :  { %v4393_v13 = vpop.eup %4392  ;;  %v3662_v16 = vmul.f32 %v4391_v62, %v3660_v11  ;;  %vm3667_vm6 = vweird.f32 %v4391_v62 }
0x1d1e   :  { %v3682_v49 = vmul.f32 %v4393_v13, %v3680_v12  ;;  %vm3668_vm9 = vmor %vm3666_vm8, %vm3667_vm6  ;;  %vm3687_vm11 = vweird.f32 %v4393_v13 }
0x1d1f   :  { %v3663_v44 = vsub.f32 1.0, %v3662_v16  ;;  %vm3688_vm14 = vmor %vm3686_vm13, %vm3687_vm11 }
0x1d20   :  { %v3683_v60 = vsub.f32 1.0, %v3682_v49 }
0x1d21   :  { %v3664_v31 = vmul.f32 %v4391_v62, %v3663_v44 }
0x1d22   :  { %v3684_v24 = vmul.f32 %v4393_v13, %v3683_v60 }
0x1d23   :  { %v3665_v21 = vadd.f32 %v4391_v62, %v3664_v31 }
0x1d24   :  { %v3685_v19 = vadd.f32 %v4393_v13, %v3684_v24 }
0x1d25   :  { %v3669_v38 = vsel %vm3668_vm9, %v4391_v62, %v3665_v21 }
0x1d26   :  { %v3674_v55 = vsel %vm3671_vm10, %v3673_v3, %v3669_v38  ;;  %v3689_v26 = vsel %vm3688_vm14, %v4393_v13, %v3685_v19 }
0x1d27   :  { %v3696_v5 = vmul.f32 %v3674_v55, %v3654_v20  ;;  %v3694_v42 = vsel %vm3691_vm15, %v3693_v15, %v3689_v26 }
0x1d28   :  { %v3699_v23 = vsub.f32 1.0, %v3694_v42  ;;  %v3701_v45 = vmul.f32 %v3694_v42, %v6395_v54 }
0x1d29   :  { %v3697_v25 = vadd.f32 %v3696_v5, %v3594_v17 }
0x1d2b   :  { %4394 = vtanh.f32 %v3697_v25 }
0x1d31   :  { %v4395_v6 = vpop.eup %4394 }
0x1d32   :  { %v3700_v48 = vmul.f32 %v4395_v6, %v3699_v23 }
0x1d34   :  { %v6463_v35 = vadd.f32 %v3701_v45, %v3700_v48 }
0x1d36   :  { %4200 = vmatmul.msk.f32.vlgmr.msra.gmra.mxu2 %vm218_vm12, %v6463_v35 }
0x1d37   :  { %3876 = vmatpush.msra.mxu2 %v6167_v52 }
0x1d39   :  { %3877 = vmatpush.msra.mxu2 %v6173_v29 }
0x1d3b   :  { %3878 = vmatpush.msra.mxu2 %v6179_v2 }
0x1d3d   :  { %3879 = vmatpush.msra.mxu2 %v6185_v8 }
0x1db9   :  { %v3723_v34 = vpop.f32.mrf.mxu2 }
0x1dba   :  { %v3724_v33 = vadd.f32 %v6331_v58, %v3723_v34 }
0x1dbc   :  { %4201 = vst [vmem:[%s6523_s15 + $0x30] sm:$0xff] %v3724_v33  ;;  %v3728_v54 = vsel %vm65_vm7, %v3724_v33, -inf  ;;  %vm3753_vm7 = vcmp.eq.s32.totalorder %v3752_v7, 1 }
0x1dbd   :  { %3729 = vmax.xlane.f32.xlu0 %v3728_v54 }
0x1e30   :  { %v3730_v9 = vpop.xlane.xlu0 %3729 }
0x1e31   :  { %vm3731_vm0 = vcmp.eq.f32.partialorder %v3728_v54, %v3730_v9 }
0x1e32   :  { %v3732_v52 = vsel %vm3731_vm0, %v4748_v28, 128 }
0x1e33   :  { %v3734_v29 = vshra.s32 %v3732_v52, 16  ;;  %v3733_v2 = vand.u32 65535, %v3732_v52 }
0x1e35   :  { %v3736_v37 = vcvt.s32.f32 %v3734_v29  ;;  %v3735_v4 = vcvt.s32.f32 %v3733_v2 }
0x1e37   :  { %3737 = vmin.xlane.f32.xlu0 %v3736_v37 }
0x1eaa   :  { %v3738_v8 = vpop.xlane.xlu0 %3737 }
0x1eab   :  { %vm3739_vm2 = vcmp.eq.f32.partialorder %v3736_v37, %v3738_v8  ;;  %v3744_v51 = vcvt.f32.s32 %v3738_v8 }
0x1eac   :  { %v3740_v53 = vsel %vm3739_vm2, %v3735_v4, inf }
0x1ead   :  { %3741 = vmin.xlane.f32.xlu0 %v3740_v53  ;;  %v3745_v18 = vshll.u32 %v3744_v51, 16 }
0x1f20   :  { %v3742_v47 = vpop.xlane.xlu0 %3741 }
0x1f21   :  { %v3743_v32 = vcvt.f32.s32 %v3742_v47 }
0x1f23   :  { %v3746_v63 = vadd.s32 %v3745_v18, %v3743_v32 }
0x1f25   :  { %v3754_v11 = vsel %vm3753_vm7, %v4203_v22, %v3746_v63 }
0x1f26   :  { %3756 = vperm.xlu1 %4221, %v3754_v11  }
0x1f98   :  { %v3757_v12 = vpop.permute.xlu1 %3756 }
0x1f99   :  { %vm3758_vm3 = vcmp.eq.s32.totalorder %v4748_v28, %v3757_v12 }
0x1f9a   :  { %4205 = vmatmul.msk.f32.vlgmr.msra.gmra.mxu3 %vm3758_vm3, %v6545_v1 }
0x201d   :  { %v3778_v41 = vpop.f32.mrf.mxu3 }
0x201e   :  { %4206 = vmatmul.msk.f32.vlgmr.msrb.gmra.mxu1 %vm145_vm1, %v3778_v41  ;;  %4207 = vmatmul.msk.f32.vlgmr.msrb.gmra.mxu2 %vm145_vm1, %v3778_v41 }
0x201f   :  { %4208 = vmatmul.msk.f32.vlgmr.msrb.gmra.mxu0 %vm145_vm1, %v3778_v41  ;;  %3966 = vmatpush.msrb.mxu1 %v6230_v56 }
0x2021   :  { %3967 = vmatpush.msrb.mxu1 %v6238_v40 }
0x2023   :  { %3968 = vmatpush.msrb.mxu1 %v6246_v46 }
0x2025   :  { %3969 = vmatpush.msrb.mxu1 %v6253_v61 }
0x2026   :  { %4209 = vmatmul.msk.f32.vlgmr.msra.gmra.mxu1 %vm218_vm12, %v6463_v35  ;;  %4210 = vmatmul.msk.f32.vlgmr.msra.gmra.mxu2 %vm218_vm12, %v6463_v35 }
0x2027   :  { %4211 = vmatmul.msk.f32.vlgmr.msra.gmra.mxu0 %vm218_vm12, %v6463_v35 }
0x209b   :  { %v3801_v28 = vpop.f32.mrf.mxu1 }
0x209c   :  { %v3802_v56 = vadd.f32 %v6569_v57, %v3801_v28  ;;  %v3841_v39 = vpop.f32.mrf.mxu0 }
0x209d   :  { %v3842_v25 = vadd.f32 %v6316_v50, %v3841_v39 }
0x20a1   :  { %v3821_v1 = vpop.f32.mrf.mxu2 }
0x20a2   :  { %v3822_v61 = vadd.f32 %v6570_v10, %v3821_v1 }
0x20a3   :  { %v3861_v62 = vpop.f32.mrf.mxu1 }
0x20a4   :  { %v3862_v40 = vadd.f32 %v6571_v43, %v3861_v62  ;;  %v3901_v55 = vpop.f32.mrf.mxu0 }
0x20a5   :  { %v3902_v5 = vadd.f32 %v6310_v27, %v3901_v55 }
0x20a6   :  { %v3904_v13 = vadd.f32 %v3862_v40, %v3802_v56 }
0x20a8   :  { %v4212_v46 = vmul.f32 -1.442695, %v3904_v13 }
0x20a9   :  { %v3881_v16 = vpop.f32.mrf.mxu2 }
0x20aa   :  { %4396 = vpow2.f32 %v4212_v46  ;;  %v3882_v49 = vadd.f32 %v6572_v30, %v3881_v16 }
0x20ac   :  { %v3924_v44 = vadd.f32 %v3882_v49, %v3822_v61 }
0x20ae   :  { %v4213_v0 = vmul.f32 -1.442695, %v3924_v44 }
0x20b0   :  { %v4397_v60 = vpop.eup %4396  ;;  %4398 = vpow2.f32 %v4213_v0 }
0x20b1   :  { %v3908_v31 = vadd.f32 1.0, %v4397_v60 }
0x20b3   :  { %4400 = vrcp.f32 %v3908_v31  ;;  %v3920_v3 = vand.u32 2147483648, %v3908_v31  ;;  %v3918_v10 = vand.u32 2147483647, %v3908_v31  ;;  %vm3914_vm4 = vweird.f32 %v3908_v31 }
0x20b5   :  { %v3921_v17 = vor.u32 1.1754944e-38, %v3920_v3  ;;  %vm3919_vm6 = vcmp.eq.f32.partialorder %v3918_v10, 8.507059e+37 }
0x20b6   :  { %v4399_v59 = vpop.eup %4398 }
0x20b7   :  { %v3928_v24 = vadd.f32 1.0, %v4399_v59 }
0x20b9   :  { %v4401_v57 = vpop.eup %4400  ;;  %4402 = vrcp.f32 %v3928_v24  ;;  %v3940_v23 = vand.u32 2147483648, %v3928_v24  ;;  %v3938_v6 = vand.u32 2147483647, %v3928_v24  ;;  %vm3934_vm9 = vweird.f32 %v3928_v24 }
0x20ba   :  { %v3910_v43 = vmul.f32 %v4401_v57, %v3908_v31  ;;  %vm3915_vm1 = vweird.f32 %v4401_v57 }
0x20bb   :  { %vm3916_vm5 = vmor %vm3914_vm4, %vm3915_vm1  ;;  %v3941_v33 = vor.u32 1.1754944e-38, %v3940_v23  ;;  %vm3939_vm11 = vcmp.eq.f32.partialorder %v3938_v6, 8.507059e+37 }
0x20bc   :  { %v3911_v21 = vsub.f32 1.0, %v3910_v43 }
0x20be   :  { %v3912_v20 = vmul.f32 %v4401_v57, %v3911_v21 }
0x20bf   :  { %v4403_v38 = vpop.eup %4402 }
0x20c0   :  { %v3913_v30 = vadd.f32 %v4401_v57, %v3912_v20  ;;  %v3930_v19 = vmul.f32 %v4403_v38, %v3928_v24  ;;  %vm3935_vm8 = vweird.f32 %v4403_v38 }
0x20c1   :  { %vm3936_vm10 = vmor %vm3934_vm9, %vm3935_vm8 }
0x20c2   :  { %v3917_v36 = vsel %vm3916_vm5, %v4401_v57, %v3913_v30  ;;  %v3931_v14 = vsub.f32 1.0, %v3930_v19 }
0x20c3   :  { %v3922_v26 = vsel %vm3919_vm6, %v3921_v17, %v3917_v36 }
0x20c4   :  { %v3944_v15 = vmul.f32 %v3922_v26, %v3902_v5  ;;  %v3932_v42 = vmul.f32 %v4403_v38, %v3931_v14 }
0x20c6   :  { %v3945_v48 = vadd.f32 %v3944_v15, %v3842_v25  ;;  %v3933_v45 = vadd.f32 %v4403_v38, %v3932_v42 }
0x20c8   :  { %4404 = vtanh.f32 %v3945_v48  ;;  %v3937_v34 = vsel %vm3936_vm10, %v4403_v38, %v3933_v45 }
0x20c9   :  { %v3942_v27 = vsel %vm3939_vm11, %v3941_v33, %v3937_v34 }
0x20ca   :  { %v3947_v54 = vsub.f32 1.0, %v3942_v27  ;;  %v3949_v50 = vmul.f32 %v3942_v27, %v6463_v35 }
0x20ce   :  { %v4405_v9 = vpop.eup %4404 }
0x20cf   :  { %v3948_v52 = vmul.f32 %v4405_v9, %v3947_v54 }
0x20d1   :  { %v3950_v29 = vadd.f32 %v3949_v50, %v3948_v52 }
0x20d3   :  { %4214 = vmatmul.msk.f32.vlgmr.msrb.gmra.mxu1 %vm218_vm12, %v3950_v29 }
0x2150   :  { %v3971_v37 = vpop.f32.mrf.mxu1 }
0x2151   :  { %v3972_v2 = vadd.f32 %v6331_v58, %v3971_v37 }
0x2153   :  { %4215 = vst [vmem:[%s6523_s15 + $0x38] sm:$0xff] %v3972_v2 }
0x2154   :  { %3980 = vsyncpa [#allocation3], 1 }

</bundles_post_ra>
